<compile_context>
chip_gen: v7x
topology: tpu7x:2x2x1
jax: 0.10.0
libtpu: 0.0.40
codegen_flags: <defaults>
</compile_context>

<pallas_src>
import functools
import math

import jax
import jax.numpy as jnp
from jax.experimental import pallas as pl
from jax.experimental.pallas import tpu as pltpu


_EPS = 1e-5
_VMEM_LIMIT = 32 * 1024 * 1024   # explicit scoped-VMEM budget (safe on v5e/v6e/v7x)


# ----------------------------------------------------------------------------
# in-kernel helpers
# ----------------------------------------------------------------------------

def _layer_norm(z, g, b, eps):
    mu = jnp.mean(z, axis=-1, keepdims=True)
    var = jnp.mean(jnp.square(z - mu), axis=-1, keepdims=True)
    return (z - mu) * jax.lax.rsqrt(var + eps) * g + b


def _mha(q_in, k_in, v_in, wq, bq, wk, bk, wv, bv, wo, bo, *, nhead):
    """Multi-head attention for one batch element on 2D (rows, E) slabs.

    * 1/sqrt(head_dim) is folded into (wq, bq) at init time.
    * Heads handled via batched einsum contractions (no per-head Python
      unroll, no lane-unaligned column slices, no concatenates).
    """
    L, E = q_in.shape
    S = k_in.shape[0]
    hd = E // nhead

    q = jnp.dot(q_in, wq, preferred_element_type=jnp.float32) + bq   # pre-scaled
    k = jnp.dot(k_in, wk, preferred_element_type=jnp.float32) + bk
    v = jnp.dot(v_in, wv, preferred_element_type=jnp.float32) + bv

    q3 = q.reshape(L, nhead, hd)
    k3 = k.reshape(S, nhead, hd)
    v3 = v.reshape(S, nhead, hd)

    # scores: (H, L, S), contraction over hd (no explicit k transpose)
    s = jnp.einsum('lhd,shd->hls', q3, k3, preferred_element_type=jnp.float32)
    m = jnp.max(s, axis=-1, keepdims=True)
    p = jnp.exp(s - m)
    denom = jnp.sum(p, axis=-1, keepdims=True)
    p = p * pl.reciprocal(denom, approx=False)        # exact EUP recip, off VALU path

    o = jnp.einsum('hls,shd->lhd', p, v3, preferred_element_type=jnp.float32)
    attn = o.reshape(L, E)
    return jnp.dot(attn, wo, preferred_element_type=jnp.float32) + bo


def _bytes(*arrays):
    return int(sum(a.size * a.dtype.itemsize for a in arrays))


# ----------------------------------------------------------------------------
# fused ENCODER layer kernel (one grid step per batch element)
#   y   = LN1( x + OutProj( MHA(q=k=x+pos, v=x) ) )
#   out = LN2( y + W2( relu(W1 y) ) )
# ----------------------------------------------------------------------------

def _encoder_layer_kernel(x_ref, pos_ref,
                          wq_ref, bq_ref, wk_ref, bk_ref, wv_ref, bv_ref,
                          wo_ref, bo_ref, ln1w_ref, ln1b_ref,
                          w1_ref, b1_ref, w2_ref, b2_ref, ln2w_ref, ln2b_ref,
                          o_ref, *, nhead, eps):
    x = x_ref[...].astype(jnp.float32)       # (S, E)
    pos = pos_ref[...].astype(jnp.float32)
    qk_in = x + pos

    att = _mha(qk_in, qk_in, x,
               wq_ref[...], bq_ref[...], wk_ref[...], bk_ref[...],
               wv_ref[...], bv_ref[...], wo_ref[...], bo_ref[...], nhead=nhead)
    y = _layer_norm(x + att, ln1w_ref[...], ln1b_ref[...], eps)

    h = jnp.maximum(
        jnp.dot(y, w1_ref[...], preferred_element_type=jnp.float32) + b1_ref[...],
        0.0)
    f = jnp.dot(h, w2_ref[...], preferred_element_type=jnp.float32) + b2_ref[...]
    out = _layer_norm(y + f, ln2w_ref[...], ln2b_ref[...], eps)
    o_ref[...] = out.astype(o_ref.dtype)


def encoder_layer(x, pos, lp, *, nhead, eps=_EPS):
    N, S, E = x.shape
    a = lp["self_attn"]
    F = lp["linear1_w_t"].shape[1]

    act = pl.BlockSpec((None, S, E), lambda n: (n, 0, 0))

    def wspec(arr):
        return pl.BlockSpec(arr.shape, lambda n: (0,) * arr.ndim)

    operands = (x, pos,
                a["w_q"], a["b_q"], a["w_k"], a["b_k"], a["w_v"], a["b_v"],
                a["w_out"], a["b_out"], lp["norm1_w"], lp["norm1_b"],
                lp["linear1_w_t"], lp["linear1_b"],
                lp["linear2_w_t"], lp["linear2_b"],
                lp["norm2_w"], lp["norm2_b"])
    in_specs = [act, act] + [wspec(o) for o in operands[2:]]

    flops = N * (8 * S * E * E + 4 * S * S * E + 4 * S * E * F)
    transc = N * nhead * S * S
    bytes_accessed = _bytes(*operands) + N * S * E * x.dtype.itemsize

    kernel = functools.partial(_encoder_layer_kernel, nhead=nhead, eps=eps)
    return pl.pallas_call(
        kernel,
        out_shape=jax.ShapeDtypeStruct((N, S, E), x.dtype),
        grid=(N,),
        in_specs=in_specs,
        out_specs=act,
        compiler_params=pltpu.CompilerParams(
            dimension_semantics=("parallel",),
            vmem_limit_bytes=_VMEM_LIMIT),
        cost_estimate=pl.CostEstimate(flops=flops, transcendentals=transc,
                                      bytes_accessed=bytes_accessed),
    )(*operands)


# ----------------------------------------------------------------------------
# fused DECODER layer kernel (one grid step per batch element)
#   t   = LN1( tgt + SelfAttn(q=k=tgt+qpos, v=tgt) )
#   t   = LN2( t + CrossAttn(q=t+qpos, k=mem+pos, v=mem) )
#   out = LN3( t + W2(relu(W1 t)) )          [+ final decoder LN if last layer]
# ----------------------------------------------------------------------------

def _decoder_layer_kernel(tgt_ref, qpos_ref, mem_ref, mpos_ref,
                          sa_wq, sa_bq, sa_wk, sa_bk, sa_wv, sa_bv, sa_wo, sa_bo,
                          ln1w, ln1b,
                          ca_wq, ca_bq, ca_wk, ca_bk, ca_wv, ca_bv, ca_wo, ca_bo,
                          ln2w, ln2b,
                          w1, b1, w2, b2, ln3w, ln3b,
                          fin_w, fin_b,
                          o_ref, *, nhead, eps, final_norm):
    tgt = tgt_ref[...].astype(jnp.float32)    # (Q, E)
    qpos = qpos_ref[...].astype(jnp.float32)  # (Q, E)
    mem = mem_ref[...].astype(jnp.float32)    # (S, E)
    mpos = mpos_ref[...].astype(jnp.float32)

    # self-attention + residual + LN
    qk = tgt + qpos
    att = _mha(qk, qk, tgt,
               sa_wq[...], sa_bq[...], sa_wk[...], sa_bk[...],
               sa_wv[...], sa_bv[...], sa_wo[...], sa_bo[...], nhead=nhead)
    t = _layer_norm(tgt + att, ln1w[...], ln1b[...], eps)

    # cross-attention + residual + LN
    att = _mha(t + qpos, mem + mpos, mem,
               ca_wq[...], ca_bq[...], ca_wk[...], ca_bk[...],
               ca_wv[...], ca_bv[...], ca_wo[...], ca_bo[...], nhead=nhead)
    t = _layer_norm(t + att, ln2w[...], ln2b[...], eps)

    # FFN + residual + LN
    h = jnp.maximum(
        jnp.dot(t, w1[...], preferred_element_type=jnp.float32) + b1[...], 0.0)
    f = jnp.dot(h, w2[...], preferred_element_type=jnp.float32) + b2[...]
    out = _layer_norm(t + f, ln3w[...], ln3b[...], eps)

    if final_norm:   # fused final decoder LayerNorm (static flag, last layer only)
        out = _layer_norm(out, fin_w[...], fin_b[...], eps)
    o_ref[...] = out.astype(o_ref.dtype)


def decoder_layer(tgt, qpos, mem, mpos, lp, dec_norm_w, dec_norm_b,
                  *, nhead, final_norm, eps=_EPS):
    N, Q, E = tgt.shape
    S = mem.shape[1]
    sa = lp["self_attn"]
    ca = lp["cross_attn"]
    F = lp["linear1_w_t"].shape[1]

    tgt_spec = pl.BlockSpec((None, Q, E), lambda n: (n, 0, 0))
    mem_spec = pl.BlockSpec((None, S, E), lambda n: (n, 0, 0))

    def wspec(arr):
        return pl.BlockSpec(arr.shape, lambda n: (0,) * arr.ndim)

    operands = (
        tgt, qpos, mem, mpos,
        sa["w_q"], sa["b_q"], sa["w_k"], sa["b_k"], sa["w_v"], sa["b_v"],
        sa["w_out"], sa["b_out"], lp["norm1_w"], lp["norm1_b"],
        ca["w_q"], ca["b_q"], ca["w_k"], ca["b_k"], ca["w_v"], ca["b_v"],
        ca["w_out"], ca["b_out"], lp["norm2_w"], lp["norm2_b"],
        lp["linear1_w_t"], lp["linear1_b"], lp["linear2_w_t"], lp["linear2_b"],
        lp["norm3_w"], lp["norm3_b"],
        dec_norm_w, dec_norm_b)
    in_specs = ([tgt_spec, wspec(qpos), mem_spec, mem_spec]
                + [wspec(o) for o in operands[4:]])

    flops = N * (8 * Q * E * E + 4 * Q * Q * E            # self-attn
                 + 4 * Q * E * E + 4 * S * E * E + 4 * Q * S * E   # cross-attn
                 + 4 * Q * E * F)                          # FFN
    transc = N * nhead * (Q * Q + Q * S)
    bytes_accessed = _bytes(*operands) + N * Q * E * tgt.dtype.itemsize

    kernel = functools.partial(_decoder_layer_kernel, nhead=nhead, eps=eps,
                               final_norm=final_norm)
    return pl.pallas_call(
        kernel,
        out_shape=jax.ShapeDtypeStruct((N, Q, E), tgt.dtype),
        grid=(N,),
        in_specs=in_specs,
        out_specs=tgt_spec,
        compiler_params=pltpu.CompilerParams(
            dimension_semantics=("parallel",),
            vmem_limit_bytes=_VMEM_LIMIT),
        cost_estimate=pl.CostEstimate(flops=flops, transcendentals=transc,
                                      bytes_accessed=bytes_accessed),
    )(*operands)


# ----------------------------------------------------------------------------
# Transformer forward (stage=1, normalize_before=False, return_intermediate=False)
# ----------------------------------------------------------------------------

def transformer_forward(params, srcs, masks, pos_embeds, query_embed, *, nhead):
    # --- flatten feature levels + add level embedding ---
    src_list, pos_list = [], []
    for lvl, (src, mask, pos_embed) in enumerate(zip(srcs, masks, pos_embeds)):
        bs, c, h, w = src.shape
        s = src.reshape(bs, c, h * w).transpose(0, 2, 1)           # (N, hw, E)
        p = pos_embed.reshape(bs, c, h * w).transpose(0, 2, 1)
        p = p + params["level_embed"][lvl].reshape(1, 1, c)
        src_list.append(s)
        pos_list.append(p)
    src_flat = jnp.concatenate(src_list, axis=1)                   # (N, S, E)
    pos_flat = jnp.concatenate(pos_list, axis=1)
    # TODO(synk): key_padding_mask (mask_flatten) not applied inside attention.

    N, S, E = src_flat.shape

    # --- encoder: one fused pallas_call per layer ---
    x = src_flat
    for lp in params["encoder_layers"]:
        x = encoder_layer(x, pos_flat, lp, nhead=nhead)
    memory = x                                                     # (N, S, E)

    # --- decoder: tgt = zeros, query pos = first d_model columns of query_embed
    Q = query_embed.shape[0]
    qpos = query_embed[:, :E]                                      # (Q, E), shared over batch
    out = jnp.zeros((N, Q, E), dtype=src_flat.dtype)

    nl = len(params["decoder_layers"])
    for i, lp in enumerate(params["decoder_layers"]):
        out = decoder_layer(out, qpos, memory, pos_flat, lp,
                            params["decoder_norm_w"], params["decoder_norm_b"],
                            nhead=nhead, final_norm=(i == nl - 1))

    # match PyTorch output layouts (seq-first)
    hs = out.transpose(1, 0, 2)[None]                              # (1, Q, N, E)
    memory_out = memory.transpose(1, 0, 2)                         # (S, N, E)
    return hs, memory_out, None, None


# ----------------------------------------------------------------------------
# deterministic parameter init
#   * all weights pre-transposed (K-major)
#   * Q/K/V projections pre-split (no fused (E,3E) weight, no in-kernel slicing)
#   * 1/sqrt(head_dim) folded into (w_q, b_q)
# ----------------------------------------------------------------------------

def init_params(key, d_model, nhead, dim_feedforward,
                num_encoder_layers, num_decoder_layers, num_feature_levels):
    hd = d_model // nhead
    scale = 1.0 / math.sqrt(hd)

    def xavier(k, shape):
        bound = math.sqrt(6.0 / (shape[0] + shape[1]))
        return jax.random.uniform(k, shape, jnp.float32, -bound, bound)

    def small(k, shape):
        return (0.02 * jax.random.normal(k, shape)).astype(jnp.float32)

    def mha(k):
        ks = jax.random.split(k, 8)
        return {
            "w_q": xavier(ks[0], (d_model, d_model)) * scale,   # scale folded in
            "b_q": small(ks[1], (1, d_model)) * scale,
            "w_k": xavier(ks[2], (d_model, d_model)),
            "b_k": small(ks[3], (1, d_model)),
            "w_v": xavier(ks[4], (d_model, d_model)),
            "b_v": small(ks[5], (1, d_model)),
            "w_out": xavier(ks[6], (d_model, d_model)),
            "b_out": small(ks[7], (1, d_model)),
        }

    def ffn(k):
        k1, k2, k3, k4 = jax.random.split(k, 4)
        return {
            "linear1_w_t": xavier(k1, (d_model, dim_feedforward)),
            "linear1_b": small(k2, (1, dim_feedforward)),
            "linear2_w_t": xavier(k3, (dim_feedforward, d_model)),
            "linear2_b": small(k4, (1, d_model)),
        }

    def ln():
        return (jnp.ones((1, d_model), jnp.float32),
                jnp.zeros((1, d_model), jnp.float32))

    keys = jax.random.split(key, num_encoder_layers + num_decoder_layers + 1)
    enc_layers = []
    for i in range(num_encoder_layers):
        k1, k2 = jax.random.split(keys[i], 2)
        g1, b1 = ln(); g2, b2 = ln()
        layer = {"self_attn": mha(k1), "norm1_w": g1, "norm1_b": b1,
                 "norm2_w": g2, "norm2_b": b2}
        layer.update(ffn(k2))
        enc_layers.append(layer)

    dec_layers = []
    for i in range(num_decoder_layers):
        k1, k2, k3 = jax.random.split(keys[num_encoder_layers + i], 3)
        g1, b1 = ln(); g2, b2 = ln(); g3, b3 = ln()
        layer = {"self_attn": mha(k1), "cross_attn": mha(k2),
                 "norm1_w": g1, "norm1_b": b1, "norm2_w": g2, "norm2_b": b2,
                 "norm3_w": g3, "norm3_b": b3}
        layer.update(ffn(k3))
        dec_layers.append(layer)

    gd, bd = ln()
    return {
        "encoder_layers": enc_layers,
        "decoder_layers": dec_layers,
        "decoder_norm_w": gd, "decoder_norm_b": bd,
        "level_embed": jax.random.normal(
            keys[-1], (num_feature_levels, d_model)).astype(jnp.float32),
    }


# ----------------------------------------------------------------------------
# main
# ----------------------------------------------------------------------------

if __name__ == "__main__":
    d_model = 32
    nhead = 4
    dim_feedforward = 64
    num_encoder_layers = 2
    num_decoder_layers = 2
    num_queries = 8
    num_feature_levels = 1
    bs, fh, fw = 2, 4, 4

    key = jax.random.PRNGKey(0)
    k_src, k_pos, k_q, k_par = jax.random.split(key, 4)

    srcs = [jax.random.normal(k_src, (bs, d_model, fh, fw), dtype=jnp.float32)]
    masks = [jnp.zeros((bs, fh, fw), dtype=jnp.bool_)]            # no padding
    pos_embeds = [jax.random.normal(k_pos, (bs, d_model, fh, fw), dtype=jnp.float32)]
    query_embed = jax.random.normal(k_q, (num_queries, 2 * d_model), dtype=jnp.float32)

    params = init_params(k_par, d_model, nhead, dim_feedforward,
                         num_encoder_layers, num_decoder_layers, num_feature_levels)

    fwd = jax.jit(functools.partial(transformer_forward, nhead=nhead))
    hs, memory, _, _ = fwd(params, srcs, masks, pos_embeds, query_embed)
    hs = jax.block_until_ready(hs)
    memory = jax.block_until_ready(memory)

    assert hs.shape == (1, num_queries, bs, d_model), hs.shape
    assert memory.shape == (fh * fw * num_feature_levels, bs, d_model), memory.shape
    assert bool(jnp.all(jnp.isfinite(hs))) and bool(jnp.all(jnp.isfinite(memory)))
    print("KERNEL_OK")
</pallas_src>

<mosaic_0001>
module attributes {stable_mosaic.version = 11 : i64} {
  func.func @_encoder_layer_kernel(%arg0: i32, %arg1: memref<1x16x32xf32, #tpu.memory_space<vmem>>, %arg2: memref<1x16x32xf32, #tpu.memory_space<vmem>>, %arg3: memref<32x32xf32, #tpu.memory_space<vmem>>, %arg4: memref<1x32xf32, #tpu.memory_space<vmem>>, %arg5: memref<32x32xf32, #tpu.memory_space<vmem>>, %arg6: memref<1x32xf32, #tpu.memory_space<vmem>>, %arg7: memref<32x32xf32, #tpu.memory_space<vmem>>, %arg8: memref<1x32xf32, #tpu.memory_space<vmem>>, %arg9: memref<32x32xf32, #tpu.memory_space<vmem>>, %arg10: memref<1x32xf32, #tpu.memory_space<vmem>>, %arg11: memref<1x32xf32, #tpu.memory_space<vmem>>, %arg12: memref<1x32xf32, #tpu.memory_space<vmem>>, %arg13: memref<32x64xf32, #tpu.memory_space<vmem>>, %arg14: memref<1x64xf32, #tpu.memory_space<vmem>>, %arg15: memref<64x32xf32, #tpu.memory_space<vmem>>, %arg16: memref<1x32xf32, #tpu.memory_space<vmem>>, %arg17: memref<1x32xf32, #tpu.memory_space<vmem>>, %arg18: memref<1x32xf32, #tpu.memory_space<vmem>>, %arg19: memref<1x16x32xf32, #tpu.memory_space<vmem>>) attributes {dimension_semantics = [#tpu.dimension_semantics<parallel>], iteration_bounds = array<i64: 2>, scalar_prefetch = 0 : i64, scratch_operands = 0 : i64, tpu.core_type = #tpu.core_type<tc>, window_params = [{transform_indices = @transform_0, window_bounds = array<i64: 1, 16, 32>}, {transform_indices = @transform_1, window_bounds = array<i64: 1, 16, 32>}, {pipeline_mode = #tpu.pipeline_mode<synchronous>, transform_indices = @transform_2, window_bounds = array<i64: 32, 32>}, {pipeline_mode = #tpu.pipeline_mode<synchronous>, transform_indices = @transform_3, window_bounds = array<i64: 1, 32>}, {pipeline_mode = #tpu.pipeline_mode<synchronous>, transform_indices = @transform_4, window_bounds = array<i64: 32, 32>}, {pipeline_mode = #tpu.pipeline_mode<synchronous>, transform_indices = @transform_5, window_bounds = array<i64: 1, 32>}, {pipeline_mode = #tpu.pipeline_mode<synchronous>, transform_indices = @transform_6, window_bounds = array<i64: 32, 32>}, {pipeline_mode = #tpu.pipeline_mode<synchronous>, transform_indices = @transform_7, window_bounds = array<i64: 1, 32>}, {pipeline_mode = #tpu.pipeline_mode<synchronous>, transform_indices = @transform_8, window_bounds = array<i64: 32, 32>}, {pipeline_mode = #tpu.pipeline_mode<synchronous>, transform_indices = @transform_9, window_bounds = array<i64: 1, 32>}, {pipeline_mode = #tpu.pipeline_mode<synchronous>, transform_indices = @transform_10, window_bounds = array<i64: 1, 32>}, {pipeline_mode = #tpu.pipeline_mode<synchronous>, transform_indices = @transform_11, window_bounds = array<i64: 1, 32>}, {pipeline_mode = #tpu.pipeline_mode<synchronous>, transform_indices = @transform_12, window_bounds = array<i64: 32, 64>}, {pipeline_mode = #tpu.pipeline_mode<synchronous>, transform_indices = @transform_13, window_bounds = array<i64: 1, 64>}, {pipeline_mode = #tpu.pipeline_mode<synchronous>, transform_indices = @transform_14, window_bounds = array<i64: 64, 32>}, {pipeline_mode = #tpu.pipeline_mode<synchronous>, transform_indices = @transform_15, window_bounds = array<i64: 1, 32>}, {pipeline_mode = #tpu.pipeline_mode<synchronous>, transform_indices = @transform_16, window_bounds = array<i64: 1, 32>}, {pipeline_mode = #tpu.pipeline_mode<synchronous>, transform_indices = @transform_17, window_bounds = array<i64: 1, 32>}, {transform_indices = @transform_18, window_bounds = array<i64: 1, 16, 32>}]} {
    %c0 = arith.constant 0 : index
    %c0_0 = arith.constant 0 : index
    %c0_1 = arith.constant 0 : index
    %0 = vector.load %arg1[%c0, %c0_0, %c0_1] : memref<1x16x32xf32, #tpu.memory_space<vmem>>, vector<1x16x32xf32>
    %1 = vector.shape_cast %0 : vector<1x16x32xf32> to vector<16x32xf32>
    %c0_2 = arith.constant 0 : index
    %c0_3 = arith.constant 0 : index
    %c0_4 = arith.constant 0 : index
    %2 = vector.load %arg2[%c0_2, %c0_3, %c0_4] : memref<1x16x32xf32, #tpu.memory_space<vmem>>, vector<1x16x32xf32>
    %3 = vector.shape_cast %2 : vector<1x16x32xf32> to vector<16x32xf32>
    %4 = arith.addf %1, %3 : vector<16x32xf32>
    %c0_5 = arith.constant 0 : index
    %c0_6 = arith.constant 0 : index
    %5 = vector.load %arg3[%c0_5, %c0_6] : memref<32x32xf32, #tpu.memory_space<vmem>>, vector<32x32xf32>
    %c0_7 = arith.constant 0 : index
    %c0_8 = arith.constant 0 : index
    %6 = vector.load %arg4[%c0_7, %c0_8] : memref<1x32xf32, #tpu.memory_space<vmem>>, vector<1x32xf32>
    %c0_9 = arith.constant 0 : index
    %c0_10 = arith.constant 0 : index
    %7 = vector.load %arg5[%c0_9, %c0_10] : memref<32x32xf32, #tpu.memory_space<vmem>>, vector<32x32xf32>
    %c0_11 = arith.constant 0 : index
    %c0_12 = arith.constant 0 : index
    %8 = vector.load %arg6[%c0_11, %c0_12] : memref<1x32xf32, #tpu.memory_space<vmem>>, vector<1x32xf32>
    %c0_13 = arith.constant 0 : index
    %c0_14 = arith.constant 0 : index
    %9 = vector.load %arg7[%c0_13, %c0_14] : memref<32x32xf32, #tpu.memory_space<vmem>>, vector<32x32xf32>
    %c0_15 = arith.constant 0 : index
    %c0_16 = arith.constant 0 : index
    %10 = vector.load %arg8[%c0_15, %c0_16] : memref<1x32xf32, #tpu.memory_space<vmem>>, vector<1x32xf32>
    %c0_17 = arith.constant 0 : index
    %c0_18 = arith.constant 0 : index
    %11 = vector.load %arg9[%c0_17, %c0_18] : memref<32x32xf32, #tpu.memory_space<vmem>>, vector<32x32xf32>
    %c0_19 = arith.constant 0 : index
    %c0_20 = arith.constant 0 : index
    %12 = vector.load %arg10[%c0_19, %c0_20] : memref<1x32xf32, #tpu.memory_space<vmem>>, vector<1x32xf32>
    %cst = arith.constant dense<0.000000e+00> : vector<16x32xf32>
    %13 = tpu.matmul %4, %5, %cst {dimension_numbers = #tpu.dot_dimension_numbers<[1], [0], [0], [1], [0, 0, 1, 1], [], []>} : vector<16x32xf32>, vector<32x32xf32>, vector<16x32xf32> -> vector<16x32xf32>
    %14 = vector.broadcast %6 : vector<1x32xf32> to vector<16x32xf32>
    %15 = arith.addf %13, %14 : vector<16x32xf32>
    %cst_21 = arith.constant dense<0.000000e+00> : vector<16x32xf32>
    %16 = tpu.matmul %4, %7, %cst_21 {dimension_numbers = #tpu.dot_dimension_numbers<[1], [0], [0], [1], [0, 0, 1, 1], [], []>} : vector<16x32xf32>, vector<32x32xf32>, vector<16x32xf32> -> vector<16x32xf32>
    %17 = vector.broadcast %8 : vector<1x32xf32> to vector<16x32xf32>
    %18 = arith.addf %16, %17 : vector<16x32xf32>
    %cst_22 = arith.constant dense<0.000000e+00> : vector<16x32xf32>
    %19 = tpu.matmul %1, %9, %cst_22 {dimension_numbers = #tpu.dot_dimension_numbers<[1], [0], [0], [1], [0, 0, 1, 1], [], []>} : vector<16x32xf32>, vector<32x32xf32>, vector<16x32xf32> -> vector<16x32xf32>
    %20 = vector.broadcast %10 : vector<1x32xf32> to vector<16x32xf32>
    %21 = arith.addf %19, %20 : vector<16x32xf32>
    %22 = vector.shape_cast %15 : vector<16x32xf32> to vector<16x4x8xf32>
    %23 = vector.shape_cast %18 : vector<16x32xf32> to vector<16x4x8xf32>
    %24 = vector.shape_cast %21 : vector<16x32xf32> to vector<16x4x8xf32>
    "tpu.trace_start"() <{level = 10 : i32, message = "lhd,shd->hls"}> : () -> ()
    %cst_23 = arith.constant dense<0.000000e+00> : vector<4x16x16xf32>
    %25 = tpu.matmul %22, %23, %cst_23 {dimension_numbers = #tpu.dot_dimension_numbers<[2], [2], [0], [0], [0, 1, 0, 0, 1, 0], [1], [1]>} : vector<16x4x8xf32>, vector<16x4x8xf32>, vector<4x16x16xf32> -> vector<4x16x16xf32>
    "tpu.trace_stop"() : () -> ()
    %cst_24 = arith.constant dense<0xFF800000> : vector<4x16xf32>
    %26 = vector.multi_reduction <maximumf>, %25, %cst_24 [2] : vector<4x16x16xf32> to vector<4x16xf32>
    %27 = vector.shape_cast %26 : vector<4x16xf32> to vector<4x16x1xf32>
    %28 = vector.broadcast %27 : vector<4x16x1xf32> to vector<4x16x16xf32>
    %29 = arith.subf %25, %28 : vector<4x16x16xf32>
    %30 = math.exp %29 : vector<4x16x16xf32>
    %cst_25 = arith.constant dense<0.000000e+00> : vector<4x16xf32>
    %31 = vector.multi_reduction <add>, %30, %cst_25 [2] : vector<4x16x16xf32> to vector<4x16xf32>
    %32 = vector.shape_cast %31 : vector<4x16xf32> to vector<4x16x1xf32>
    %33 = tpu.reciprocal %32 : vector<4x16x1xf32> -> vector<4x16x1xf32>
    %34 = vector.broadcast %33 : vector<4x16x1xf32> to vector<4x16x16xf32>
    %35 = arith.mulf %30, %34 : vector<4x16x16xf32>
    "tpu.trace_start"() <{level = 10 : i32, message = "hls,shd->lhd"}> : () -> ()
    %cst_26 = arith.constant dense<0.000000e+00> : vector<4x8x16xf32>
    %36 = tpu.matmul %24, %35, %cst_26 {dimension_numbers = #tpu.dot_dimension_numbers<[0], [2], [2], [1], [0, 1, 0, 2, 1, 1], [1], [0]>} : vector<16x4x8xf32>, vector<4x16x16xf32>, vector<4x8x16xf32> -> vector<4x8x16xf32>
    %37 = tpu.transpose %36, [2, 0, 1] : vector<4x8x16xf32> -> vector<16x4x8xf32>
    "tpu.trace_stop"() : () -> ()
    %38 = vector.shape_cast %37 : vector<16x4x8xf32> to vector<16x32xf32>
    %cst_27 = arith.constant dense<0.000000e+00> : vector<16x32xf32>
    %39 = tpu.matmul %38, %11, %cst_27 {dimension_numbers = #tpu.dot_dimension_numbers<[1], [0], [0], [1], [0, 0, 1, 1], [], []>} : vector<16x32xf32>, vector<32x32xf32>, vector<16x32xf32> -> vector<16x32xf32>
    %40 = vector.broadcast %12 : vector<1x32xf32> to vector<16x32xf32>
    %41 = arith.addf %39, %40 : vector<16x32xf32>
    %42 = arith.addf %1, %41 : vector<16x32xf32>
    %c0_28 = arith.constant 0 : index
    %c0_29 = arith.constant 0 : index
    %43 = vector.load %arg11[%c0_28, %c0_29] : memref<1x32xf32, #tpu.memory_space<vmem>>, vector<1x32xf32>
    %c0_30 = arith.constant 0 : index
    %c0_31 = arith.constant 0 : index
    %44 = vector.load %arg12[%c0_30, %c0_31] : memref<1x32xf32, #tpu.memory_space<vmem>>, vector<1x32xf32>
    %cst_32 = arith.constant dense<0.000000e+00> : vector<16xf32>
    %45 = vector.multi_reduction <add>, %42, %cst_32 [1] : vector<16x32xf32> to vector<16xf32>
    %46 = vector.shape_cast %45 : vector<16xf32> to vector<16x1xf32>
    %cst_33 = arith.constant 3.200000e+01 : f32
    %47 = vector.broadcast %cst_33 : f32 to vector<16x1xf32>
    %48 = arith.divf %46, %47 : vector<16x1xf32>
    %49 = vector.broadcast %48 : vector<16x1xf32> to vector<16x32xf32>
    %50 = arith.subf %42, %49 : vector<16x32xf32>
    %51 = arith.mulf %50, %50 : vector<16x32xf32>
    %cst_34 = arith.constant dense<0.000000e+00> : vector<16xf32>
    %52 = vector.multi_reduction <add>, %51, %cst_34 [1] : vector<16x32xf32> to vector<16xf32>
    %53 = vector.shape_cast %52 : vector<16xf32> to vector<16x1xf32>
    %cst_35 = arith.constant 3.200000e+01 : f32
    %54 = vector.broadcast %cst_35 : f32 to vector<16x1xf32>
    %55 = arith.divf %53, %54 : vector<16x1xf32>
    %56 = vector.broadcast %48 : vector<16x1xf32> to vector<16x32xf32>
    %57 = arith.subf %42, %56 : vector<16x32xf32>
    %cst_36 = arith.constant 9.99999974E-6 : f32
    %58 = vector.broadcast %cst_36 : f32 to vector<16x1xf32>
    %59 = arith.addf %55, %58 : vector<16x1xf32>
    %60 = math.rsqrt %59 : vector<16x1xf32>
    %61 = vector.broadcast %60 : vector<16x1xf32> to vector<16x32xf32>
    %62 = arith.mulf %57, %61 : vector<16x32xf32>
    %63 = vector.broadcast %43 : vector<1x32xf32> to vector<16x32xf32>
    %64 = arith.mulf %62, %63 : vector<16x32xf32>
    %65 = vector.broadcast %44 : vector<1x32xf32> to vector<16x32xf32>
    %66 = arith.addf %64, %65 : vector<16x32xf32>
    %c0_37 = arith.constant 0 : index
    %c0_38 = arith.constant 0 : index
    %67 = vector.load %arg13[%c0_37, %c0_38] : memref<32x64xf32, #tpu.memory_space<vmem>>, vector<32x64xf32>
    %cst_39 = arith.constant dense<0.000000e+00> : vector<16x64xf32>
    %68 = tpu.matmul %66, %67, %cst_39 {dimension_numbers = #tpu.dot_dimension_numbers<[1], [0], [0], [1], [0, 0, 1, 1], [], []>} : vector<16x32xf32>, vector<32x64xf32>, vector<16x64xf32> -> vector<16x64xf32>
    %c0_40 = arith.constant 0 : index
    %c0_41 = arith.constant 0 : index
    %69 = vector.load %arg14[%c0_40, %c0_41] : memref<1x64xf32, #tpu.memory_space<vmem>>, vector<1x64xf32>
    %70 = vector.broadcast %69 : vector<1x64xf32> to vector<16x64xf32>
    %71 = arith.addf %68, %70 : vector<16x64xf32>
    %cst_42 = arith.constant 0.000000e+00 : f32
    %72 = vector.broadcast %cst_42 : f32 to vector<16x64xf32>
    %73 = arith.maximumf %71, %72 : vector<16x64xf32>
    %c0_43 = arith.constant 0 : index
    %c0_44 = arith.constant 0 : index
    %74 = vector.load %arg15[%c0_43, %c0_44] : memref<64x32xf32, #tpu.memory_space<vmem>>, vector<64x32xf32>
    %cst_45 = arith.constant dense<0.000000e+00> : vector<16x32xf32>
    %75 = tpu.matmul %73, %74, %cst_45 {dimension_numbers = #tpu.dot_dimension_numbers<[1], [0], [0], [1], [0, 0, 1, 1], [], []>} : vector<16x64xf32>, vector<64x32xf32>, vector<16x32xf32> -> vector<16x32xf32>
    %c0_46 = arith.constant 0 : index
    %c0_47 = arith.constant 0 : index
    %76 = vector.load %arg16[%c0_46, %c0_47] : memref<1x32xf32, #tpu.memory_space<vmem>>, vector<1x32xf32>
    %77 = vector.broadcast %76 : vector<1x32xf32> to vector<16x32xf32>
    %78 = arith.addf %75, %77 : vector<16x32xf32>
    %79 = arith.addf %66, %78 : vector<16x32xf32>
    %c0_48 = arith.constant 0 : index
    %c0_49 = arith.constant 0 : index
    %80 = vector.load %arg17[%c0_48, %c0_49] : memref<1x32xf32, #tpu.memory_space<vmem>>, vector<1x32xf32>
    %c0_50 = arith.constant 0 : index
    %c0_51 = arith.constant 0 : index
    %81 = vector.load %arg18[%c0_50, %c0_51] : memref<1x32xf32, #tpu.memory_space<vmem>>, vector<1x32xf32>
    %cst_52 = arith.constant dense<0.000000e+00> : vector<16xf32>
    %82 = vector.multi_reduction <add>, %79, %cst_52 [1] : vector<16x32xf32> to vector<16xf32>
    %83 = vector.shape_cast %82 : vector<16xf32> to vector<16x1xf32>
    %cst_53 = arith.constant 3.200000e+01 : f32
    %84 = vector.broadcast %cst_53 : f32 to vector<16x1xf32>
    %85 = arith.divf %83, %84 : vector<16x1xf32>
    %86 = vector.broadcast %85 : vector<16x1xf32> to vector<16x32xf32>
    %87 = arith.subf %79, %86 : vector<16x32xf32>
    %88 = arith.mulf %87, %87 : vector<16x32xf32>
    %cst_54 = arith.constant dense<0.000000e+00> : vector<16xf32>
    %89 = vector.multi_reduction <add>, %88, %cst_54 [1] : vector<16x32xf32> to vector<16xf32>
    %90 = vector.shape_cast %89 : vector<16xf32> to vector<16x1xf32>
    %cst_55 = arith.constant 3.200000e+01 : f32
    %91 = vector.broadcast %cst_55 : f32 to vector<16x1xf32>
    %92 = arith.divf %90, %91 : vector<16x1xf32>
    %93 = vector.broadcast %85 : vector<16x1xf32> to vector<16x32xf32>
    %94 = arith.subf %79, %93 : vector<16x32xf32>
    %cst_56 = arith.constant 9.99999974E-6 : f32
    %95 = vector.broadcast %cst_56 : f32 to vector<16x1xf32>
    %96 = arith.addf %92, %95 : vector<16x1xf32>
    %97 = math.rsqrt %96 : vector<16x1xf32>
    %98 = vector.broadcast %97 : vector<16x1xf32> to vector<16x32xf32>
    %99 = arith.mulf %94, %98 : vector<16x32xf32>
    %100 = vector.broadcast %80 : vector<1x32xf32> to vector<16x32xf32>
    %101 = arith.mulf %99, %100 : vector<16x32xf32>
    %102 = vector.broadcast %81 : vector<1x32xf32> to vector<16x32xf32>
    %103 = arith.addf %101, %102 : vector<16x32xf32>
    %c0_57 = arith.constant 0 : index
    %c0_58 = arith.constant 0 : index
    %c0_59 = arith.constant 0 : index
    %104 = vector.load %arg19[%c0_57, %c0_58, %c0_59] : memref<1x16x32xf32, #tpu.memory_space<vmem>>, vector<1x16x32xf32>
    %105 = vector.shape_cast %104 : vector<1x16x32xf32> to vector<16x32xf32>
    %106 = vector.shape_cast %103 : vector<16x32xf32> to vector<1x16x32xf32>
    tpu.vector_store %arg19[%c0_57, %c0_58, %c0_59], %106 {strides = array<i32>} : memref<1x16x32xf32, #tpu.memory_space<vmem>>, vector<1x16x32xf32>,
    return
  }
  func.func @transform_0(%arg0: i32) -> (i32, i32, i32) {
    %c0_i32 = arith.constant 0 : i32
    %c0_i32_0 = arith.constant 0 : i32
    %c0_i32_1 = arith.constant 0 : i32
    return %arg0, %c0_i32, %c0_i32_0 : i32, i32, i32
  }
  func.func @transform_1(%arg0: i32) -> (i32, i32, i32) {
    %c0_i32 = arith.constant 0 : i32
    %c0_i32_0 = arith.constant 0 : i32
    %c0_i32_1 = arith.constant 0 : i32
    return %arg0, %c0_i32, %c0_i32_0 : i32, i32, i32
  }
  func.func @transform_2(%arg0: i32) -> (i32, i32) {
    %c0_i32 = arith.constant 0 : i32
    %c0_i32_0 = arith.constant 0 : i32
    %c0_i32_1 = arith.constant 0 : i32
    return %c0_i32, %c0_i32_0 : i32, i32
  }
  func.func @transform_3(%arg0: i32) -> (i32, i32) {
    %c0_i32 = arith.constant 0 : i32
    %c0_i32_0 = arith.constant 0 : i32
    %c0_i32_1 = arith.constant 0 : i32
    return %c0_i32, %c0_i32_0 : i32, i32
  }
  func.func @transform_4(%arg0: i32) -> (i32, i32) {
    %c0_i32 = arith.constant 0 : i32
    %c0_i32_0 = arith.constant 0 : i32
    %c0_i32_1 = arith.constant 0 : i32
    return %c0_i32, %c0_i32_0 : i32, i32
  }
  func.func @transform_5(%arg0: i32) -> (i32, i32) {
    %c0_i32 = arith.constant 0 : i32
    %c0_i32_0 = arith.constant 0 : i32
    %c0_i32_1 = arith.constant 0 : i32
    return %c0_i32, %c0_i32_0 : i32, i32
  }
  func.func @transform_6(%arg0: i32) -> (i32, i32) {
    %c0_i32 = arith.constant 0 : i32
    %c0_i32_0 = arith.constant 0 : i32
    %c0_i32_1 = arith.constant 0 : i32
    return %c0_i32, %c0_i32_0 : i32, i32
  }
  func.func @transform_7(%arg0: i32) -> (i32, i32) {
    %c0_i32 = arith.constant 0 : i32
    %c0_i32_0 = arith.constant 0 : i32
    %c0_i32_1 = arith.constant 0 : i32
    return %c0_i32, %c0_i32_0 : i32, i32
  }
  func.func @transform_8(%arg0: i32) -> (i32, i32) {
    %c0_i32 = arith.constant 0 : i32
    %c0_i32_0 = arith.constant 0 : i32
    %c0_i32_1 = arith.constant 0 : i32
    return %c0_i32, %c0_i32_0 : i32, i32
  }
  func.func @transform_9(%arg0: i32) -> (i32, i32) {
    %c0_i32 = arith.constant 0 : i32
    %c0_i32_0 = arith.constant 0 : i32
    %c0_i32_1 = arith.constant 0 : i32
    return %c0_i32, %c0_i32_0 : i32, i32
  }
  func.func @transform_10(%arg0: i32) -> (i32, i32) {
    %c0_i32 = arith.constant 0 : i32
    %c0_i32_0 = arith.constant 0 : i32
    %c0_i32_1 = arith.constant 0 : i32
    return %c0_i32, %c0_i32_0 : i32, i32
  }
  func.func @transform_11(%arg0: i32) -> (i32, i32) {
    %c0_i32 = arith.constant 0 : i32
    %c0_i32_0 = arith.constant 0 : i32
    %c0_i32_1 = arith.constant 0 : i32
    return %c0_i32, %c0_i32_0 : i32, i32
  }
  func.func @transform_12(%arg0: i32) -> (i32, i32) {
    %c0_i32 = arith.constant 0 : i32
    %c0_i32_0 = arith.constant 0 : i32
    %c0_i32_1 = arith.constant 0 : i32
    return %c0_i32, %c0_i32_0 : i32, i32
  }
  func.func @transform_13(%arg0: i32) -> (i32, i32) {
    %c0_i32 = arith.constant 0 : i32
    %c0_i32_0 = arith.constant 0 : i32
    %c0_i32_1 = arith.constant 0 : i32
    return %c0_i32, %c0_i32_0 : i32, i32
  }
  func.func @transform_14(%arg0: i32) -> (i32, i32) {
    %c0_i32 = arith.constant 0 : i32
    %c0_i32_0 = arith.constant 0 : i32
    %c0_i32_1 = arith.constant 0 : i32
    return %c0_i32, %c0_i32_0 : i32, i32
  }
  func.func @transform_15(%arg0: i32) -> (i32, i32) {
    %c0_i32 = arith.constant 0 : i32
    %c0_i32_0 = arith.constant 0 : i32
    %c0_i32_1 = arith.constant 0 : i32
    return %c0_i32, %c0_i32_0 : i32, i32
  }
  func.func @transform_16(%arg0: i32) -> (i32, i32) {
    %c0_i32 = arith.constant 0 : i32
    %c0_i32_0 = arith.constant 0 : i32
    %c0_i32_1 = arith.constant 0 : i32
    return %c0_i32, %c0_i32_0 : i32, i32
  }
  func.func @transform_17(%arg0: i32) -> (i32, i32) {
    %c0_i32 = arith.constant 0 : i32
    %c0_i32_0 = arith.constant 0 : i32
    %c0_i32_1 = arith.constant 0 : i32
    return %c0_i32, %c0_i32_0 : i32, i32
  }
  func.func @transform_18(%arg0: i32) -> (i32, i32, i32) {
    %c0_i32 = arith.constant 0 : i32
    %c0_i32_0 = arith.constant 0 : i32
    %c0_i32_1 = arith.constant 0 : i32
    return %arg0, %c0_i32, %c0_i32_0 : i32, i32, i32
  }
}

module attributes {stable_mosaic.version = 11 : i64} {
  func.func @_decoder_layer_kernel(%arg0: i32, %arg1: memref<1x8x32xf32, #tpu.memory_space<vmem>>, %arg2: memref<8x32xf32, #tpu.memory_space<vmem>>, %arg3: memref<1x16x32xf32, #tpu.memory_space<vmem>>, %arg4: memref<1x16x32xf32, #tpu.memory_space<vmem>>, %arg5: memref<32x32xf32, #tpu.memory_space<vmem>>, %arg6: memref<1x32xf32, #tpu.memory_space<vmem>>, %arg7: memref<32x32xf32, #tpu.memory_space<vmem>>, %arg8: memref<1x32xf32, #tpu.memory_space<vmem>>, %arg9: memref<32x32xf32, #tpu.memory_space<vmem>>, %arg10: memref<1x32xf32, #tpu.memory_space<vmem>>, %arg11: memref<32x32xf32, #tpu.memory_space<vmem>>, %arg12: memref<1x32xf32, #tpu.memory_space<vmem>>, %arg13: memref<1x32xf32, #tpu.memory_space<vmem>>, %arg14: memref<1x32xf32, #tpu.memory_space<vmem>>, %arg15: memref<32x32xf32, #tpu.memory_space<vmem>>, %arg16: memref<1x32xf32, #tpu.memory_space<vmem>>, %arg17: memref<32x32xf32, #tpu.memory_space<vmem>>, %arg18: memref<1x32xf32, #tpu.memory_space<vmem>>, %arg19: memref<32x32xf32, #tpu.memory_space<vmem>>, %arg20: memref<1x32xf32, #tpu.memory_space<vmem>>, %arg21: memref<32x32xf32, #tpu.memory_space<vmem>>, %arg22: memref<1x32xf32, #tpu.memory_space<vmem>>, %arg23: memref<1x32xf32, #tpu.memory_space<vmem>>, %arg24: memref<1x32xf32, #tpu.memory_space<vmem>>, %arg25: memref<32x64xf32, #tpu.memory_space<vmem>>, %arg26: memref<1x64xf32, #tpu.memory_space<vmem>>, %arg27: memref<64x32xf32, #tpu.memory_space<vmem>>, %arg28: memref<1x32xf32, #tpu.memory_space<vmem>>, %arg29: memref<1x32xf32, #tpu.memory_space<vmem>>, %arg30: memref<1x32xf32, #tpu.memory_space<vmem>>, %arg31: memref<1x32xf32, #tpu.memory_space<vmem>>, %arg32: memref<1x32xf32, #tpu.memory_space<vmem>>, %arg33: memref<1x8x32xf32, #tpu.memory_space<vmem>>) attributes {dimension_semantics = [#tpu.dimension_semantics<parallel>], iteration_bounds = array<i64: 2>, scalar_prefetch = 0 : i64, scratch_operands = 0 : i64, tpu.core_type = #tpu.core_type<tc>, window_params = [{transform_indices = @transform_0, window_bounds = array<i64: 1, 8, 32>}, {pipeline_mode = #tpu.pipeline_mode<synchronous>, transform_indices = @transform_1, window_bounds = array<i64: 8, 32>}, {transform_indices = @transform_2, window_bounds = array<i64: 1, 16, 32>}, {transform_indices = @transform_3, window_bounds = array<i64: 1, 16, 32>}, {pipeline_mode = #tpu.pipeline_mode<synchronous>, transform_indices = @transform_4, window_bounds = array<i64: 32, 32>}, {pipeline_mode = #tpu.pipeline_mode<synchronous>, transform_indices = @transform_5, window_bounds = array<i64: 1, 32>}, {pipeline_mode = #tpu.pipeline_mode<synchronous>, transform_indices = @transform_6, window_bounds = array<i64: 32, 32>}, {pipeline_mode = #tpu.pipeline_mode<synchronous>, transform_indices = @transform_7, window_bounds = array<i64: 1, 32>}, {pipeline_mode = #tpu.pipeline_mode<synchronous>, transform_indices = @transform_8, window_bounds = array<i64: 32, 32>}, {pipeline_mode = #tpu.pipeline_mode<synchronous>, transform_indices = @transform_9, window_bounds = array<i64: 1, 32>}, {pipeline_mode = #tpu.pipeline_mode<synchronous>, transform_indices = @transform_10, window_bounds = array<i64: 32, 32>}, {pipeline_mode = #tpu.pipeline_mode<synchronous>, transform_indices = @transform_11, window_bounds = array<i64: 1, 32>}, {pipeline_mode = #tpu.pipeline_mode<synchronous>, transform_indices = @transform_12, window_bounds = array<i64: 1, 32>}, {pipeline_mode = #tpu.pipeline_mode<synchronous>, transform_indices = @transform_13, window_bounds = array<i64: 1, 32>}, {pipeline_mode = #tpu.pipeline_mode<synchronous>, transform_indices = @transform_14, window_bounds = array<i64: 32, 32>}, {pipeline_mode = #tpu.pipeline_mode<synchronous>, transform_indices = @transform_15, window_bounds = array<i64: 1, 32>}, {pipeline_mode = #tpu.pipeline_mode<synchronous>, transform_indices = @transform_16, window_bounds = array<i64: 32, 32>}, {pipeline_mode = #tpu.pipeline_mode<synchronous>, transform_indices = @transform_17, window_bounds = array<i64: 1, 32>}, {pipeline_mode = #tpu.pipeline_mode<synchronous>, transform_indices = @transform_18, window_bounds = array<i64: 32, 32>}, {pipeline_mode = #tpu.pipeline_mode<synchronous>, transform_indices = @transform_19, window_bounds = array<i64: 1, 32>}, {pipeline_mode = #tpu.pipeline_mode<synchronous>, transform_indices = @transform_20, window_bounds = array<i64: 32, 32>}, {pipeline_mode = #tpu.pipeline_mode<synchronous>, transform_indices = @transform_21, window_bounds = array<i64: 1, 32>}, {pipeline_mode = #tpu.pipeline_mode<synchronous>, transform_indices = @transform_22, window_bounds = array<i64: 1, 32>}, {pipeline_mode = #tpu.pipeline_mode<synchronous>, transform_indices = @transform_23, window_bounds = array<i64: 1, 32>}, {pipeline_mode = #tpu.pipeline_mode<synchronous>, transform_indices = @transform_24, window_bounds = array<i64: 32, 64>}, {pipeline_mode = #tpu.pipeline_mode<synchronous>, transform_indices = @transform_25, window_bounds = array<i64: 1, 64>}, {pipeline_mode = #tpu.pipeline_mode<synchronous>, transform_indices = @transform_26, window_bounds = array<i64: 64, 32>}, {pipeline_mode = #tpu.pipeline_mode<synchronous>, transform_indices = @transform_27, window_bounds = array<i64: 1, 32>}, {pipeline_mode = #tpu.pipeline_mode<synchronous>, transform_indices = @transform_28, window_bounds = array<i64: 1, 32>}, {pipeline_mode = #tpu.pipeline_mode<synchronous>, transform_indices = @transform_29, window_bounds = array<i64: 1, 32>}, {pipeline_mode = #tpu.pipeline_mode<synchronous>, transform_indices = @transform_30, window_bounds = array<i64: 1, 32>}, {pipeline_mode = #tpu.pipeline_mode<synchronous>, transform_indices = @transform_31, window_bounds = array<i64: 1, 32>}, {transform_indices = @transform_32, window_bounds = array<i64: 1, 8, 32>}]} {
    %c0 = arith.constant 0 : index
    %c0_0 = arith.constant 0 : index
    %c0_1 = arith.constant 0 : index
    %0 = vector.load %arg1[%c0, %c0_0, %c0_1] : memref<1x8x32xf32, #tpu.memory_space<vmem>>, vector<1x8x32xf32>
    %1 = vector.shape_cast %0 : vector<1x8x32xf32> to vector<8x32xf32>
    %c0_2 = arith.constant 0 : index
    %c0_3 = arith.constant 0 : index
    %2 = vector.load %arg2[%c0_2, %c0_3] : memref<8x32xf32, #tpu.memory_space<vmem>>, vector<8x32xf32>
    %c0_4 = arith.constant 0 : index
    %c0_5 = arith.constant 0 : index
    %c0_6 = arith.constant 0 : index
    %3 = vector.load %arg3[%c0_4, %c0_5, %c0_6] : memref<1x16x32xf32, #tpu.memory_space<vmem>>, vector<1x16x32xf32>
    %4 = vector.shape_cast %3 : vector<1x16x32xf32> to vector<16x32xf32>
    %c0_7 = arith.constant 0 : index
    %c0_8 = arith.constant 0 : index
    %c0_9 = arith.constant 0 : index
    %5 = vector.load %arg4[%c0_7, %c0_8, %c0_9] : memref<1x16x32xf32, #tpu.memory_space<vmem>>, vector<1x16x32xf32>
    %6 = vector.shape_cast %5 : vector<1x16x32xf32> to vector<16x32xf32>
    %7 = arith.addf %1, %2 : vector<8x32xf32>
    %c0_10 = arith.constant 0 : index
    %c0_11 = arith.constant 0 : index
    %8 = vector.load %arg5[%c0_10, %c0_11] : memref<32x32xf32, #tpu.memory_space<vmem>>, vector<32x32xf32>
    %c0_12 = arith.constant 0 : index
    %c0_13 = arith.constant 0 : index
    %9 = vector.load %arg6[%c0_12, %c0_13] : memref<1x32xf32, #tpu.memory_space<vmem>>, vector<1x32xf32>
    %c0_14 = arith.constant 0 : index
    %c0_15 = arith.constant 0 : index
    %10 = vector.load %arg7[%c0_14, %c0_15] : memref<32x32xf32, #tpu.memory_space<vmem>>, vector<32x32xf32>
    %c0_16 = arith.constant 0 : index
    %c0_17 = arith.constant 0 : index
    %11 = vector.load %arg8[%c0_16, %c0_17] : memref<1x32xf32, #tpu.memory_space<vmem>>, vector<1x32xf32>
    %c0_18 = arith.constant 0 : index
    %c0_19 = arith.constant 0 : index
    %12 = vector.load %arg9[%c0_18, %c0_19] : memref<32x32xf32, #tpu.memory_space<vmem>>, vector<32x32xf32>
    %c0_20 = arith.constant 0 : index
    %c0_21 = arith.constant 0 : index
    %13 = vector.load %arg10[%c0_20, %c0_21] : memref<1x32xf32, #tpu.memory_space<vmem>>, vector<1x32xf32>
    %c0_22 = arith.constant 0 : index
    %c0_23 = arith.constant 0 : index
    %14 = vector.load %arg11[%c0_22, %c0_23] : memref<32x32xf32, #tpu.memory_space<vmem>>, vector<32x32xf32>
    %c0_24 = arith.constant 0 : index
    %c0_25 = arith.constant 0 : index
    %15 = vector.load %arg12[%c0_24, %c0_25] : memref<1x32xf32, #tpu.memory_space<vmem>>, vector<1x32xf32>
    %cst = arith.constant dense<0.000000e+00> : vector<8x32xf32>
    %16 = tpu.matmul %7, %8, %cst {dimension_numbers = #tpu.dot_dimension_numbers<[1], [0], [0], [1], [0, 0, 1, 1], [], []>} : vector<8x32xf32>, vector<32x32xf32>, vector<8x32xf32> -> vector<8x32xf32>
    %17 = vector.broadcast %9 : vector<1x32xf32> to vector<8x32xf32>
    %18 = arith.addf %16, %17 : vector<8x32xf32>
    %cst_26 = arith.constant dense<0.000000e+00> : vector<8x32xf32>
    %19 = tpu.matmul %7, %10, %cst_26 {dimension_numbers = #tpu.dot_dimension_numbers<[1], [0], [0], [1], [0, 0, 1, 1], [], []>} : vector<8x32xf32>, vector<32x32xf32>, vector<8x32xf32> -> vector<8x32xf32>
    %20 = vector.broadcast %11 : vector<1x32xf32> to vector<8x32xf32>
    %21 = arith.addf %19, %20 : vector<8x32xf32>
    %cst_27 = arith.constant dense<0.000000e+00> : vector<8x32xf32>
    %22 = tpu.matmul %1, %12, %cst_27 {dimension_numbers = #tpu.dot_dimension_numbers<[1], [0], [0], [1], [0, 0, 1, 1], [], []>} : vector<8x32xf32>, vector<32x32xf32>, vector<8x32xf32> -> vector<8x32xf32>
    %23 = vector.broadcast %13 : vector<1x32xf32> to vector<8x32xf32>
    %24 = arith.addf %22, %23 : vector<8x32xf32>
    %25 = vector.shape_cast %18 : vector<8x32xf32> to vector<8x4x8xf32>
    %26 = vector.shape_cast %21 : vector<8x32xf32> to vector<8x4x8xf32>
    %27 = vector.shape_cast %24 : vector<8x32xf32> to vector<8x4x8xf32>
    "tpu.trace_start"() <{level = 10 : i32, message = "lhd,shd->hls"}> : () -> ()
    %cst_28 = arith.constant dense<0.000000e+00> : vector<4x8x8xf32>
    %28 = tpu.matmul %25, %26, %cst_28 {dimension_numbers = #tpu.dot_dimension_numbers<[2], [2], [0], [0], [0, 1, 0, 0, 1, 0], [1], [1]>} : vector<8x4x8xf32>, vector<8x4x8xf32>, vector<4x8x8xf32> -> vector<4x8x8xf32>
    "tpu.trace_stop"() : () -> ()
    %cst_29 = arith.constant dense<0xFF800000> : vector<4x8xf32>
    %29 = vector.multi_reduction <maximumf>, %28, %cst_29 [2] : vector<4x8x8xf32> to vector<4x8xf32>
    %30 = vector.shape_cast %29 : vector<4x8xf32> to vector<4x8x1xf32>
    %31 = vector.broadcast %30 : vector<4x8x1xf32> to vector<4x8x8xf32>
    %32 = arith.subf %28, %31 : vector<4x8x8xf32>
    %33 = math.exp %32 : vector<4x8x8xf32>
    %cst_30 = arith.constant dense<0.000000e+00> : vector<4x8xf32>
    %34 = vector.multi_reduction <add>, %33, %cst_30 [2] : vector<4x8x8xf32> to vector<4x8xf32>
    %35 = vector.shape_cast %34 : vector<4x8xf32> to vector<4x8x1xf32>
    %36 = tpu.reciprocal %35 : vector<4x8x1xf32> -> vector<4x8x1xf32>
    %37 = vector.broadcast %36 : vector<4x8x1xf32> to vector<4x8x8xf32>
    %38 = arith.mulf %33, %37 : vector<4x8x8xf32>
    "tpu.trace_start"() <{level = 10 : i32, message = "hls,shd->lhd"}> : () -> ()
    %cst_31 = arith.constant dense<0.000000e+00> : vector<4x8x8xf32>
    %39 = tpu.matmul %27, %38, %cst_31 {dimension_numbers = #tpu.dot_dimension_numbers<[0], [2], [2], [1], [0, 1, 0, 2, 1, 1], [1], [0]>} : vector<8x4x8xf32>, vector<4x8x8xf32>, vector<4x8x8xf32> -> vector<4x8x8xf32>
    %40 = tpu.transpose %39, [2, 0, 1] : vector<4x8x8xf32> -> vector<8x4x8xf32>
    "tpu.trace_stop"() : () -> ()
    %41 = vector.shape_cast %40 : vector<8x4x8xf32> to vector<8x32xf32>
    %cst_32 = arith.constant dense<0.000000e+00> : vector<8x32xf32>
    %42 = tpu.matmul %41, %14, %cst_32 {dimension_numbers = #tpu.dot_dimension_numbers<[1], [0], [0], [1], [0, 0, 1, 1], [], []>} : vector<8x32xf32>, vector<32x32xf32>, vector<8x32xf32> -> vector<8x32xf32>
    %43 = vector.broadcast %15 : vector<1x32xf32> to vector<8x32xf32>
    %44 = arith.addf %42, %43 : vector<8x32xf32>
    %45 = arith.addf %1, %44 : vector<8x32xf32>
    %c0_33 = arith.constant 0 : index
    %c0_34 = arith.constant 0 : index
    %46 = vector.load %arg13[%c0_33, %c0_34] : memref<1x32xf32, #tpu.memory_space<vmem>>, vector<1x32xf32>
    %c0_35 = arith.constant 0 : index
    %c0_36 = arith.constant 0 : index
    %47 = vector.load %arg14[%c0_35, %c0_36] : memref<1x32xf32, #tpu.memory_space<vmem>>, vector<1x32xf32>
    %cst_37 = arith.constant dense<0.000000e+00> : vector<8xf32>
    %48 = vector.multi_reduction <add>, %45, %cst_37 [1] : vector<8x32xf32> to vector<8xf32>
    %49 = vector.shape_cast %48 : vector<8xf32> to vector<8x1xf32>
    %cst_38 = arith.constant 3.200000e+01 : f32
    %50 = vector.broadcast %cst_38 : f32 to vector<8x1xf32>
    %51 = arith.divf %49, %50 : vector<8x1xf32>
    %52 = vector.broadcast %51 : vector<8x1xf32> to vector<8x32xf32>
    %53 = arith.subf %45, %52 : vector<8x32xf32>
    %54 = arith.mulf %53, %53 : vector<8x32xf32>
    %cst_39 = arith.constant dense<0.000000e+00> : vector<8xf32>
    %55 = vector.multi_reduction <add>, %54, %cst_39 [1] : vector<8x32xf32> to vector<8xf32>
    %56 = vector.shape_cast %55 : vector<8xf32> to vector<8x1xf32>
    %cst_40 = arith.constant 3.200000e+01 : f32
    %57 = vector.broadcast %cst_40 : f32 to vector<8x1xf32>
    %58 = arith.divf %56, %57 : vector<8x1xf32>
    %59 = vector.broadcast %51 : vector<8x1xf32> to vector<8x32xf32>
    %60 = arith.subf %45, %59 : vector<8x32xf32>
    %cst_41 = arith.constant 9.99999974E-6 : f32
    %61 = vector.broadcast %cst_41 : f32 to vector<8x1xf32>
    %62 = arith.addf %58, %61 : vector<8x1xf32>
    %63 = math.rsqrt %62 : vector<8x1xf32>
    %64 = vector.broadcast %63 : vector<8x1xf32> to vector<8x32xf32>
    %65 = arith.mulf %60, %64 : vector<8x32xf32>
    %66 = vector.broadcast %46 : vector<1x32xf32> to vector<8x32xf32>
    %67 = arith.mulf %65, %66 : vector<8x32xf32>
    %68 = vector.broadcast %47 : vector<1x32xf32> to vector<8x32xf32>
    %69 = arith.addf %67, %68 : vector<8x32xf32>
    %70 = arith.addf %69, %2 : vector<8x32xf32>
    %71 = arith.addf %4, %6 : vector<16x32xf32>
    %c0_42 = arith.constant 0 : index
    %c0_43 = arith.constant 0 : index
    %72 = vector.load %arg15[%c0_42, %c0_43] : memref<32x32xf32, #tpu.memory_space<vmem>>, vector<32x32xf32>
    %c0_44 = arith.constant 0 : index
    %c0_45 = arith.constant 0 : index
    %73 = vector.load %arg16[%c0_44, %c0_45] : memref<1x32xf32, #tpu.memory_space<vmem>>, vector<1x32xf32>
    %c0_46 = arith.constant 0 : index
    %c0_47 = arith.constant 0 : index
    %74 = vector.load %arg17[%c0_46, %c0_47] : memref<32x32xf32, #tpu.memory_space<vmem>>, vector<32x32xf32>
    %c0_48 = arith.constant 0 : index
    %c0_49 = arith.constant 0 : index
    %75 = vector.load %arg18[%c0_48, %c0_49] : memref<1x32xf32, #tpu.memory_space<vmem>>, vector<1x32xf32>
    %c0_50 = arith.constant 0 : index
    %c0_51 = arith.constant 0 : index
    %76 = vector.load %arg19[%c0_50, %c0_51] : memref<32x32xf32, #tpu.memory_space<vmem>>, vector<32x32xf32>
    %c0_52 = arith.constant 0 : index
    %c0_53 = arith.constant 0 : index
    %77 = vector.load %arg20[%c0_52, %c0_53] : memref<1x32xf32, #tpu.memory_space<vmem>>, vector<1x32xf32>
    %c0_54 = arith.constant 0 : index
    %c0_55 = arith.constant 0 : index
    %78 = vector.load %arg21[%c0_54, %c0_55] : memref<32x32xf32, #tpu.memory_space<vmem>>, vector<32x32xf32>
    %c0_56 = arith.constant 0 : index
    %c0_57 = arith.constant 0 : index
    %79 = vector.load %arg22[%c0_56, %c0_57] : memref<1x32xf32, #tpu.memory_space<vmem>>, vector<1x32xf32>
    %cst_58 = arith.constant dense<0.000000e+00> : vector<8x32xf32>
    %80 = tpu.matmul %70, %72, %cst_58 {dimension_numbers = #tpu.dot_dimension_numbers<[1], [0], [0], [1], [0, 0, 1, 1], [], []>} : vector<8x32xf32>, vector<32x32xf32>, vector<8x32xf32> -> vector<8x32xf32>
    %81 = vector.broadcast %73 : vector<1x32xf32> to vector<8x32xf32>
    %82 = arith.addf %80, %81 : vector<8x32xf32>
    %cst_59 = arith.constant dense<0.000000e+00> : vector<16x32xf32>
    %83 = tpu.matmul %71, %74, %cst_59 {dimension_numbers = #tpu.dot_dimension_numbers<[1], [0], [0], [1], [0, 0, 1, 1], [], []>} : vector<16x32xf32>, vector<32x32xf32>, vector<16x32xf32> -> vector<16x32xf32>
    %84 = vector.broadcast %75 : vector<1x32xf32> to vector<16x32xf32>
    %85 = arith.addf %83, %84 : vector<16x32xf32>
    %cst_60 = arith.constant dense<0.000000e+00> : vector<16x32xf32>
    %86 = tpu.matmul %4, %76, %cst_60 {dimension_numbers = #tpu.dot_dimension_numbers<[1], [0], [0], [1], [0, 0, 1, 1], [], []>} : vector<16x32xf32>, vector<32x32xf32>, vector<16x32xf32> -> vector<16x32xf32>
    %87 = vector.broadcast %77 : vector<1x32xf32> to vector<16x32xf32>
    %88 = arith.addf %86, %87 : vector<16x32xf32>
    %89 = vector.shape_cast %82 : vector<8x32xf32> to vector<8x4x8xf32>
    %90 = vector.shape_cast %85 : vector<16x32xf32> to vector<16x4x8xf32>
    %91 = vector.shape_cast %88 : vector<16x32xf32> to vector<16x4x8xf32>
    "tpu.trace_start"() <{level = 10 : i32, message = "lhd,shd->hls"}> : () -> ()
    %cst_61 = arith.constant dense<0.000000e+00> : vector<4x8x16xf32>
    %92 = tpu.matmul %89, %90, %cst_61 {dimension_numbers = #tpu.dot_dimension_numbers<[2], [2], [0], [0], [0, 1, 0, 0, 1, 0], [1], [1]>} : vector<8x4x8xf32>, vector<16x4x8xf32>, vector<4x8x16xf32> -> vector<4x8x16xf32>
    "tpu.trace_stop"() : () -> ()
    %cst_62 = arith.constant dense<0xFF800000> : vector<4x8xf32>
    %93 = vector.multi_reduction <maximumf>, %92, %cst_62 [2] : vector<4x8x16xf32> to vector<4x8xf32>
    %94 = vector.shape_cast %93 : vector<4x8xf32> to vector<4x8x1xf32>
    %95 = vector.broadcast %94 : vector<4x8x1xf32> to vector<4x8x16xf32>
    %96 = arith.subf %92, %95 : vector<4x8x16xf32>
    %97 = math.exp %96 : vector<4x8x16xf32>
    %cst_63 = arith.constant dense<0.000000e+00> : vector<4x8xf32>
    %98 = vector.multi_reduction <add>, %97, %cst_63 [2] : vector<4x8x16xf32> to vector<4x8xf32>
    %99 = vector.shape_cast %98 : vector<4x8xf32> to vector<4x8x1xf32>
    %100 = tpu.reciprocal %99 : vector<4x8x1xf32> -> vector<4x8x1xf32>
    %101 = vector.broadcast %100 : vector<4x8x1xf32> to vector<4x8x16xf32>
    %102 = arith.mulf %97, %101 : vector<4x8x16xf32>
    "tpu.trace_start"() <{level = 10 : i32, message = "hls,shd->lhd"}> : () -> ()
    %cst_64 = arith.constant dense<0.000000e+00> : vector<4x8x8xf32>
    %103 = tpu.matmul %91, %102, %cst_64 {dimension_numbers = #tpu.dot_dimension_numbers<[0], [2], [2], [1], [0, 1, 0, 2, 1, 1], [1], [0]>} : vector<16x4x8xf32>, vector<4x8x16xf32>, vector<4x8x8xf32> -> vector<4x8x8xf32>
    %104 = tpu.transpose %103, [2, 0, 1] : vector<4x8x8xf32> -> vector<8x4x8xf32>
    "tpu.trace_stop"() : () -> ()
    %105 = vector.shape_cast %104 : vector<8x4x8xf32> to vector<8x32xf32>
    %cst_65 = arith.constant dense<0.000000e+00> : vector<8x32xf32>
    %106 = tpu.matmul %105, %78, %cst_65 {dimension_numbers = #tpu.dot_dimension_numbers<[1], [0], [0], [1], [0, 0, 1, 1], [], []>} : vector<8x32xf32>, vector<32x32xf32>, vector<8x32xf32> -> vector<8x32xf32>
    %107 = vector.broadcast %79 : vector<1x32xf32> to vector<8x32xf32>
    %108 = arith.addf %106, %107 : vector<8x32xf32>
    %109 = arith.addf %69, %108 : vector<8x32xf32>
    %c0_66 = arith.constant 0 : index
    %c0_67 = arith.constant 0 : index
    %110 = vector.load %arg23[%c0_66, %c0_67] : memref<1x32xf32, #tpu.memory_space<vmem>>, vector<1x32xf32>
    %c0_68 = arith.constant 0 : index
    %c0_69 = arith.constant 0 : index
    %111 = vector.load %arg24[%c0_68, %c0_69] : memref<1x32xf32, #tpu.memory_space<vmem>>, vector<1x32xf32>
    %cst_70 = arith.constant dense<0.000000e+00> : vector<8xf32>
    %112 = vector.multi_reduction <add>, %109, %cst_70 [1] : vector<8x32xf32> to vector<8xf32>
    %113 = vector.shape_cast %112 : vector<8xf32> to vector<8x1xf32>
    %cst_71 = arith.constant 3.200000e+01 : f32
    %114 = vector.broadcast %cst_71 : f32 to vector<8x1xf32>
    %115 = arith.divf %113, %114 : vector<8x1xf32>
    %116 = vector.broadcast %115 : vector<8x1xf32> to vector<8x32xf32>
    %117 = arith.subf %109, %116 : vector<8x32xf32>
    %118 = arith.mulf %117, %117 : vector<8x32xf32>
    %cst_72 = arith.constant dense<0.000000e+00> : vector<8xf32>
    %119 = vector.multi_reduction <add>, %118, %cst_72 [1] : vector<8x32xf32> to vector<8xf32>
    %120 = vector.shape_cast %119 : vector<8xf32> to vector<8x1xf32>
    %cst_73 = arith.constant 3.200000e+01 : f32
    %121 = vector.broadcast %cst_73 : f32 to vector<8x1xf32>
    %122 = arith.divf %120, %121 : vector<8x1xf32>
    %123 = vector.broadcast %115 : vector<8x1xf32> to vector<8x32xf32>
    %124 = arith.subf %109, %123 : vector<8x32xf32>
    %cst_74 = arith.constant 9.99999974E-6 : f32
    %125 = vector.broadcast %cst_74 : f32 to vector<8x1xf32>
    %126 = arith.addf %122, %125 : vector<8x1xf32>
    %127 = math.rsqrt %126 : vector<8x1xf32>
    %128 = vector.broadcast %127 : vector<8x1xf32> to vector<8x32xf32>
    %129 = arith.mulf %124, %128 : vector<8x32xf32>
    %130 = vector.broadcast %110 : vector<1x32xf32> to vector<8x32xf32>
    %131 = arith.mulf %129, %130 : vector<8x32xf32>
    %132 = vector.broadcast %111 : vector<1x32xf32> to vector<8x32xf32>
    %133 = arith.addf %131, %132 : vector<8x32xf32>
    %c0_75 = arith.constant 0 : index
    %c0_76 = arith.constant 0 : index
    %134 = vector.load %arg25[%c0_75, %c0_76] : memref<32x64xf32, #tpu.memory_space<vmem>>, vector<32x64xf32>
    %cst_77 = arith.constant dense<0.000000e+00> : vector<8x64xf32>
    %135 = tpu.matmul %133, %134, %cst_77 {dimension_numbers = #tpu.dot_dimension_numbers<[1], [0], [0], [1], [0, 0, 1, 1], [], []>} : vector<8x32xf32>, vector<32x64xf32>, vector<8x64xf32> -> vector<8x64xf32>
    %c0_78 = arith.constant 0 : index
    %c0_79 = arith.constant 0 : index
    %136 = vector.load %arg26[%c0_78, %c0_79] : memref<1x64xf32, #tpu.memory_space<vmem>>, vector<1x64xf32>
    %137 = vector.broadcast %136 : vector<1x64xf32> to vector<8x64xf32>
    %138 = arith.addf %135, %137 : vector<8x64xf32>
    %cst_80 = arith.constant 0.000000e+00 : f32
    %139 = vector.broadcast %cst_80 : f32 to vector<8x64xf32>
    %140 = arith.maximumf %138, %139 : vector<8x64xf32>
    %c0_81 = arith.constant 0 : index
    %c0_82 = arith.constant 0 : index
    %141 = vector.load %arg27[%c0_81, %c0_82] : memref<64x32xf32, #tpu.memory_space<vmem>>, vector<64x32xf32>
    %cst_83 = arith.constant dense<0.000000e+00> : vector<8x32xf32>
    %142 = tpu.matmul %140, %141, %cst_83 {dimension_numbers = #tpu.dot_dimension_numbers<[1], [0], [0], [1], [0, 0, 1, 1], [], []>} : vector<8x64xf32>, vector<64x32xf32>, vector<8x32xf32> -> vector<8x32xf32>
    %c0_84 = arith.constant 0 : index
    %c0_85 = arith.constant 0 : index
    %143 = vector.load %arg28[%c0_84, %c0_85] : memref<1x32xf32, #tpu.memory_space<vmem>>, vector<1x32xf32>
    %144 = vector.broadcast %143 : vector<1x32xf32> to vector<8x32xf32>
    %145 = arith.addf %142, %144 : vector<8x32xf32>
    %146 = arith.addf %133, %145 : vector<8x32xf32>
    %c0_86 = arith.constant 0 : index
    %c0_87 = arith.constant 0 : index
    %147 = vector.load %arg29[%c0_86, %c0_87] : memref<1x32xf32, #tpu.memory_space<vmem>>, vector<1x32xf32>
    %c0_88 = arith.constant 0 : index
    %c0_89 = arith.constant 0 : index
    %148 = vector.load %arg30[%c0_88, %c0_89] : memref<1x32xf32, #tpu.memory_space<vmem>>, vector<1x32xf32>
    %cst_90 = arith.constant dense<0.000000e+00> : vector<8xf32>
    %149 = vector.multi_reduction <add>, %146, %cst_90 [1] : vector<8x32xf32> to vector<8xf32>
    %150 = vector.shape_cast %149 : vector<8xf32> to vector<8x1xf32>
    %cst_91 = arith.constant 3.200000e+01 : f32
    %151 = vector.broadcast %cst_91 : f32 to vector<8x1xf32>
    %152 = arith.divf %150, %151 : vector<8x1xf32>
    %153 = vector.broadcast %152 : vector<8x1xf32> to vector<8x32xf32>
    %154 = arith.subf %146, %153 : vector<8x32xf32>
    %155 = arith.mulf %154, %154 : vector<8x32xf32>
    %cst_92 = arith.constant dense<0.000000e+00> : vector<8xf32>
    %156 = vector.multi_reduction <add>, %155, %cst_92 [1] : vector<8x32xf32> to vector<8xf32>
    %157 = vector.shape_cast %156 : vector<8xf32> to vector<8x1xf32>
    %cst_93 = arith.constant 3.200000e+01 : f32
    %158 = vector.broadcast %cst_93 : f32 to vector<8x1xf32>
    %159 = arith.divf %157, %158 : vector<8x1xf32>
    %160 = vector.broadcast %152 : vector<8x1xf32> to vector<8x32xf32>
    %161 = arith.subf %146, %160 : vector<8x32xf32>
    %cst_94 = arith.constant 9.99999974E-6 : f32
    %162 = vector.broadcast %cst_94 : f32 to vector<8x1xf32>
    %163 = arith.addf %159, %162 : vector<8x1xf32>
    %164 = math.rsqrt %163 : vector<8x1xf32>
    %165 = vector.broadcast %164 : vector<8x1xf32> to vector<8x32xf32>
    %166 = arith.mulf %161, %165 : vector<8x32xf32>
    %167 = vector.broadcast %147 : vector<1x32xf32> to vector<8x32xf32>
    %168 = arith.mulf %166, %167 : vector<8x32xf32>
    %169 = vector.broadcast %148 : vector<1x32xf32> to vector<8x32xf32>
    %170 = arith.addf %168, %169 : vector<8x32xf32>
    %c0_95 = arith.constant 0 : index
    %c0_96 = arith.constant 0 : index
    %171 = vector.load %arg31[%c0_95, %c0_96] : memref<1x32xf32, #tpu.memory_space<vmem>>, vector<1x32xf32>
    %c0_97 = arith.constant 0 : index
    %c0_98 = arith.constant 0 : index
    %172 = vector.load %arg32[%c0_97, %c0_98] : memref<1x32xf32, #tpu.memory_space<vmem>>, vector<1x32xf32>
    %cst_99 = arith.constant dense<0.000000e+00> : vector<8xf32>
    %173 = vector.multi_reduction <add>, %170, %cst_99 [1] : vector<8x32xf32> to vector<8xf32>
    %174 = vector.shape_cast %173 : vector<8xf32> to vector<8x1xf32>
    %cst_100 = arith.constant 3.200000e+01 : f32
    %175 = vector.broadcast %cst_100 : f32 to vector<8x1xf32>
    %176 = arith.divf %174, %175 : vector<8x1xf32>
    %177 = vector.broadcast %176 : vector<8x1xf32> to vector<8x32xf32>
    %178 = arith.subf %170, %177 : vector<8x32xf32>
    %179 = arith.mulf %178, %178 : vector<8x32xf32>
    %cst_101 = arith.constant dense<0.000000e+00> : vector<8xf32>
    %180 = vector.multi_reduction <add>, %179, %cst_101 [1] : vector<8x32xf32> to vector<8xf32>
    %181 = vector.shape_cast %180 : vector<8xf32> to vector<8x1xf32>
    %cst_102 = arith.constant 3.200000e+01 : f32
    %182 = vector.broadcast %cst_102 : f32 to vector<8x1xf32>
    %183 = arith.divf %181, %182 : vector<8x1xf32>
    %184 = vector.broadcast %176 : vector<8x1xf32> to vector<8x32xf32>
    %185 = arith.subf %170, %184 : vector<8x32xf32>
    %cst_103 = arith.constant 9.99999974E-6 : f32
    %186 = vector.broadcast %cst_103 : f32 to vector<8x1xf32>
    %187 = arith.addf %183, %186 : vector<8x1xf32>
    %188 = math.rsqrt %187 : vector<8x1xf32>
    %189 = vector.broadcast %188 : vector<8x1xf32> to vector<8x32xf32>
    %190 = arith.mulf %185, %189 : vector<8x32xf32>
    %191 = vector.broadcast %171 : vector<1x32xf32> to vector<8x32xf32>
    %192 = arith.mulf %190, %191 : vector<8x32xf32>
    %193 = vector.broadcast %172 : vector<1x32xf32> to vector<8x32xf32>
    %194 = arith.addf %192, %193 : vector<8x32xf32>
    %c0_104 = arith.constant 0 : index
    %c0_105 = arith.constant 0 : index
    %c0_106 = arith.constant 0 : index
    %195 = vector.load %arg33[%c0_104, %c0_105, %c0_106] : memref<1x8x32xf32, #tpu.memory_space<vmem>>, vector<1x8x32xf32>
    %196 = vector.shape_cast %195 : vector<1x8x32xf32> to vector<8x32xf32>
    %197 = vector.shape_cast %194 : vector<8x32xf32> to vector<1x8x32xf32>
    tpu.vector_store %arg33[%c0_104, %c0_105, %c0_106], %197 {strides = array<i32>} : memref<1x8x32xf32, #tpu.memory_space<vmem>>, vector<1x8x32xf32>,
    return
  }
  func.func @transform_0(%arg0: i32) -> (i32, i32, i32) {
    %c0_i32 = arith.constant 0 : i32
    %c0_i32_0 = arith.constant 0 : i32
    %c0_i32_1 = arith.constant 0 : i32
    return %arg0, %c0_i32, %c0_i32_0 : i32, i32, i32
  }
  func.func @transform_1(%arg0: i32) -> (i32, i32) {
    %c0_i32 = arith.constant 0 : i32
    %c0_i32_0 = arith.constant 0 : i32
    %c0_i32_1 = arith.constant 0 : i32
    return %c0_i32, %c0_i32_0 : i32, i32
  }
  func.func @transform_2(%arg0: i32) -> (i32, i32, i32) {
    %c0_i32 = arith.constant 0 : i32
    %c0_i32_0 = arith.constant 0 : i32
    %c0_i32_1 = arith.constant 0 : i32
    return %arg0, %c0_i32, %c0_i32_0 : i32, i32, i32
  }
  func.func @transform_3(%arg0: i32) -> (i32, i32, i32) {
    %c0_i32 = arith.constant 0 : i32
    %c0_i32_0 = arith.constant 0 : i32
    %c0_i32_1 = arith.constant 0 : i32
    return %arg0, %c0_i32, %c0_i32_0 : i32, i32, i32
  }
  func.func @transform_4(%arg0: i32) -> (i32, i32) {
    %c0_i32 = arith.constant 0 : i32
    %c0_i32_0 = arith.constant 0 : i32
    %c0_i32_1 = arith.constant 0 : i32
    return %c0_i32, %c0_i32_0 : i32, i32
  }
  func.func @transform_5(%arg0: i32) -> (i32, i32) {
    %c0_i32 = arith.constant 0 : i32
    %c0_i32_0 = arith.constant 0 : i32
    %c0_i32_1 = arith.constant 0 : i32
    return %c0_i32, %c0_i32_0 : i32, i32
  }
  func.func @transform_6(%arg0: i32) -> (i32, i32) {
    %c0_i32 = arith.constant 0 : i32
    %c0_i32_0 = arith.constant 0 : i32
    %c0_i32_1 = arith.constant 0 : i32
    return %c0_i32, %c0_i32_0 : i32, i32
  }
  func.func @transform_7(%arg0: i32) -> (i32, i32) {
    %c0_i32 = arith.constant 0 : i32
    %c0_i32_0 = arith.constant 0 : i32
    %c0_i32_1 = arith.constant 0 : i32
    return %c0_i32, %c0_i32_0 : i32, i32
  }
  func.func @transform_8(%arg0: i32) -> (i32, i32) {
    %c0_i32 = arith.constant 0 : i32
    %c0_i32_0 = arith.constant 0 : i32
    %c0_i32_1 = arith.constant 0 : i32
    return %c0_i32, %c0_i32_0 : i32, i32
  }
  func.func @transform_9(%arg0: i32) -> (i32, i32) {
    %c0_i32 = arith.constant 0 : i32
    %c0_i32_0 = arith.constant 0 : i32
    %c0_i32_1 = arith.constant 0 : i32
    return %c0_i32, %c0_i32_0 : i32, i32
  }
  func.func @transform_10(%arg0: i32) -> (i32, i32) {
    %c0_i32 = arith.constant 0 : i32
    %c0_i32_0 = arith.constant 0 : i32
    %c0_i32_1 = arith.constant 0 : i32
    return %c0_i32, %c0_i32_0 : i32, i32
  }
  func.func @transform_11(%arg0: i32) -> (i32, i32) {
    %c0_i32 = arith.constant 0 : i32
    %c0_i32_0 = arith.constant 0 : i32
    %c0_i32_1 = arith.constant 0 : i32
    return %c0_i32, %c0_i32_0 : i32, i32
  }
  func.func @transform_12(%arg0: i32) -> (i32, i32) {
    %c0_i32 = arith.constant 0 : i32
    %c0_i32_0 = arith.constant 0 : i32
    %c0_i32_1 = arith.constant 0 : i32
    return %c0_i32, %c0_i32_0 : i32, i32
  }
  func.func @transform_13(%arg0: i32) -> (i32, i32) {
    %c0_i32 = arith.constant 0 : i32
    %c0_i32_0 = arith.constant 0 : i32
    %c0_i32_1 = arith.constant 0 : i32
    return %c0_i32, %c0_i32_0 : i32, i32
  }
  func.func @transform_14(%arg0: i32) -> (i32, i32) {
    %c0_i32 = arith.constant 0 : i32
    %c0_i32_0 = arith.constant 0 : i32
    %c0_i32_1 = arith.constant 0 : i32
    return %c0_i32, %c0_i32_0 : i32, i32
  }
  func.func @transform_15(%arg0: i32) -> (i32, i32) {
    %c0_i32 = arith.constant 0 : i32
    %c0_i32_0 = arith.constant 0 : i32
    %c0_i32_1 = arith.constant 0 : i32
    return %c0_i32, %c0_i32_0 : i32, i32
  }
  func.func @transform_16(%arg0: i32) -> (i32, i32) {
    %c0_i32 = arith.constant 0 : i32
    %c0_i32_0 = arith.constant 0 : i32
    %c0_i32_1 = arith.constant 0 : i32
    return %c0_i32, %c0_i32_0 : i32, i32
  }
  func.func @transform_17(%arg0: i32) -> (i32, i32) {
    %c0_i32 = arith.constant 0 : i32
    %c0_i32_0 = arith.constant 0 : i32
    %c0_i32_1 = arith.constant 0 : i32
    return %c0_i32, %c0_i32_0 : i32, i32
  }
  func.func @transform_18(%arg0: i32) -> (i32, i32) {
    %c0_i32 = arith.constant 0 : i32
    %c0_i32_0 = arith.constant 0 : i32
    %c0_i32_1 = arith.constant 0 : i32
    return %c0_i32, %c0_i32_0 : i32, i32
  }
  func.func @transform_19(%arg0: i32) -> (i32, i32) {
    %c0_i32 = arith.constant 0 : i32
    %c0_i32_0 = arith.constant 0 : i32
    %c0_i32_1 = arith.constant 0 : i32
    return %c0_i32, %c0_i32_0 : i32, i32
  }
  func.func @transform_20(%arg0: i32) -> (i32, i32) {
    %c0_i32 = arith.constant 0 : i32
    %c0_i32_0 = arith.constant 0 : i32
    %c0_i32_1 = arith.constant 0 : i32
    return %c0_i32, %c0_i32_0 : i32, i32
  }
  func.func @transform_21(%arg0: i32) -> (i32, i32) {
    %c0_i32 = arith.constant 0 : i32
    %c0_i32_0 = arith.constant 0 : i32
    %c0_i32_1 = arith.constant 0 : i32
    return %c0_i32, %c0_i32_0 : i32, i32
  }
  func.func @transform_22(%arg0: i32) -> (i32, i32) {
    %c0_i32 = arith.constant 0 : i32
    %c0_i32_0 = arith.constant 0 : i32
    %c0_i32_1 = arith.constant 0 : i32
    return %c0_i32, %c0_i32_0 : i32, i32
  }
  func.func @transform_23(%arg0: i32) -> (i32, i32) {
    %c0_i32 = arith.constant 0 : i32
    %c0_i32_0 = arith.constant 0 : i32
    %c0_i32_1 = arith.constant 0 : i32
    return %c0_i32, %c0_i32_0 : i32, i32
  }
  func.func @transform_24(%arg0: i32) -> (i32, i32) {
    %c0_i32 = arith.constant 0 : i32
    %c0_i32_0 = arith.constant 0 : i32
    %c0_i32_1 = arith.constant 0 : i32
    return %c0_i32, %c0_i32_0 : i32, i32
  }
  func.func @transform_25(%arg0: i32) -> (i32, i32) {
    %c0_i32 = arith.constant 0 : i32
    %c0_i32_0 = arith.constant 0 : i32
    %c0_i32_1 = arith.constant 0 : i32
    return %c0_i32, %c0_i32_0 : i32, i32
  }
  func.func @transform_26(%arg0: i32) -> (i32, i32) {
    %c0_i32 = arith.constant 0 : i32
    %c0_i32_0 = arith.constant 0 : i32
    %c0_i32_1 = arith.constant 0 : i32
    return %c0_i32, %c0_i32_0 : i32, i32
  }
  func.func @transform_27(%arg0: i32) -> (i32, i32) {
    %c0_i32 = arith.constant 0 : i32
    %c0_i32_0 = arith.constant 0 : i32
    %c0_i32_1 = arith.constant 0 : i32
    return %c0_i32, %c0_i32_0 : i32, i32
  }
  func.func @transform_28(%arg0: i32) -> (i32, i32) {
    %c0_i32 = arith.constant 0 : i32
    %c0_i32_0 = arith.constant 0 : i32
    %c0_i32_1 = arith.constant 0 : i32
    return %c0_i32, %c0_i32_0 : i32, i32
  }
  func.func @transform_29(%arg0: i32) -> (i32, i32) {
    %c0_i32 = arith.constant 0 : i32
    %c0_i32_0 = arith.constant 0 : i32
    %c0_i32_1 = arith.constant 0 : i32
    return %c0_i32, %c0_i32_0 : i32, i32
  }
  func.func @transform_30(%arg0: i32) -> (i32, i32) {
    %c0_i32 = arith.constant 0 : i32
    %c0_i32_0 = arith.constant 0 : i32
    %c0_i32_1 = arith.constant 0 : i32
    return %c0_i32, %c0_i32_0 : i32, i32
  }
  func.func @transform_31(%arg0: i32) -> (i32, i32) {
    %c0_i32 = arith.constant 0 : i32
    %c0_i32_0 = arith.constant 0 : i32
    %c0_i32_1 = arith.constant 0 : i32
    return %c0_i32, %c0_i32_0 : i32, i32
  }
  func.func @transform_32(%arg0: i32) -> (i32, i32, i32) {
    %c0_i32 = arith.constant 0 : i32
    %c0_i32_0 = arith.constant 0 : i32
    %c0_i32_1 = arith.constant 0 : i32
    return %arg0, %c0_i32, %c0_i32_0 : i32, i32, i32
  }
}

module attributes {stable_mosaic.version = 11 : i64} {
  func.func @_decoder_layer_kernel(%arg0: i32, %arg1: memref<1x8x32xf32, #tpu.memory_space<vmem>>, %arg2: memref<8x32xf32, #tpu.memory_space<vmem>>, %arg3: memref<1x16x32xf32, #tpu.memory_space<vmem>>, %arg4: memref<1x16x32xf32, #tpu.memory_space<vmem>>, %arg5: memref<32x32xf32, #tpu.memory_space<vmem>>, %arg6: memref<1x32xf32, #tpu.memory_space<vmem>>, %arg7: memref<32x32xf32, #tpu.memory_space<vmem>>, %arg8: memref<1x32xf32, #tpu.memory_space<vmem>>, %arg9: memref<32x32xf32, #tpu.memory_space<vmem>>, %arg10: memref<1x32xf32, #tpu.memory_space<vmem>>, %arg11: memref<32x32xf32, #tpu.memory_space<vmem>>, %arg12: memref<1x32xf32, #tpu.memory_space<vmem>>, %arg13: memref<1x32xf32, #tpu.memory_space<vmem>>, %arg14: memref<1x32xf32, #tpu.memory_space<vmem>>, %arg15: memref<32x32xf32, #tpu.memory_space<vmem>>, %arg16: memref<1x32xf32, #tpu.memory_space<vmem>>, %arg17: memref<32x32xf32, #tpu.memory_space<vmem>>, %arg18: memref<1x32xf32, #tpu.memory_space<vmem>>, %arg19: memref<32x32xf32, #tpu.memory_space<vmem>>, %arg20: memref<1x32xf32, #tpu.memory_space<vmem>>, %arg21: memref<32x32xf32, #tpu.memory_space<vmem>>, %arg22: memref<1x32xf32, #tpu.memory_space<vmem>>, %arg23: memref<1x32xf32, #tpu.memory_space<vmem>>, %arg24: memref<1x32xf32, #tpu.memory_space<vmem>>, %arg25: memref<32x64xf32, #tpu.memory_space<vmem>>, %arg26: memref<1x64xf32, #tpu.memory_space<vmem>>, %arg27: memref<64x32xf32, #tpu.memory_space<vmem>>, %arg28: memref<1x32xf32, #tpu.memory_space<vmem>>, %arg29: memref<1x32xf32, #tpu.memory_space<vmem>>, %arg30: memref<1x32xf32, #tpu.memory_space<vmem>>, %arg31: memref<1x32xf32, #tpu.memory_space<vmem>>, %arg32: memref<1x32xf32, #tpu.memory_space<vmem>>, %arg33: memref<1x8x32xf32, #tpu.memory_space<vmem>>) attributes {dimension_semantics = [#tpu.dimension_semantics<parallel>], iteration_bounds = array<i64: 2>, scalar_prefetch = 0 : i64, scratch_operands = 0 : i64, tpu.core_type = #tpu.core_type<tc>, window_params = [{transform_indices = @transform_0, window_bounds = array<i64: 1, 8, 32>}, {pipeline_mode = #tpu.pipeline_mode<synchronous>, transform_indices = @transform_1, window_bounds = array<i64: 8, 32>}, {transform_indices = @transform_2, window_bounds = array<i64: 1, 16, 32>}, {transform_indices = @transform_3, window_bounds = array<i64: 1, 16, 32>}, {pipeline_mode = #tpu.pipeline_mode<synchronous>, transform_indices = @transform_4, window_bounds = array<i64: 32, 32>}, {pipeline_mode = #tpu.pipeline_mode<synchronous>, transform_indices = @transform_5, window_bounds = array<i64: 1, 32>}, {pipeline_mode = #tpu.pipeline_mode<synchronous>, transform_indices = @transform_6, window_bounds = array<i64: 32, 32>}, {pipeline_mode = #tpu.pipeline_mode<synchronous>, transform_indices = @transform_7, window_bounds = array<i64: 1, 32>}, {pipeline_mode = #tpu.pipeline_mode<synchronous>, transform_indices = @transform_8, window_bounds = array<i64: 32, 32>}, {pipeline_mode = #tpu.pipeline_mode<synchronous>, transform_indices = @transform_9, window_bounds = array<i64: 1, 32>}, {pipeline_mode = #tpu.pipeline_mode<synchronous>, transform_indices = @transform_10, window_bounds = array<i64: 32, 32>}, {pipeline_mode = #tpu.pipeline_mode<synchronous>, transform_indices = @transform_11, window_bounds = array<i64: 1, 32>}, {pipeline_mode = #tpu.pipeline_mode<synchronous>, transform_indices = @transform_12, window_bounds = array<i64: 1, 32>}, {pipeline_mode = #tpu.pipeline_mode<synchronous>, transform_indices = @transform_13, window_bounds = array<i64: 1, 32>}, {pipeline_mode = #tpu.pipeline_mode<synchronous>, transform_indices = @transform_14, window_bounds = array<i64: 32, 32>}, {pipeline_mode = #tpu.pipeline_mode<synchronous>, transform_indices = @transform_15, window_bounds = array<i64: 1, 32>}, {pipeline_mode = #tpu.pipeline_mode<synchronous>, transform_indices = @transform_16, window_bounds = array<i64: 32, 32>}, {pipeline_mode = #tpu.pipeline_mode<synchronous>, transform_indices = @transform_17, window_bounds = array<i64: 1, 32>}, {pipeline_mode = #tpu.pipeline_mode<synchronous>, transform_indices = @transform_18, window_bounds = array<i64: 32, 32>}, {pipeline_mode = #tpu.pipeline_mode<synchronous>, transform_indices = @transform_19, window_bounds = array<i64: 1, 32>}, {pipeline_mode = #tpu.pipeline_mode<synchronous>, transform_indices = @transform_20, window_bounds = array<i64: 32, 32>}, {pipeline_mode = #tpu.pipeline_mode<synchronous>, transform_indices = @transform_21, window_bounds = array<i64: 1, 32>}, {pipeline_mode = #tpu.pipeline_mode<synchronous>, transform_indices = @transform_22, window_bounds = array<i64: 1, 32>}, {pipeline_mode = #tpu.pipeline_mode<synchronous>, transform_indices = @transform_23, window_bounds = array<i64: 1, 32>}, {pipeline_mode = #tpu.pipeline_mode<synchronous>, transform_indices = @transform_24, window_bounds = array<i64: 32, 64>}, {pipeline_mode = #tpu.pipeline_mode<synchronous>, transform_indices = @transform_25, window_bounds = array<i64: 1, 64>}, {pipeline_mode = #tpu.pipeline_mode<synchronous>, transform_indices = @transform_26, window_bounds = array<i64: 64, 32>}, {pipeline_mode = #tpu.pipeline_mode<synchronous>, transform_indices = @transform_27, window_bounds = array<i64: 1, 32>}, {pipeline_mode = #tpu.pipeline_mode<synchronous>, transform_indices = @transform_28, window_bounds = array<i64: 1, 32>}, {pipeline_mode = #tpu.pipeline_mode<synchronous>, transform_indices = @transform_29, window_bounds = array<i64: 1, 32>}, {pipeline_mode = #tpu.pipeline_mode<synchronous>, transform_indices = @transform_30, window_bounds = array<i64: 1, 32>}, {pipeline_mode = #tpu.pipeline_mode<synchronous>, transform_indices = @transform_31, window_bounds = array<i64: 1, 32>}, {transform_indices = @transform_32, window_bounds = array<i64: 1, 8, 32>}]} {
    %c0 = arith.constant 0 : index
    %c0_0 = arith.constant 0 : index
    %c0_1 = arith.constant 0 : index
    %0 = vector.load %arg1[%c0, %c0_0, %c0_1] : memref<1x8x32xf32, #tpu.memory_space<vmem>>, vector<1x8x32xf32>
    %1 = vector.shape_cast %0 : vector<1x8x32xf32> to vector<8x32xf32>
    %c0_2 = arith.constant 0 : index
    %c0_3 = arith.constant 0 : index
    %2 = vector.load %arg2[%c0_2, %c0_3] : memref<8x32xf32, #tpu.memory_space<vmem>>, vector<8x32xf32>
    %c0_4 = arith.constant 0 : index
    %c0_5 = arith.constant 0 : index
    %c0_6 = arith.constant 0 : index
    %3 = vector.load %arg3[%c0_4, %c0_5, %c0_6] : memref<1x16x32xf32, #tpu.memory_space<vmem>>, vector<1x16x32xf32>
    %4 = vector.shape_cast %3 : vector<1x16x32xf32> to vector<16x32xf32>
    %c0_7 = arith.constant 0 : index
    %c0_8 = arith.constant 0 : index
    %c0_9 = arith.constant 0 : index
    %5 = vector.load %arg4[%c0_7, %c0_8, %c0_9] : memref<1x16x32xf32, #tpu.memory_space<vmem>>, vector<1x16x32xf32>
    %6 = vector.shape_cast %5 : vector<1x16x32xf32> to vector<16x32xf32>
    %7 = arith.addf %1, %2 : vector<8x32xf32>
    %c0_10 = arith.constant 0 : index
    %c0_11 = arith.constant 0 : index
    %8 = vector.load %arg5[%c0_10, %c0_11] : memref<32x32xf32, #tpu.memory_space<vmem>>, vector<32x32xf32>
    %c0_12 = arith.constant 0 : index
    %c0_13 = arith.constant 0 : index
    %9 = vector.load %arg6[%c0_12, %c0_13] : memref<1x32xf32, #tpu.memory_space<vmem>>, vector<1x32xf32>
    %c0_14 = arith.constant 0 : index
    %c0_15 = arith.constant 0 : index
    %10 = vector.load %arg7[%c0_14, %c0_15] : memref<32x32xf32, #tpu.memory_space<vmem>>, vector<32x32xf32>
    %c0_16 = arith.constant 0 : index
    %c0_17 = arith.constant 0 : index
    %11 = vector.load %arg8[%c0_16, %c0_17] : memref<1x32xf32, #tpu.memory_space<vmem>>, vector<1x32xf32>
    %c0_18 = arith.constant 0 : index
    %c0_19 = arith.constant 0 : index
    %12 = vector.load %arg9[%c0_18, %c0_19] : memref<32x32xf32, #tpu.memory_space<vmem>>, vector<32x32xf32>
    %c0_20 = arith.constant 0 : index
    %c0_21 = arith.constant 0 : index
    %13 = vector.load %arg10[%c0_20, %c0_21] : memref<1x32xf32, #tpu.memory_space<vmem>>, vector<1x32xf32>
    %c0_22 = arith.constant 0 : index
    %c0_23 = arith.constant 0 : index
    %14 = vector.load %arg11[%c0_22, %c0_23] : memref<32x32xf32, #tpu.memory_space<vmem>>, vector<32x32xf32>
    %c0_24 = arith.constant 0 : index
    %c0_25 = arith.constant 0 : index
    %15 = vector.load %arg12[%c0_24, %c0_25] : memref<1x32xf32, #tpu.memory_space<vmem>>, vector<1x32xf32>
    %cst = arith.constant dense<0.000000e+00> : vector<8x32xf32>
    %16 = tpu.matmul %7, %8, %cst {dimension_numbers = #tpu.dot_dimension_numbers<[1], [0], [0], [1], [0, 0, 1, 1], [], []>} : vector<8x32xf32>, vector<32x32xf32>, vector<8x32xf32> -> vector<8x32xf32>
    %17 = vector.broadcast %9 : vector<1x32xf32> to vector<8x32xf32>
    %18 = arith.addf %16, %17 : vector<8x32xf32>
    %cst_26 = arith.constant dense<0.000000e+00> : vector<8x32xf32>
    %19 = tpu.matmul %7, %10, %cst_26 {dimension_numbers = #tpu.dot_dimension_numbers<[1], [0], [0], [1], [0, 0, 1, 1], [], []>} : vector<8x32xf32>, vector<32x32xf32>, vector<8x32xf32> -> vector<8x32xf32>
    %20 = vector.broadcast %11 : vector<1x32xf32> to vector<8x32xf32>
    %21 = arith.addf %19, %20 : vector<8x32xf32>
    %cst_27 = arith.constant dense<0.000000e+00> : vector<8x32xf32>
    %22 = tpu.matmul %1, %12, %cst_27 {dimension_numbers = #tpu.dot_dimension_numbers<[1], [0], [0], [1], [0, 0, 1, 1], [], []>} : vector<8x32xf32>, vector<32x32xf32>, vector<8x32xf32> -> vector<8x32xf32>
    %23 = vector.broadcast %13 : vector<1x32xf32> to vector<8x32xf32>
    %24 = arith.addf %22, %23 : vector<8x32xf32>
    %25 = vector.shape_cast %18 : vector<8x32xf32> to vector<8x4x8xf32>
    %26 = vector.shape_cast %21 : vector<8x32xf32> to vector<8x4x8xf32>
    %27 = vector.shape_cast %24 : vector<8x32xf32> to vector<8x4x8xf32>
    "tpu.trace_start"() <{level = 10 : i32, message = "lhd,shd->hls"}> : () -> ()
    %cst_28 = arith.constant dense<0.000000e+00> : vector<4x8x8xf32>
    %28 = tpu.matmul %25, %26, %cst_28 {dimension_numbers = #tpu.dot_dimension_numbers<[2], [2], [0], [0], [0, 1, 0, 0, 1, 0], [1], [1]>} : vector<8x4x8xf32>, vector<8x4x8xf32>, vector<4x8x8xf32> -> vector<4x8x8xf32>
    "tpu.trace_stop"() : () -> ()
    %cst_29 = arith.constant dense<0xFF800000> : vector<4x8xf32>
    %29 = vector.multi_reduction <maximumf>, %28, %cst_29 [2] : vector<4x8x8xf32> to vector<4x8xf32>
    %30 = vector.shape_cast %29 : vector<4x8xf32> to vector<4x8x1xf32>
    %31 = vector.broadcast %30 : vector<4x8x1xf32> to vector<4x8x8xf32>
    %32 = arith.subf %28, %31 : vector<4x8x8xf32>
    %33 = math.exp %32 : vector<4x8x8xf32>
    %cst_30 = arith.constant dense<0.000000e+00> : vector<4x8xf32>
    %34 = vector.multi_reduction <add>, %33, %cst_30 [2] : vector<4x8x8xf32> to vector<4x8xf32>
    %35 = vector.shape_cast %34 : vector<4x8xf32> to vector<4x8x1xf32>
    %36 = tpu.reciprocal %35 : vector<4x8x1xf32> -> vector<4x8x1xf32>
    %37 = vector.broadcast %36 : vector<4x8x1xf32> to vector<4x8x8xf32>
    %38 = arith.mulf %33, %37 : vector<4x8x8xf32>
    "tpu.trace_start"() <{level = 10 : i32, message = "hls,shd->lhd"}> : () -> ()
    %cst_31 = arith.constant dense<0.000000e+00> : vector<4x8x8xf32>
    %39 = tpu.matmul %27, %38, %cst_31 {dimension_numbers = #tpu.dot_dimension_numbers<[0], [2], [2], [1], [0, 1, 0, 2, 1, 1], [1], [0]>} : vector<8x4x8xf32>, vector<4x8x8xf32>, vector<4x8x8xf32> -> vector<4x8x8xf32>
    %40 = tpu.transpose %39, [2, 0, 1] : vector<4x8x8xf32> -> vector<8x4x8xf32>
    "tpu.trace_stop"() : () -> ()
    %41 = vector.shape_cast %40 : vector<8x4x8xf32> to vector<8x32xf32>
    %cst_32 = arith.constant dense<0.000000e+00> : vector<8x32xf32>
    %42 = tpu.matmul %41, %14, %cst_32 {dimension_numbers = #tpu.dot_dimension_numbers<[1], [0], [0], [1], [0, 0, 1, 1], [], []>} : vector<8x32xf32>, vector<32x32xf32>, vector<8x32xf32> -> vector<8x32xf32>
    %43 = vector.broadcast %15 : vector<1x32xf32> to vector<8x32xf32>
    %44 = arith.addf %42, %43 : vector<8x32xf32>
    %45 = arith.addf %1, %44 : vector<8x32xf32>
    %c0_33 = arith.constant 0 : index
    %c0_34 = arith.constant 0 : index
    %46 = vector.load %arg13[%c0_33, %c0_34] : memref<1x32xf32, #tpu.memory_space<vmem>>, vector<1x32xf32>
    %c0_35 = arith.constant 0 : index
    %c0_36 = arith.constant 0 : index
    %47 = vector.load %arg14[%c0_35, %c0_36] : memref<1x32xf32, #tpu.memory_space<vmem>>, vector<1x32xf32>
    %cst_37 = arith.constant dense<0.000000e+00> : vector<8xf32>
    %48 = vector.multi_reduction <add>, %45, %cst_37 [1] : vector<8x32xf32> to vector<8xf32>
    %49 = vector.shape_cast %48 : vector<8xf32> to vector<8x1xf32>
    %cst_38 = arith.constant 3.200000e+01 : f32
    %50 = vector.broadcast %cst_38 : f32 to vector<8x1xf32>
    %51 = arith.divf %49, %50 : vector<8x1xf32>
    %52 = vector.broadcast %51 : vector<8x1xf32> to vector<8x32xf32>
    %53 = arith.subf %45, %52 : vector<8x32xf32>
    %54 = arith.mulf %53, %53 : vector<8x32xf32>
    %cst_39 = arith.constant dense<0.000000e+00> : vector<8xf32>
    %55 = vector.multi_reduction <add>, %54, %cst_39 [1] : vector<8x32xf32> to vector<8xf32>
    %56 = vector.shape_cast %55 : vector<8xf32> to vector<8x1xf32>
    %cst_40 = arith.constant 3.200000e+01 : f32
    %57 = vector.broadcast %cst_40 : f32 to vector<8x1xf32>
    %58 = arith.divf %56, %57 : vector<8x1xf32>
    %59 = vector.broadcast %51 : vector<8x1xf32> to vector<8x32xf32>
    %60 = arith.subf %45, %59 : vector<8x32xf32>
    %cst_41 = arith.constant 9.99999974E-6 : f32
    %61 = vector.broadcast %cst_41 : f32 to vector<8x1xf32>
    %62 = arith.addf %58, %61 : vector<8x1xf32>
    %63 = math.rsqrt %62 : vector<8x1xf32>
    %64 = vector.broadcast %63 : vector<8x1xf32> to vector<8x32xf32>
    %65 = arith.mulf %60, %64 : vector<8x32xf32>
    %66 = vector.broadcast %46 : vector<1x32xf32> to vector<8x32xf32>
    %67 = arith.mulf %65, %66 : vector<8x32xf32>
    %68 = vector.broadcast %47 : vector<1x32xf32> to vector<8x32xf32>
    %69 = arith.addf %67, %68 : vector<8x32xf32>
    %70 = arith.addf %69, %2 : vector<8x32xf32>
    %71 = arith.addf %4, %6 : vector<16x32xf32>
    %c0_42 = arith.constant 0 : index
    %c0_43 = arith.constant 0 : index
    %72 = vector.load %arg15[%c0_42, %c0_43] : memref<32x32xf32, #tpu.memory_space<vmem>>, vector<32x32xf32>
    %c0_44 = arith.constant 0 : index
    %c0_45 = arith.constant 0 : index
    %73 = vector.load %arg16[%c0_44, %c0_45] : memref<1x32xf32, #tpu.memory_space<vmem>>, vector<1x32xf32>
    %c0_46 = arith.constant 0 : index
    %c0_47 = arith.constant 0 : index
    %74 = vector.load %arg17[%c0_46, %c0_47] : memref<32x32xf32, #tpu.memory_space<vmem>>, vector<32x32xf32>
    %c0_48 = arith.constant 0 : index
    %c0_49 = arith.constant 0 : index
    %75 = vector.load %arg18[%c0_48, %c0_49] : memref<1x32xf32, #tpu.memory_space<vmem>>, vector<1x32xf32>
    %c0_50 = arith.constant 0 : index
    %c0_51 = arith.constant 0 : index
    %76 = vector.load %arg19[%c0_50, %c0_51] : memref<32x32xf32, #tpu.memory_space<vmem>>, vector<32x32xf32>
    %c0_52 = arith.constant 0 : index
    %c0_53 = arith.constant 0 : index
    %77 = vector.load %arg20[%c0_52, %c0_53] : memref<1x32xf32, #tpu.memory_space<vmem>>, vector<1x32xf32>
    %c0_54 = arith.constant 0 : index
    %c0_55 = arith.constant 0 : index
    %78 = vector.load %arg21[%c0_54, %c0_55] : memref<32x32xf32, #tpu.memory_space<vmem>>, vector<32x32xf32>
    %c0_56 = arith.constant 0 : index
    %c0_57 = arith.constant 0 : index
    %79 = vector.load %arg22[%c0_56, %c0_57] : memref<1x32xf32, #tpu.memory_space<vmem>>, vector<1x32xf32>
    %cst_58 = arith.constant dense<0.000000e+00> : vector<8x32xf32>
    %80 = tpu.matmul %70, %72, %cst_58 {dimension_numbers = #tpu.dot_dimension_numbers<[1], [0], [0], [1], [0, 0, 1, 1], [], []>} : vector<8x32xf32>, vector<32x32xf32>, vector<8x32xf32> -> vector<8x32xf32>
    %81 = vector.broadcast %73 : vector<1x32xf32> to vector<8x32xf32>
    %82 = arith.addf %80, %81 : vector<8x32xf32>
    %cst_59 = arith.constant dense<0.000000e+00> : vector<16x32xf32>
    %83 = tpu.matmul %71, %74, %cst_59 {dimension_numbers = #tpu.dot_dimension_numbers<[1], [0], [0], [1], [0, 0, 1, 1], [], []>} : vector<16x32xf32>, vector<32x32xf32>, vector<16x32xf32> -> vector<16x32xf32>
    %84 = vector.broadcast %75 : vector<1x32xf32> to vector<16x32xf32>
    %85 = arith.addf %83, %84 : vector<16x32xf32>
    %cst_60 = arith.constant dense<0.000000e+00> : vector<16x32xf32>
    %86 = tpu.matmul %4, %76, %cst_60 {dimension_numbers = #tpu.dot_dimension_numbers<[1], [0], [0], [1], [0, 0, 1, 1], [], []>} : vector<16x32xf32>, vector<32x32xf32>, vector<16x32xf32> -> vector<16x32xf32>
    %87 = vector.broadcast %77 : vector<1x32xf32> to vector<16x32xf32>
    %88 = arith.addf %86, %87 : vector<16x32xf32>
    %89 = vector.shape_cast %82 : vector<8x32xf32> to vector<8x4x8xf32>
    %90 = vector.shape_cast %85 : vector<16x32xf32> to vector<16x4x8xf32>
    %91 = vector.shape_cast %88 : vector<16x32xf32> to vector<16x4x8xf32>
    "tpu.trace_start"() <{level = 10 : i32, message = "lhd,shd->hls"}> : () -> ()
    %cst_61 = arith.constant dense<0.000000e+00> : vector<4x8x16xf32>
    %92 = tpu.matmul %89, %90, %cst_61 {dimension_numbers = #tpu.dot_dimension_numbers<[2], [2], [0], [0], [0, 1, 0, 0, 1, 0], [1], [1]>} : vector<8x4x8xf32>, vector<16x4x8xf32>, vector<4x8x16xf32> -> vector<4x8x16xf32>
    "tpu.trace_stop"() : () -> ()
    %cst_62 = arith.constant dense<0xFF800000> : vector<4x8xf32>
    %93 = vector.multi_reduction <maximumf>, %92, %cst_62 [2] : vector<4x8x16xf32> to vector<4x8xf32>
    %94 = vector.shape_cast %93 : vector<4x8xf32> to vector<4x8x1xf32>
    %95 = vector.broadcast %94 : vector<4x8x1xf32> to vector<4x8x16xf32>
    %96 = arith.subf %92, %95 : vector<4x8x16xf32>
    %97 = math.exp %96 : vector<4x8x16xf32>
    %cst_63 = arith.constant dense<0.000000e+00> : vector<4x8xf32>
    %98 = vector.multi_reduction <add>, %97, %cst_63 [2] : vector<4x8x16xf32> to vector<4x8xf32>
    %99 = vector.shape_cast %98 : vector<4x8xf32> to vector<4x8x1xf32>
    %100 = tpu.reciprocal %99 : vector<4x8x1xf32> -> vector<4x8x1xf32>
    %101 = vector.broadcast %100 : vector<4x8x1xf32> to vector<4x8x16xf32>
    %102 = arith.mulf %97, %101 : vector<4x8x16xf32>
    "tpu.trace_start"() <{level = 10 : i32, message = "hls,shd->lhd"}> : () -> ()
    %cst_64 = arith.constant dense<0.000000e+00> : vector<4x8x8xf32>
    %103 = tpu.matmul %91, %102, %cst_64 {dimension_numbers = #tpu.dot_dimension_numbers<[0], [2], [2], [1], [0, 1, 0, 2, 1, 1], [1], [0]>} : vector<16x4x8xf32>, vector<4x8x16xf32>, vector<4x8x8xf32> -> vector<4x8x8xf32>
    %104 = tpu.transpose %103, [2, 0, 1] : vector<4x8x8xf32> -> vector<8x4x8xf32>
    "tpu.trace_stop"() : () -> ()
    %105 = vector.shape_cast %104 : vector<8x4x8xf32> to vector<8x32xf32>
    %cst_65 = arith.constant dense<0.000000e+00> : vector<8x32xf32>
    %106 = tpu.matmul %105, %78, %cst_65 {dimension_numbers = #tpu.dot_dimension_numbers<[1], [0], [0], [1], [0, 0, 1, 1], [], []>} : vector<8x32xf32>, vector<32x32xf32>, vector<8x32xf32> -> vector<8x32xf32>
    %107 = vector.broadcast %79 : vector<1x32xf32> to vector<8x32xf32>
    %108 = arith.addf %106, %107 : vector<8x32xf32>
    %109 = arith.addf %69, %108 : vector<8x32xf32>
    %c0_66 = arith.constant 0 : index
    %c0_67 = arith.constant 0 : index
    %110 = vector.load %arg23[%c0_66, %c0_67] : memref<1x32xf32, #tpu.memory_space<vmem>>, vector<1x32xf32>
    %c0_68 = arith.constant 0 : index
    %c0_69 = arith.constant 0 : index
    %111 = vector.load %arg24[%c0_68, %c0_69] : memref<1x32xf32, #tpu.memory_space<vmem>>, vector<1x32xf32>
    %cst_70 = arith.constant dense<0.000000e+00> : vector<8xf32>
    %112 = vector.multi_reduction <add>, %109, %cst_70 [1] : vector<8x32xf32> to vector<8xf32>
    %113 = vector.shape_cast %112 : vector<8xf32> to vector<8x1xf32>
    %cst_71 = arith.constant 3.200000e+01 : f32
    %114 = vector.broadcast %cst_71 : f32 to vector<8x1xf32>
    %115 = arith.divf %113, %114 : vector<8x1xf32>
    %116 = vector.broadcast %115 : vector<8x1xf32> to vector<8x32xf32>
    %117 = arith.subf %109, %116 : vector<8x32xf32>
    %118 = arith.mulf %117, %117 : vector<8x32xf32>
    %cst_72 = arith.constant dense<0.000000e+00> : vector<8xf32>
    %119 = vector.multi_reduction <add>, %118, %cst_72 [1] : vector<8x32xf32> to vector<8xf32>
    %120 = vector.shape_cast %119 : vector<8xf32> to vector<8x1xf32>
    %cst_73 = arith.constant 3.200000e+01 : f32
    %121 = vector.broadcast %cst_73 : f32 to vector<8x1xf32>
    %122 = arith.divf %120, %121 : vector<8x1xf32>
    %123 = vector.broadcast %115 : vector<8x1xf32> to vector<8x32xf32>
    %124 = arith.subf %109, %123 : vector<8x32xf32>
    %cst_74 = arith.constant 9.99999974E-6 : f32
    %125 = vector.broadcast %cst_74 : f32 to vector<8x1xf32>
    %126 = arith.addf %122, %125 : vector<8x1xf32>
    %127 = math.rsqrt %126 : vector<8x1xf32>
    %128 = vector.broadcast %127 : vector<8x1xf32> to vector<8x32xf32>
    %129 = arith.mulf %124, %128 : vector<8x32xf32>
    %130 = vector.broadcast %110 : vector<1x32xf32> to vector<8x32xf32>
    %131 = arith.mulf %129, %130 : vector<8x32xf32>
    %132 = vector.broadcast %111 : vector<1x32xf32> to vector<8x32xf32>
    %133 = arith.addf %131, %132 : vector<8x32xf32>
    %c0_75 = arith.constant 0 : index
    %c0_76 = arith.constant 0 : index
    %134 = vector.load %arg25[%c0_75, %c0_76] : memref<32x64xf32, #tpu.memory_space<vmem>>, vector<32x64xf32>
    %cst_77 = arith.constant dense<0.000000e+00> : vector<8x64xf32>
    %135 = tpu.matmul %133, %134, %cst_77 {dimension_numbers = #tpu.dot_dimension_numbers<[1], [0], [0], [1], [0, 0, 1, 1], [], []>} : vector<8x32xf32>, vector<32x64xf32>, vector<8x64xf32> -> vector<8x64xf32>
    %c0_78 = arith.constant 0 : index
    %c0_79 = arith.constant 0 : index
    %136 = vector.load %arg26[%c0_78, %c0_79] : memref<1x64xf32, #tpu.memory_space<vmem>>, vector<1x64xf32>
    %137 = vector.broadcast %136 : vector<1x64xf32> to vector<8x64xf32>
    %138 = arith.addf %135, %137 : vector<8x64xf32>
    %cst_80 = arith.constant 0.000000e+00 : f32
    %139 = vector.broadcast %cst_80 : f32 to vector<8x64xf32>
    %140 = arith.maximumf %138, %139 : vector<8x64xf32>
    %c0_81 = arith.constant 0 : index
    %c0_82 = arith.constant 0 : index
    %141 = vector.load %arg27[%c0_81, %c0_82] : memref<64x32xf32, #tpu.memory_space<vmem>>, vector<64x32xf32>
    %cst_83 = arith.constant dense<0.000000e+00> : vector<8x32xf32>
    %142 = tpu.matmul %140, %141, %cst_83 {dimension_numbers = #tpu.dot_dimension_numbers<[1], [0], [0], [1], [0, 0, 1, 1], [], []>} : vector<8x64xf32>, vector<64x32xf32>, vector<8x32xf32> -> vector<8x32xf32>
    %c0_84 = arith.constant 0 : index
    %c0_85 = arith.constant 0 : index
    %143 = vector.load %arg28[%c0_84, %c0_85] : memref<1x32xf32, #tpu.memory_space<vmem>>, vector<1x32xf32>
    %144 = vector.broadcast %143 : vector<1x32xf32> to vector<8x32xf32>
    %145 = arith.addf %142, %144 : vector<8x32xf32>
    %146 = arith.addf %133, %145 : vector<8x32xf32>
    %c0_86 = arith.constant 0 : index
    %c0_87 = arith.constant 0 : index
    %147 = vector.load %arg29[%c0_86, %c0_87] : memref<1x32xf32, #tpu.memory_space<vmem>>, vector<1x32xf32>
    %c0_88 = arith.constant 0 : index
    %c0_89 = arith.constant 0 : index
    %148 = vector.load %arg30[%c0_88, %c0_89] : memref<1x32xf32, #tpu.memory_space<vmem>>, vector<1x32xf32>
    %cst_90 = arith.constant dense<0.000000e+00> : vector<8xf32>
    %149 = vector.multi_reduction <add>, %146, %cst_90 [1] : vector<8x32xf32> to vector<8xf32>
    %150 = vector.shape_cast %149 : vector<8xf32> to vector<8x1xf32>
    %cst_91 = arith.constant 3.200000e+01 : f32
    %151 = vector.broadcast %cst_91 : f32 to vector<8x1xf32>
    %152 = arith.divf %150, %151 : vector<8x1xf32>
    %153 = vector.broadcast %152 : vector<8x1xf32> to vector<8x32xf32>
    %154 = arith.subf %146, %153 : vector<8x32xf32>
    %155 = arith.mulf %154, %154 : vector<8x32xf32>
    %cst_92 = arith.constant dense<0.000000e+00> : vector<8xf32>
    %156 = vector.multi_reduction <add>, %155, %cst_92 [1] : vector<8x32xf32> to vector<8xf32>
    %157 = vector.shape_cast %156 : vector<8xf32> to vector<8x1xf32>
    %cst_93 = arith.constant 3.200000e+01 : f32
    %158 = vector.broadcast %cst_93 : f32 to vector<8x1xf32>
    %159 = arith.divf %157, %158 : vector<8x1xf32>
    %160 = vector.broadcast %152 : vector<8x1xf32> to vector<8x32xf32>
    %161 = arith.subf %146, %160 : vector<8x32xf32>
    %cst_94 = arith.constant 9.99999974E-6 : f32
    %162 = vector.broadcast %cst_94 : f32 to vector<8x1xf32>
    %163 = arith.addf %159, %162 : vector<8x1xf32>
    %164 = math.rsqrt %163 : vector<8x1xf32>
    %165 = vector.broadcast %164 : vector<8x1xf32> to vector<8x32xf32>
    %166 = arith.mulf %161, %165 : vector<8x32xf32>
    %167 = vector.broadcast %147 : vector<1x32xf32> to vector<8x32xf32>
    %168 = arith.mulf %166, %167 : vector<8x32xf32>
    %169 = vector.broadcast %148 : vector<1x32xf32> to vector<8x32xf32>
    %170 = arith.addf %168, %169 : vector<8x32xf32>
    %c0_95 = arith.constant 0 : index
    %c0_96 = arith.constant 0 : index
    %c0_97 = arith.constant 0 : index
    %171 = vector.load %arg33[%c0_95, %c0_96, %c0_97] : memref<1x8x32xf32, #tpu.memory_space<vmem>>, vector<1x8x32xf32>
    %172 = vector.shape_cast %171 : vector<1x8x32xf32> to vector<8x32xf32>
    %173 = vector.shape_cast %170 : vector<8x32xf32> to vector<1x8x32xf32>
    tpu.vector_store %arg33[%c0_95, %c0_96, %c0_97], %173 {strides = array<i32>} : memref<1x8x32xf32, #tpu.memory_space<vmem>>, vector<1x8x32xf32>,
    return
  }
  func.func @transform_0(%arg0: i32) -> (i32, i32, i32) {
    %c0_i32 = arith.constant 0 : i32
    %c0_i32_0 = arith.constant 0 : i32
    %c0_i32_1 = arith.constant 0 : i32
    return %arg0, %c0_i32, %c0_i32_0 : i32, i32, i32
  }
  func.func @transform_1(%arg0: i32) -> (i32, i32) {
    %c0_i32 = arith.constant 0 : i32
    %c0_i32_0 = arith.constant 0 : i32
    %c0_i32_1 = arith.constant 0 : i32
    return %c0_i32, %c0_i32_0 : i32, i32
  }
  func.func @transform_2(%arg0: i32) -> (i32, i32, i32) {
    %c0_i32 = arith.constant 0 : i32
    %c0_i32_0 = arith.constant 0 : i32
    %c0_i32_1 = arith.constant 0 : i32
    return %arg0, %c0_i32, %c0_i32_0 : i32, i32, i32
  }
  func.func @transform_3(%arg0: i32) -> (i32, i32, i32) {
    %c0_i32 = arith.constant 0 : i32
    %c0_i32_0 = arith.constant 0 : i32
    %c0_i32_1 = arith.constant 0 : i32
    return %arg0, %c0_i32, %c0_i32_0 : i32, i32, i32
  }
  func.func @transform_4(%arg0: i32) -> (i32, i32) {
    %c0_i32 = arith.constant 0 : i32
    %c0_i32_0 = arith.constant 0 : i32
    %c0_i32_1 = arith.constant 0 : i32
    return %c0_i32, %c0_i32_0 : i32, i32
  }
  func.func @transform_5(%arg0: i32) -> (i32, i32) {
    %c0_i32 = arith.constant 0 : i32
    %c0_i32_0 = arith.constant 0 : i32
    %c0_i32_1 = arith.constant 0 : i32
    return %c0_i32, %c0_i32_0 : i32, i32
  }
  func.func @transform_6(%arg0: i32) -> (i32, i32) {
    %c0_i32 = arith.constant 0 : i32
    %c0_i32_0 = arith.constant 0 : i32
    %c0_i32_1 = arith.constant 0 : i32
    return %c0_i32, %c0_i32_0 : i32, i32
  }
  func.func @transform_7(%arg0: i32) -> (i32, i32) {
    %c0_i32 = arith.constant 0 : i32
    %c0_i32_0 = arith.constant 0 : i32
    %c0_i32_1 = arith.constant 0 : i32
    return %c0_i32, %c0_i32_0 : i32, i32
  }
  func.func @transform_8(%arg0: i32) -> (i32, i32) {
    %c0_i32 = arith.constant 0 : i32
    %c0_i32_0 = arith.constant 0 : i32
    %c0_i32_1 = arith.constant 0 : i32
    return %c0_i32, %c0_i32_0 : i32, i32
  }
  func.func @transform_9(%arg0: i32) -> (i32, i32) {
    %c0_i32 = arith.constant 0 : i32
    %c0_i32_0 = arith.constant 0 : i32
    %c0_i32_1 = arith.constant 0 : i32
    return %c0_i32, %c0_i32_0 : i32, i32
  }
  func.func @transform_10(%arg0: i32) -> (i32, i32) {
    %c0_i32 = arith.constant 0 : i32
    %c0_i32_0 = arith.constant 0 : i32
    %c0_i32_1 = arith.constant 0 : i32
    return %c0_i32, %c0_i32_0 : i32, i32
  }
  func.func @transform_11(%arg0: i32) -> (i32, i32) {
    %c0_i32 = arith.constant 0 : i32
    %c0_i32_0 = arith.constant 0 : i32
    %c0_i32_1 = arith.constant 0 : i32
    return %c0_i32, %c0_i32_0 : i32, i32
  }
  func.func @transform_12(%arg0: i32) -> (i32, i32) {
    %c0_i32 = arith.constant 0 : i32
    %c0_i32_0 = arith.constant 0 : i32
    %c0_i32_1 = arith.constant 0 : i32
    return %c0_i32, %c0_i32_0 : i32, i32
  }
  func.func @transform_13(%arg0: i32) -> (i32, i32) {
    %c0_i32 = arith.constant 0 : i32
    %c0_i32_0 = arith.constant 0 : i32
    %c0_i32_1 = arith.constant 0 : i32
    return %c0_i32, %c0_i32_0 : i32, i32
  }
  func.func @transform_14(%arg0: i32) -> (i32, i32) {
    %c0_i32 = arith.constant 0 : i32
    %c0_i32_0 = arith.constant 0 : i32
    %c0_i32_1 = arith.constant 0 : i32
    return %c0_i32, %c0_i32_0 : i32, i32
  }
  func.func @transform_15(%arg0: i32) -> (i32, i32) {
    %c0_i32 = arith.constant 0 : i32
    %c0_i32_0 = arith.constant 0 : i32
    %c0_i32_1 = arith.constant 0 : i32
    return %c0_i32, %c0_i32_0 : i32, i32
  }
  func.func @transform_16(%arg0: i32) -> (i32, i32) {
    %c0_i32 = arith.constant 0 : i32
    %c0_i32_0 = arith.constant 0 : i32
    %c0_i32_1 = arith.constant 0 : i32
    return %c0_i32, %c0_i32_0 : i32, i32
  }
  func.func @transform_17(%arg0: i32) -> (i32, i32) {
    %c0_i32 = arith.constant 0 : i32
    %c0_i32_0 = arith.constant 0 : i32
    %c0_i32_1 = arith.constant 0 : i32
    return %c0_i32, %c0_i32_0 : i32, i32
  }
  func.func @transform_18(%arg0: i32) -> (i32, i32) {
    %c0_i32 = arith.constant 0 : i32
    %c0_i32_0 = arith.constant 0 : i32
    %c0_i32_1 = arith.constant 0 : i32
    return %c0_i32, %c0_i32_0 : i32, i32
  }
  func.func @transform_19(%arg0: i32) -> (i32, i32) {
    %c0_i32 = arith.constant 0 : i32
    %c0_i32_0 = arith.constant 0 : i32
    %c0_i32_1 = arith.constant 0 : i32
    return %c0_i32, %c0_i32_0 : i32, i32
  }
  func.func @transform_20(%arg0: i32) -> (i32, i32) {
    %c0_i32 = arith.constant 0 : i32
    %c0_i32_0 = arith.constant 0 : i32
    %c0_i32_1 = arith.constant 0 : i32
    return %c0_i32, %c0_i32_0 : i32, i32
  }
  func.func @transform_21(%arg0: i32) -> (i32, i32) {
    %c0_i32 = arith.constant 0 : i32
    %c0_i32_0 = arith.constant 0 : i32
    %c0_i32_1 = arith.constant 0 : i32
    return %c0_i32, %c0_i32_0 : i32, i32
  }
  func.func @transform_22(%arg0: i32) -> (i32, i32) {
    %c0_i32 = arith.constant 0 : i32
    %c0_i32_0 = arith.constant 0 : i32
    %c0_i32_1 = arith.constant 0 : i32
    return %c0_i32, %c0_i32_0 : i32, i32
  }
  func.func @transform_23(%arg0: i32) -> (i32, i32) {
    %c0_i32 = arith.constant 0 : i32
    %c0_i32_0 = arith.constant 0 : i32
    %c0_i32_1 = arith.constant 0 : i32
    return %c0_i32, %c0_i32_0 : i32, i32
  }
  func.func @transform_24(%arg0: i32) -> (i32, i32) {
    %c0_i32 = arith.constant 0 : i32
    %c0_i32_0 = arith.constant 0 : i32
    %c0_i32_1 = arith.constant 0 : i32
    return %c0_i32, %c0_i32_0 : i32, i32
  }
  func.func @transform_25(%arg0: i32) -> (i32, i32) {
    %c0_i32 = arith.constant 0 : i32
    %c0_i32_0 = arith.constant 0 : i32
    %c0_i32_1 = arith.constant 0 : i32
    return %c0_i32, %c0_i32_0 : i32, i32
  }
  func.func @transform_26(%arg0: i32) -> (i32, i32) {
    %c0_i32 = arith.constant 0 : i32
    %c0_i32_0 = arith.constant 0 : i32
    %c0_i32_1 = arith.constant 0 : i32
    return %c0_i32, %c0_i32_0 : i32, i32
  }
  func.func @transform_27(%arg0: i32) -> (i32, i32) {
    %c0_i32 = arith.constant 0 : i32
    %c0_i32_0 = arith.constant 0 : i32
    %c0_i32_1 = arith.constant 0 : i32
    return %c0_i32, %c0_i32_0 : i32, i32
  }
  func.func @transform_28(%arg0: i32) -> (i32, i32) {
    %c0_i32 = arith.constant 0 : i32
    %c0_i32_0 = arith.constant 0 : i32
    %c0_i32_1 = arith.constant 0 : i32
    return %c0_i32, %c0_i32_0 : i32, i32
  }
  func.func @transform_29(%arg0: i32) -> (i32, i32) {
    %c0_i32 = arith.constant 0 : i32
    %c0_i32_0 = arith.constant 0 : i32
    %c0_i32_1 = arith.constant 0 : i32
    return %c0_i32, %c0_i32_0 : i32, i32
  }
  func.func @transform_30(%arg0: i32) -> (i32, i32) {
    %c0_i32 = arith.constant 0 : i32
    %c0_i32_0 = arith.constant 0 : i32
    %c0_i32_1 = arith.constant 0 : i32
    return %c0_i32, %c0_i32_0 : i32, i32
  }
  func.func @transform_31(%arg0: i32) -> (i32, i32) {
    %c0_i32 = arith.constant 0 : i32
    %c0_i32_0 = arith.constant 0 : i32
    %c0_i32_1 = arith.constant 0 : i32
    return %c0_i32, %c0_i32_0 : i32, i32
  }
  func.func @transform_32(%arg0: i32) -> (i32, i32, i32) {
    %c0_i32 = arith.constant 0 : i32
    %c0_i32_0 = arith.constant 0 : i32
    %c0_i32_1 = arith.constant 0 : i32
    return %arg0, %c0_i32, %c0_i32_0 : i32, i32, i32
  }
}

</mosaic_0001>

<bundles_post_ra>
// kernel: transformer_forward.4
= control target key start
LH: loop header
LB: loop body
LE: loop exit
PB: predicated region body
PF: predicated region fallthrough
CT: control target
= control target key end

     0   :  { %s3274_s27 = smov 0   ;;  %s3569_s0 = inlined_call_operand.vmem [shape: f32[2,16,32], index: 0, kind: input, shape index: {}]   ;;  %s3570_s1 = inlined_call_operand.vmem [shape: f32[2,16,32], index: 1, kind: input, shape index: {}]   ;;  %s3571_s2 = inlined_call_operand.vmem [shape: f32[32,32], index: 2, kind: input, shape index: {}]   ;;  %s3572_s3 = inlined_call_operand.vmem [shape: f32[1,32], index: 3, kind: input, shape index: {}]   ;;  %s3573_s4 = inlined_call_operand.vmem [shape: f32[32,32], index: 4, kind: input, shape index: {}]   ;;  %s3574_s5 = inlined_call_operand.vmem [shape: f32[1,32], index: 5, kind: input, shape index: {}]   ;;  %s3575_s6 = inlined_call_operand.vmem [shape: f32[32,32], index: 6, kind: input, shape index: {}]   ;;  %s3576_s7 = inlined_call_operand.vmem [shape: f32[1,32], index: 7, kind: input, shape index: {}]   ;;  %s3577_s8 = inlined_call_operand.vmem [shape: f32[32,32], index: 8, kind: input, shape index: {}]   ;;  %s3578_s9 = inlined_call_operand.vmem [shape: f32[1,32], index: 9, kind: input, shape index: {}]   ;;  %s3579_s10 = inlined_call_operand.vmem [shape: f32[1,32], index: 10, kind: input, shape index: {}]   ;;  %s3580_s11 = inlined_call_operand.vmem [shape: f32[1,32], index: 11, kind: input, shape index: {}]   ;;  %s3581_s12 = inlined_call_operand.vmem [shape: f32[32,64], index: 12, kind: input, shape index: {}]   ;;  %s3582_s13 = inlined_call_operand.vmem [shape: f32[1,64], index: 13, kind: input, shape index: {}]   ;;  %s3583_s14 = inlined_call_operand.vmem [shape: f32[64,32], index: 14, kind: input, shape index: {}]   ;;  %s3584_s15 = inlined_call_operand.vmem [shape: f32[1,32], index: 15, kind: input, shape index: {}]   ;;  %s3585_s16 = inlined_call_operand.vmem [shape: f32[1,32], index: 16, kind: input, shape index: {}]   ;;  %s3586_s17 = inlined_call_operand.vmem [shape: f32[1,32], index: 17, kind: input, shape index: {}]   ;;  %s3587_s18 = inlined_call_operand.vmem [shape: f32[2,16,32], index: 18, kind: output, shape index: {}]  }
   0x1   :  { %3590 = sst [smem:[#allocation2_spill]] %s3569_s0 }
   0x2   :  { %3591 = sst [smem:[#allocation3_spill]] %s3570_s1 }
   0x3   :  { %3592 = sst [smem:[#allocation4_spill]] %s3571_s2 }
   0x4 LB: > { %s2781_s28 = sadd.s32 4294967295, %s3166_s27   ;;  %p2785_p0 = scmp.ge.s32.totalorder %s3166_s27, 1  ;;  %s3166_s27 = sphi %s3274_s27, %s28_s27  }
   0x5   : > { %p522_p1 = scmp.lt.s32.totalorder %s3166_s27, 3 }
   0x7   : > { %p523_p2 = pnand %p2785_p0, %p522_p1 }
   0x8   : > { %s3593_s0 = sld [smem:[#allocation4_spill]] (!%p523_p2)  ;;  %p581_p3 = scmp.lt.s32.totalorder (!%p523_p2), %s2781_s28, 1  ;;  %v607_v6 = vld [vmem:[%s3573_s4] sm:$0xff] (!%p523_p2)  ;;  %v608_v7 = vld [vmem:[%s3573_s4 + $0x8] sm:$0xff] (!%p523_p2)  ;;  %v609_v9 = vld [vmem:[%s3573_s4 + $0x10] sm:$0xff] (!%p523_p2)  ;;  %vm628_vm0 = vcmask (!%p523_p2), 261120  }
   0x9   : > { %526 = sbr.rel (%p523_p2) target bundleno = 2918 (0xb66), region = 92  ;;  %s3594_s1 = sld [smem:[#allocation2_spill]] (!%p523_p2)  ;;  %v3037_v8 = vpack.c.bf16 (!%p523_p2), %v608_v7, %v607_v6  ;;  %v610_v10 = vld [vmem:[%s3573_s4 + $0x18] sm:$0xff] (!%p523_p2)  ;;  %v2792_v18 = vld [vmem:[%s3572_s3] ss:$0 sm:$0xff] (!%p523_p2)  ;;  %vm1060_vm1 = vcmask (!%p523_p2), 64512  }
   0xa   : > { %s3595_s2 = sld [smem:[#allocation3_spill]] (!%p523_p2)  ;;  %v3041_v17 = vpack.c.bf16 (!%p523_p2), %v610_v10, %v609_v9  ;;  %v612_v22 = vld [vmem:[%s3575_s6] sm:$0xff] (!%p523_p2)  ;;  %v613_v23 = vld [vmem:[%s3575_s6 + $0x8] sm:$0xff] (!%p523_p2)  ;;  %v614_v26 = vld [vmem:[%s3575_s6 + $0x10] sm:$0xff] (!%p523_p2)  ;;  %s3168_s26 = smov (!%p523_p2), 104   ;;  %vm1377_vm2 = vcmask (!%p523_p2), 130048  }
   0xb   : > { %v3045_v24 = vpack.c.bf16 (!%p523_p2), %v613_v23, %v612_v22  ;;  %v2795_v25 = vld [vmem:[%s3574_s5] ss:$0 sm:$0xff] (!%p523_p2)  ;;  %v615_v27 = vld [vmem:[%s3575_s6 + $0x18] sm:$0xff] (!%p523_p2)  ;;  %vm3172_vm3 = vmmov (!%p523_p2), 0   ;;  %vm3430_vm4 = vmpackc.low (!%p523_p2), %vm1377_vm2, %vm1377_vm2  ;;  %vm2338_vm5 = vcmask (!%p523_p2), 195584   ;;  %vm2584_vm6 = vcmask (!%p523_p2), 523264  }
   0xc   : > { %v3049_v29 = vpack.c.bf16 (!%p523_p2), %v615_v27, %v614_v26 }
   0xd   : > { %3046 = vmatprep.subr.bf16.mxu0 (!%p523_p2), %v3045_v24 }
   0xe   : > { %v602_v0 = vld [vmem:[%s3593_s0] sm:$0xff] (!%p523_p2)  ;;  %v603_v1 = vld [vmem:[%s3593_s0 + $0x8] sm:$0xff] (!%p523_p2)  ;;  %v604_v2 = vld [vmem:[%s3593_s0 + $0x10] sm:$0xff] (!%p523_p2)  ;;  %3048 = vmatpush3.bf16.msra.mxu0 (!%p523_p2), %v3045_v24 }
   0xf   : > { %v3029_v3 = vpack.c.bf16 (!%p523_p2), %v603_v1, %v602_v0  ;;  %v605_v4 = vld [vmem:[%s3593_s0 + $0x18] sm:$0xff] (!%p523_p2)  ;;  %3050 = vmatprep.subr.bf16.mxu0 (!%p523_p2), %v3049_v29  ;;  %s3170_s0 = smov (!%p523_p2), 112  }
  0x10   : > { %v3033_v5 = vpack.c.bf16 %v605_v4, %v604_v2  ;;  %s3599_s28 = smov (!%p581_p3, %s2781_s28), 1  ;;  %v2798_v4 = vld [vmem:[%s3576_s7] ss:$0 sm:$0xff] }
  0x11   : > { %3030 = vmatprep.subr.bf16.mxu1 %v3029_v3  ;;  %s3300_s29 = sshll.u32 %s3599_s28, 4  ;;  %s3169_s28 = smov 120  }
  0x12   : > { %3032 = vmatpush3.bf16.msra.mxu1 %v3029_v3  ;;  %s585_s20 = scalar_lea.vmem %s3594_s1, %s3300_s29  ;;  %s590_s23 = scalar_lea.vmem %s3595_s2, %s3300_s29  ;;  %3052 = vmatpush3.bf16.msra.mxu0 %v3049_v29 }
  0x13   : > { %3034 = vmatprep.subr.bf16.mxu1 %v3033_v5  ;;  %v3316_v11 = vld [vmem:[%s585_s20] sm:$0xff]  ;;  %v3318_v12 = vld [vmem:[%s585_s20 + $0x8] sm:$0xff]  ;;  %s595_s19 = scalar_lea.vmem %s3587_s18, %s3300_s29 }
  0x14   : > { %v598_v13 = vld [vmem:[%s590_s23] sm:$0xff]  ;;  %v599_v14 = vld [vmem:[%s590_s23 + $0x8] sm:$0xff]  ;;  %2937 = vmatprep.mubr.msk.f32.mxu0 %vm628_vm0, %v3316_v11 }
  0x15   : > { %v600_v15 = vadd.f32 %v598_v13, %v3316_v11  ;;  %v601_v16 = vadd.f32 %v599_v14, %v3318_v12  ;;  %2938 = vmatmul.mubr.msk.f32.vlgmr.msra.gmra.mrb[0].mxu0 %vm628_vm0, %v3318_v12 }
  0x16   : > { %3036 = vmatpush3.bf16.msra.mxu1 %v3033_v5 }
  0x17   : > { %2915 = vmatprep.mubr.msk.f32.mxu1 %vm628_vm0, %v600_v15  ;;  %3038 = vmatprep.subr.bf16.mxu1 %v3037_v8 }
  0x19   : > { %2916 = vmatmul.mubr.msk.f32.vlgmr.msra.gmra.mrb[0].mxu1 %vm628_vm0, %v601_v16 }
  0x1a   : > { %3040 = vmatpush3.bf16.msra.mxu1 %v3037_v8  ;;  %2926 = vmatprep.mubr.msk.f32.mxu1 %vm628_vm0, %v600_v15 }
  0x1b   : > { %3042 = vmatprep.subr.bf16.mxu1 %v3041_v17 }
  0x1e   : > { %3044 = vmatpush3.bf16.msra.mxu1 %v3041_v17 }
  0x21   : > { %2927 = vmatmul.mubr.msk.f32.vlgmr.msra.gmra.mrb[2].mxu1 %vm628_vm0, %v601_v16 }
  0xe8   : > { %v2939_v50 = vpop.f32.mrb[0].mxu0 }
  0xe9   : > { %v869_v51 = vpop.f32.mrb[1].mxu0  ;;  %v3383_v6 = vadd.f32 %v2939_v50, %v2798_v4  ;;  %v3173_v50 = vmov 0.0  }
  0xea   : > { %v3379_v5 = vadd.f32 %v2798_v4, %v869_v51 }
  0xec   : > { %v2917_v19 = vpop.f32.mrb[0].mxu1 }
  0xed   : > { %v701_v20 = vpop.f32.mrb[1].mxu1  ;;  %v707_v33 = vadd.f32 %v2917_v19, %v2792_v18  ;;  %v3171_v19 = vmov 0.0|0.0  }
  0xee   : > { %v702_v21 = vadd.f32 %v2792_v18, %v701_v20 }
  0xf0   : > { %2942 = vmatprep.mubr.msk.f32.mxu1 %vm1060_vm1, %v702_v21 }
  0xf4   : > { %v2928_v28 = vpop.f32.mrb[2].mxu1 }
  0xf5   : > { %v788_v30 = vadd.f32 %v2928_v28, %v2795_v25  ;;  %v782_v31 = vpop.f32.mrb[3].mxu1 }
  0xf6   : > { %v783_v32 = vadd.f32 %v2795_v25, %v782_v31 }
  0xf7   : > { %908 = vrot.lane.b32.xlu1 %v788_v30, %s3168_s26 }
  0xf8   : > { %894 = vrot.lane.b32.xlu0 %v783_v32, %s3169_s28 }
  0xfb   : > { %882 = vrot.lane.b32.xlu1 %v707_v33, %s3169_s28 }
  0xfc   : > { %896 = vrot.lane.b32.xlu0 %v788_v30, %s3169_s28 }
  0xff   : > { %900 = vrot.lane.b32.xlu1 %v783_v32, %s3170_s0 }
 0x100   : > { %902 = vrot.lane.b32.xlu0 %v788_v30, %s3170_s0 }
 0x103   : > { %906 = vrot.lane.b32.xlu1 %v783_v32, %s3168_s26 }
 0x104   : > { %880 = vrot.lane.b32.xlu0 %v702_v21, %s3169_s28 }
 0x107   : > { %888 = vrot.lane.b32.xlu1 %v702_v21, %s3168_s26 }
 0x108   : > { %884 = vrot.lane.b32.xlu0 %v702_v21, %s3170_s0 }
 0x10b   : > { %890 = vrot.lane.b32.xlu1 %v707_v33, %s3168_s26 }
 0x10c   : > { %886 = vrot.lane.b32.xlu0 %v707_v33, %s3170_s0 }
 0x12a   : > { %932 = vxpose.xlu0.b32.start [1/2] (short) (narrow) %v783_v32, 8 }
 0x12e   : > { %933 = vxpose.xlu0.b32.end [2/2] (short) (narrow) %v788_v30, 8 }
 0x169   : > { %v909_v34 = vpop.permute.xlu1 %908 }
 0x16a   : > { %v895_v35 = vpop.permute.xlu0 %894 }
 0x16b   : > { %964 = vxpose.xlu1.b32.start [1/2] (short) (narrow) %v895_v35, 8 }
 0x16d   : > { %v883_v36 = vpop.permute.xlu1 %882 }
 0x16e   : > { %v897_v37 = vpop.permute.xlu0 %896 }
 0x16f   : > { %965 = vxpose.xlu1.b32.end [2/2] (short) (narrow) %v897_v37, 8 }
 0x171   : > { %v901_v38 = vpop.permute.xlu1 %900 }
 0x172   : > { %v903_v39 = vpop.permute.xlu0 %902  ;;  %996 = vxpose.xlu0.b32.start [1/2] (short) (narrow) %v901_v38, 8 }
 0x175   : > { %v907_v41 = vpop.permute.xlu1 %906 }
 0x176   : > { %997 = vxpose.xlu0.b32.end [2/2] (short) (narrow) %v903_v39, 8  ;;  %v881_v40 = vpop.permute.xlu0 %880 }
 0x179   : > { %v889_v45 = vpop.permute.xlu1 %888 }
 0x17a   : > { %1028 = vxpose.xlu0.b32.start [1/2] (short) (narrow) %v907_v41, 8  ;;  %v885_v42 = vpop.permute.xlu0 %884 }
 0x17b   : > { %2952 = vmatprep.mubr.msk.f32.mxu0 %vm1060_vm1, %v885_v42 }
 0x17d   : > { %v891_v46 = vpop.permute.xlu1 %890 }
 0x17e   : > { %1029 = vxpose.xlu0.b32.end [2/2] (short) (narrow) %v909_v34, 8  ;;  %v887_v43 = vpop.permute.xlu0 %886 }
 0x1aa   : > { %v948_v44 = vpop.trf.xlu0 }
 0x1ab   : > { %2940 = vmatprep.subr.mxu1 %v948_v44 }
 0x1ac   : > { %2941 = vmatpush3.msra.mxu1 %v948_v44 }
 0x1ad   : > { %2943 = vmatmul.mubr.msk.f32.vlgmr.msra.gmra.mrb[4].mxu1 %vm1060_vm1, %v707_v33 }
 0x1ae   : > { %2947 = vmatprep.mubr.msk.f32.mxu1 %vm1060_vm1, %v881_v40 }
 0x1eb   : > { %v980_v47 = vpop.trf.xlu1 }
 0x1ec   : > { %2945 = vmatprep.subr.mxu1 %v980_v47 }
 0x1ed   : > { %2946 = vmatpush3.msra.mxu1 %v980_v47 }
 0x1ee   : > { %2948 = vmatmul.mubr.msk.f32.vlgmr.msra.gmra.mrb[6].mxu1 %vm1060_vm1, %v883_v36 }
 0x1ef   : > { %2957 = vmatprep.mubr.msk.f32.mxu1 %vm1060_vm1, %v889_v45 }
 0x1f2   : > { %v1012_v48 = vpop.trf.xlu0 }
 0x1f3   : > { %2950 = vmatprep.subr.mxu0 %v1012_v48 }
 0x1f4   : > { %2951 = vmatpush3.msra.mxu0 %v1012_v48 }
 0x1f5   : > { %2953 = vmatmul.mubr.msk.f32.vlgmr.msra.gmra.mrb[2].mxu0 %vm1060_vm1, %v887_v43  ;;  %3053 = vmatprep.subr.bf16.mxu0 %v3171_v19 }
 0x1f6   : > { %2964 = vmatprep.mubr.msk.f32.mxu0 %vm3172_vm3, %v3173_v50 }
 0x1fa   : > { %v1044_v49 = vpop.trf.xlu0 }
 0x1fb   : > { %2955 = vmatprep.subr.mxu1 %v1044_v49 }
 0x1fc   : > { %2956 = vmatpush3.msra.mxu1 %v1044_v49 }
 0x1fd   : > { %2958 = vmatmul.mubr.msk.f32.vlgmr.msra.gmra.mrb[8].mxu1 %vm1060_vm1, %v891_v46  ;;  %3057 = vmatprep.subr.bf16.mxu1 %v3171_v19 }
 0x1fe   : > { %2971 = vmatprep.mubr.msk.f32.mxu1 %vm3172_vm3, %v3173_v50 }
 0x280   : > { %v2944_v52 = vpop.f32.mrb[4].mxu1 }
 0x281   : > { %v1131_v53 = vpop.f32.mrb[5].mxu1  ;;  %v1381_v54 = vsel %vm1377_vm2, %v2944_v52, -inf }
 0x282   : > { %1382 = vmax.xlane.f32.xlu0 %v1381_v54  ;;  %v1378_v55 = vsel %vm1377_vm2, %v1131_v53, -inf }
 0x283   : > { %1379 = vmax.xlane.f32.xlu1 %v1378_v55 }
 0x2c1   : > { %v2949_v56 = vpop.f32.mrb[6].mxu1 }
 0x2c2   : > { %v1210_v57 = vpop.f32.mrb[7].mxu1  ;;  %v1387_v58 = vsel %vm1377_vm2, %v2949_v56, -inf }
 0x2c3   : > { %1388 = vmax.xlane.f32.xlu1 %v1387_v58  ;;  %v1384_v59 = vsel %vm1377_vm2, %v1210_v57, -inf }
 0x2c7   : > { %1385 = vmax.xlane.f32.xlu1 %v1384_v59 }
 0x2c8   : > { %v2954_v60 = vpop.f32.mrb[2].mxu0 }
 0x2c9   : > { %v1289_v61 = vpop.f32.mrb[3].mxu0  ;;  %v1393_v62 = vsel %vm1377_vm2, %v2954_v60, -inf }
 0x2ca   : > { %1394 = vmax.xlane.f32.xlu0 %v1393_v62  ;;  %v1390_v63 = vsel %vm1377_vm2, %v1289_v61, -inf }
 0x2cb   : > { %1391 = vmax.xlane.f32.xlu1 %v1390_v63 }
 0x2d0   : > { %v2959_v0 = vpop.f32.mrb[8].mxu1 }
 0x2d1   : > { %v1368_v1 = vpop.f32.mrb[9].mxu1  ;;  %v1399_v2 = vsel %vm1377_vm2, %v2959_v0, -inf }
 0x2d2   : > { %1400 = vmax.xlane.f32.xlu0 %v1399_v2  ;;  %v1396_v3 = vsel %vm1377_vm2, %v1368_v1, -inf }
 0x2d3   : > { %1397 = vmax.xlane.f32.xlu1 %v1396_v3 }
 0x2e4   : > { %914 = vrot.lane.b32.xlu1 %v3379_v5, %s3169_s28 }
 0x2e8   : > { %920 = vrot.lane.b32.xlu0 %v3379_v5, %s3170_s0  ;;  %916 = vrot.lane.b32.xlu1 %v3383_v6, %s3169_s28  ;;  %s3177_s28 = smov 8  }
 0x2ec   : > { %926 = vrot.lane.b32.xlu1 %v3379_v5, %s3168_s26 }
 0x2f0   : > { %922 = vrot.lane.b32.xlu1 %v3383_v6, %s3170_s0  ;;  %s3178_s0 = smov 24  }
 0x30f   : > { %v1383_v7 = vpop.xlane.xlu0 %1382 }
 0x310   : > { %v1403_v8 = vsub.f32 %v2944_v52, %v1383_v7  ;;  %v1380_v9 = vpop.xlane.xlu1 %1379 }
 0x311   : > { %v1402_v10 = vsub.f32 %v1131_v53, %v1380_v9 }
 0x312   : > { %v1412_v13 = vmul.f32 1.442695, %v1403_v8 }
 0x313   : > { %v1410_v14 = vmul.f32 1.442695, %v1402_v10 }
 0x314   : > { %3120 = vpow2.f32 %v1412_v13 }
 0x315   : > { %3122 = vpow2.f32 %v1410_v14 }
 0x31e   : > { %v3393_v15 = vpop.eup %3120 }
 0x31f   : > { %v1429_v16 = vsel %vm1377_vm2, %v3393_v15, 0.0  ;;  %v3397_v17 = vpop.eup %3122 }
 0x320   : > { %1430 = vadd.xlane.f32.xlu0 %v1429_v16  ;;  %v1426_v18 = vsel %vm1377_vm2, %v3397_v17, 0.0 }
 0x324   : > { %1427 = vadd.xlane.f32.xlu0 %v1426_v18 }
 0x350   : > { %v1389_v20 = vpop.xlane.xlu1 %1388 }
 0x351   : > { %v1405_v21 = vsub.f32 %v2949_v56, %v1389_v20 }
 0x353   : > { %v1416_v22 = vmul.f32 1.442695, %v1405_v21 }
 0x354   : > { %v1386_v23 = vpop.xlane.xlu1 %1385 }
 0x355   : > { %3124 = vpow2.f32 %v1416_v22  ;;  %v1404_v24 = vsub.f32 %v1210_v57, %v1386_v23 }
 0x357   : > { %v1395_v25 = vpop.xlane.xlu0 %1394  ;;  %v1414_v29 = vmul.f32 1.442695, %v1404_v24 }
 0x358   : > { %v1407_v26 = vsub.f32 %v2954_v60, %v1395_v25  ;;  %v1392_v27 = vpop.xlane.xlu1 %1391 }
 0x359   : > { %v1406_v28 = vsub.f32 %v1289_v61, %v1392_v27 }
 0x35a   : > { %v1420_v30 = vmul.f32 1.442695, %v1407_v26 }
 0x35b   : > { %v1418_v31 = vmul.f32 1.442695, %v1406_v28 }
 0x35c   : > { %3126 = vpow2.f32 %v1420_v30 }
 0x35d   : > { %3128 = vpow2.f32 %v1418_v31 }
 0x35e   : > { %3130 = vpow2.f32 %v1414_v29 }
 0x35f   : > { %v3403_v32 = vpop.eup %3124  ;;  %v1401_v33 = vpop.xlane.xlu0 %1400 }
 0x360   : > { %v1409_v34 = vsub.f32 %v2959_v0, %v1401_v33  ;;  %v1398_v35 = vpop.xlane.xlu1 %1397  ;;  %v1435_v36 = vsel %vm1377_vm2, %v3403_v32, 0.0 }
 0x361   : > { %v1408_v37 = vsub.f32 %v1368_v1, %v1398_v35  ;;  %1436 = vadd.xlane.f32.xlu0 %v1435_v36 }
 0x362   : > { %v1424_v38 = vmul.f32 1.442695, %v1409_v34 }
 0x363   : > { %v1422_v39 = vmul.f32 1.442695, %v1408_v37  ;;  %v921_v54 = vpop.permute.xlu0 %920 }
 0x364   : > { %3132 = vpow2.f32 %v1424_v38  ;;  %v915_v51 = vpop.permute.xlu1 %914 }
 0x365   : > { %3134 = vpow2.f32 %v1422_v39  ;;  %v3174_v39 = vmov 1983009808  }
 0x366   : > { %v3407_v40 = vpop.eup %3126 }
 0x367   : > { %v3409_v41 = vpop.eup %3128  ;;  %v1441_v42 = vsel %vm1377_vm2, %v3407_v40, 0.0 }
 0x368   : > { %v3131_v43 = vpop.eup %3130  ;;  %1442 = vadd.xlane.f32.xlu0 %v1441_v42  ;;  %v1438_v44 = vsel %vm1377_vm2, %v3409_v41, 0.0  ;;  %v917_v52 = vpop.permute.xlu1 %916 }
 0x369   : > { %1439 = vadd.xlane.f32.xlu1 %v1438_v44  ;;  %v1432_v45 = vsel %vm1377_vm2, %v3131_v43, 0.0 }
 0x36c   : > { %1433 = vadd.xlane.f32.xlu0 %v1432_v45  ;;  %v927_v53 = vpop.permute.xlu1 %926 }
 0x36e   : > { %v3133_v46 = vpop.eup %3132 }
 0x36f   : > { %v1447_v47 = vsel %vm1377_vm2, %v3133_v46, 0.0  ;;  %v3135_v48 = vpop.eup %3134 }
 0x370   : > { %1448 = vadd.xlane.f32.xlu1 %v1447_v47  ;;  %v1444_v49 = vsel %vm1377_vm2, %v3135_v48, 0.0  ;;  %v923_v55 = vpop.permute.xlu1 %922 }
 0x374   : > { %1445 = vadd.xlane.f32.xlu1 %v1444_v49 }
 0x382   : > { %928 = vrot.lane.b32.xlu0 %v3383_v6, %s3168_s26  ;;  %s3176_s26 = smov 16  }
 0x3a0   : > { %1498 = vxpose.xlu0.b32.start [1/2] (short) (narrow) %v915_v51, 8 }
 0x3a4   : > { %1499 = vxpose.xlu0.b32.end [2/2] (short) (narrow) %v917_v52, 8 }
 0x3a7   : > { %1466 = vxpose.xlu1.b32.start [1/2] (short) (narrow) %v3379_v5, 8 }
 0x3a8   : > { %1530 = vxpose.xlu0.b32.start [1/2] (short) (narrow) %v921_v54, 8 }
 0x3ab   : > { %1467 = vxpose.xlu1.b32.end [2/2] (short) (narrow) %v3383_v6, 8 }
 0x3ac   : > { %1531 = vxpose.xlu0.b32.end [2/2] (short) (narrow) %v923_v55, 8 }
 0x3ad   : > { %v1431_v56 = vpop.xlane.xlu0 %1430 }
 0x3ae   : > { %3136 = vrcp.f32 %v1431_v56 }
 0x3af   : > { %1562 = vxpose.xlu1.b32.start [1/2] (short) (narrow) %v927_v53, 8 }
 0x3b1   : > { %v1428_v57 = vpop.xlane.xlu0 %1427 }
 0x3b2   : > { %3138 = vrcp.f32 %v1428_v57 }
 0x3b8   : > { %v3137_v58 = vpop.eup %3136 }
 0x3b9   : > { %v1459_v60 = vmul.f32 %v3137_v58, %v3393_v15 }
 0x3bc   : > { %v3139_v59 = vpop.eup %3138 }
 0x3bd   : > { %v1458_v61 = vmul.f32 %v3139_v59, %v3397_v17 }
 0x3bf   : > { %v3054_v63 = vpack.c.bf16 %v1459_v60, %v1458_v61 }
 0x3c1   : > { %3056 = vmatpush3.bf16.xpose.msk.msra.mxu0 %vm3430_vm4, %v3054_v63 }
 0x3c2   : > { %3061 = vmatprep.subr.bf16.mxu0 %v3171_v19 }
 0x3ee   : > { %v1437_v0 = vpop.xlane.xlu0 %1436 }
 0x3ef   : > { %3140 = vrcp.f32 %v1437_v0 }
 0x3f5   : > { %v1443_v1 = vpop.xlane.xlu0 %1442 }
 0x3f6   : > { %v1440_v5 = vpop.xlane.xlu1 %1439 }
 0x3f9   : > { %v1434_v2 = vpop.xlane.xlu0 %1433  ;;  %v3141_v4 = vpop.eup %3140 }
 0x3fa   : > { %3142 = vrcp.f32 %v1434_v2  ;;  %v1461_v7 = vmul.f32 %v3141_v4, %v3403_v32 }
 0x3fd   : > { %v929_v3 = vpop.permute.xlu0 %928  ;;  %v1449_v9 = vpop.xlane.xlu1 %1448 }
 0x3fe   : > { %1563 = vxpose.xlu1.b32.end [2/2] (short) (narrow) %v929_v3, 8 }
 0x401   : > { %v1446_v13 = vpop.xlane.xlu1 %1445 }
 0x402   : > { %3144 = vrcp.f32 %v1446_v13 }
 0x403   : > { %3146 = vrcp.f32 %v1449_v9 }
 0x404   : > { %v3143_v6 = vpop.eup %3142  ;;  %3148 = vrcp.f32 %v1443_v1 }
 0x405   : > { %v1460_v8 = vmul.f32 %v3143_v6, %v3131_v43  ;;  %3150 = vrcp.f32 %v1440_v5  ;;  %v3175_v43 = vmov 1934713408  }
 0x406   : > { %v2073_v44 = vunpack.c.l.s4 %v3175_v43 }
 0x407   : > { %v3058_v10 = vpack.c.bf16 %v1461_v7, %v1460_v8 }
 0x409   : > { %3060 = vmatpush3.bf16.xpose.msk.msra.mxu1 %vm3430_vm4, %v3058_v10 }
 0x40a   : > { %3065 = vmatprep.subr.bf16.mxu1 %v3171_v19 }
 0x40c   : > { %v3145_v14 = vpop.eup %3144 }
 0x40d   : > { %v3147_v15 = vpop.eup %3146  ;;  %v1464_v16 = vmul.f32 %v3145_v14, %v3135_v48  ;;  %v2074_v48 = vunpack.c.0.s8 %v2073_v44  ;;  %v617_v44 = vld [vmem:[%s3577_s8] sm:$0xff] }
 0x40e   : > { %v1465_v17 = vmul.f32 %v3147_v15, %v3133_v46  ;;  %v3149_v18 = vpop.eup %3148 }
 0x40f   : > { %v3151_v20 = vpop.eup %3150  ;;  %v1463_v19 = vmul.f32 %v3149_v18, %v3407_v40  ;;  %v2041_v40 = vunpack.c.l.s4 %v3174_v39 }
 0x410   : > { %v3066_v22 = vpack.c.bf16 %v1465_v17, %v1464_v16  ;;  %v1462_v23 = vmul.f32 %v3151_v20, %v3409_v41  ;;  %v2043_v41 = vlaneseq }
 0x411   : > { %v2042_v45 = vunpack.c.0.s8 %v2041_v40 }
 0x412   : > { %v3062_v25 = vpack.c.bf16 %v1463_v19, %v1462_v23  ;;  %v2044_v46 = vshrl.u32 %v2043_v41, 7 }
 0x414   : > { %v2045_v49 = vsub.s32 %v2042_v45, %v2044_v46  ;;  %v3455_v56 = vsub.s32 %v2074_v48, %v2044_v46 }
 0x420   : > { %v1514_v21 = vpop.trf.xlu0 }
 0x421   : > { %2972 = vmatmul.mubr.msk.f32.vlgmr.msra.gmra.mrb[10].mxu1 %vm1377_vm2, %v1514_v21 }
 0x422   : > { %3068 = vmatpush3.bf16.xpose.msk.msra.mxu1 %vm3430_vm4, %v3066_v22  ;;  %2985 = vmatprep.mubr.msk.f32.mxu1 %vm3172_vm3, %v3173_v50 }
 0x427   : > { %v1482_v24 = vpop.trf.xlu1 }
 0x428   : > { %2965 = vmatmul.mubr.msk.f32.vlgmr.msra.gmra.mrb[4].mxu0 %vm1377_vm2, %v1482_v24  ;;  %v1546_v26 = vpop.trf.xlu0 }
 0x429   : > { %3064 = vmatpush3.bf16.xpose.msk.msra.mxu0 %vm3430_vm4, %v3062_v25  ;;  %2978 = vmatprep.mubr.msk.f32.mxu0 %vm3172_vm3, %v3173_v50 }
 0x430   : > { %2979 = vmatmul.mubr.msk.f32.vlgmr.msra.gmra.mrb[6].mxu0 %vm1377_vm2, %v1546_v26 }
 0x47a   : > { %v1578_v27 = vpop.trf.xlu1 }
 0x47b   : > { %2986 = vmatmul.mubr.msk.f32.vlgmr.msra.gmra.mrb[12].mxu1 %vm1377_vm2, %v1578_v27 }
 0x4f4   : > { %v1748_v28 = vpop.f32.mrb[10].mxu1 }
 0x4f5   : > { %1942 = vxpose.xlu1.b32.start.end [1/1] (short) (narrow) %v1748_v28, 16  ;;  %v2973_v29 = vpop.f32.mrb[11].mxu1 }
 0x4fb   : > { %v1669_v30 = vpop.f32.mrb[4].mxu0 }
 0x4fc   : > { %1910 = vxpose.xlu0.b32.start.end [1/1] (short) (narrow) %v1669_v30, 16  ;;  %v2966_v31 = vpop.f32.mrb[5].mxu0 }
 0x503   : > { %v1827_v32 = vpop.f32.mrb[6].mxu0 }
 0x504   : > { %1974 = vxpose.xlu0.b32.start.end [1/1] (short) (narrow) %v1827_v32, 16  ;;  %v2980_v33 = vpop.f32.mrb[7].mxu0 }
 0x54e   : > { %v1906_v34 = vpop.f32.mrb[12].mxu1 }
 0x54f   : > { %2006 = vxpose.xlu1.b32.start.end [1/1] (short) (narrow) %v1906_v34, 16  ;;  %v2987_v35 = vpop.f32.mrb[13].mxu1 }
 0x575   : > { %v1958_v37 = vpop.trf.xlu1 }
 0x579   : > { %v1959_v42 = vpop.trf.xlu1 }
 0x57c   : > { %v1926_v36 = vpop.trf.xlu0 }
 0x580   : > { %v1927_v38 = vpop.trf.xlu0 }
 0x584   : > { %v1990_v47 = vpop.trf.xlu0 }
 0x585   : > { %v2038_v50 = vcombine.low %v1926_v36, %v1990_v47  ;;  %v2039_v51 = vcombine.high %v1926_v36, %v1990_v47 }
 0x587   : > { %v2046_v57 = vrot.slane %v2038_v50, %v2045_v49  ;;  %v2053_v58 = vrot.slane %v2039_v51, %v2045_v49  ;;  %v618_v50 = vld [vmem:[%s3577_s8 + $0x8] sm:$0xff]  ;;  %v619_v51 = vld [vmem:[%s3577_s8 + $0x10] sm:$0xff] }
 0x588   : > { %v1991_v53 = vpop.trf.xlu0 }
 0x589   : > { %v2106_v61 = vcombine.low %v1927_v38, %v1991_v53  ;;  %v2107_v62 = vcombine.high %v1927_v38, %v1991_v53 }
 0x58b   : > { %v2114_v10 = vrot.slane %v2106_v61, %v2045_v49  ;;  %v2121_v13 = vrot.slane %v2107_v62, %v2045_v49 }
 0x5cf   : > { %v2022_v52 = vpop.trf.xlu1 }
 0x5d0   : > { %v2054_v54 = vcombine.low %v1958_v37, %v2022_v52  ;;  %v2055_v55 = vcombine.high %v1958_v37, %v2022_v52  ;;  %v620_v52 = vld [vmem:[%s3577_s8 + $0x18] sm:$0xff] }
 0x5d1   : > { %v3073_v61 = vpack.c.bf16 %v620_v52, %v619_v51  ;;  %v2574_v51 = vld [vmem:[%s3583_s14 + $0x28] sm:$0xff] }
 0x5d2   : > { %v2062_v59 = vrot.slane %v2054_v54, %v2045_v49  ;;  %v2069_v60 = vrot.slane %v2055_v55, %v2045_v49 }
 0x5d3   : > { %v2023_v63 = vpop.trf.xlu1 }
 0x5d4   : > { %v2070_v0 = vcombine.low %v2046_v57, %v2062_v59  ;;  %v2071_v1 = vcombine.high %v2046_v57, %v2062_v59  ;;  %v2086_v2 = vcombine.low %v2053_v58, %v2069_v60  ;;  %v2087_v3 = vcombine.high %v2053_v58, %v2069_v60 }
 0x5d5   : > { %v2122_v4 = vcombine.low %v1959_v42, %v2023_v63  ;;  %v2123_v5 = vcombine.high %v1959_v42, %v2023_v63 }
 0x5d6   : > { %v2078_v6 = vrot.slane %v2070_v0, %v3455_v56  ;;  %v2085_v7 = vrot.slane %v2071_v1, %v3455_v56  ;;  %v2094_v8 = vrot.slane %v2086_v2, %v3455_v56  ;;  %v2101_v9 = vrot.slane %v2087_v3, %v3455_v56 }
 0x5d7   : > { %v2130_v14 = vrot.slane %v2122_v4, %v2045_v49  ;;  %v2137_v15 = vrot.slane %v2123_v5, %v2045_v49 }
 0x5d8   : > { %v2174_v16 = vcombine.low %v2078_v6, %v2085_v7  ;;  %v2821_v17 = vcombine.high %v2078_v6, %v2085_v7  ;;  %v2190_v18 = vcombine.low %v2094_v8, %v2101_v9  ;;  %v2822_v20 = vcombine.high %v2094_v8, %v2101_v9 }
 0x5d9   : > { %v2138_v21 = vcombine.low %v2114_v10, %v2130_v14  ;;  %v2139_v22 = vcombine.high %v2114_v10, %v2130_v14  ;;  %v2154_v19 = vcombine.low %v2121_v13, %v2137_v15  ;;  %v2155_v23 = vcombine.high %v2121_v13, %v2137_v15 }
 0x5da   : > { %v2181_v24 = vrot.slane %v2174_v16, %v2045_v49  ;;  %v2189_v25 = vrot.slane %v2821_v17, %v2045_v49  ;;  %v2197_v26 = vrot.slane %v2190_v18, %v2045_v49  ;;  %v2205_v27 = vrot.slane %v2822_v20, %v2045_v49 }
 0x5db   : > { %v2146_v28 = vrot.slane %v2138_v21, %v3455_v56  ;;  %v2153_v29 = vrot.slane %v2139_v22, %v3455_v56  ;;  %v2162_v30 = vrot.slane %v2154_v19, %v3455_v56  ;;  %v2169_v31 = vrot.slane %v2155_v23, %v3455_v56  ;;  %v2825_v21 = vld [vmem:[%s3578_s9] ss:$0 sm:$0xff] }
 0x5dc   : > { %v2207_v32 = vcombine.high %v2181_v24, %v2189_v25  ;;  %v2223_v33 = vcombine.high %v2197_v26, %v2205_v27  ;;  %v2206_v34 = vcombine.low %v2181_v24, %v2189_v25  ;;  %v2222_v35 = vcombine.low %v2197_v26, %v2205_v27 }
 0x5dd   : > { %v2242_v36 = vcombine.low %v2146_v28, %v2153_v29  ;;  %v2823_v37 = vcombine.high %v2146_v28, %v2153_v29  ;;  %v2258_v38 = vcombine.low %v2162_v30, %v2169_v31  ;;  %v2824_v39 = vcombine.high %v2162_v30, %v2169_v31 }
 0x5de   : > { %v2221_v40 = vrot.slane %v2207_v32, %v3455_v56  ;;  %v2237_v41 = vrot.slane %v2223_v33, %v3455_v56  ;;  %v2214_v42 = vrot.slane %v2206_v34, %v3455_v56  ;;  %v2230_v43 = vrot.slane %v2222_v35, %v3455_v56 }
 0x5df   : > { %v2249_v45 = vrot.slane %v2242_v36, %v2045_v49  ;;  %v2257_v46 = vrot.slane %v2823_v37, %v2045_v49  ;;  %v2265_v47 = vrot.slane %v2258_v38, %v2045_v49  ;;  %v2273_v48 = vrot.slane %v2824_v39, %v2045_v49  ;;  %v2476_v38 = vld [vmem:[%s3581_s12 + $0x8] sm:$0xff] }
 0x5e0   : > { %v2240_v53 = vcombine.low %v2221_v40, %v2237_v41  ;;  %v2239_v54 = vcombine.high %v2214_v42, %v2230_v43  ;;  %v2238_v55 = vcombine.low %v2214_v42, %v2230_v43  ;;  %v3069_v49 = vpack.c.bf16 %v618_v50, %v617_v44  ;;  %v2569_v43 = vld [vmem:[%s3583_s14] sm:$0xff]  ;;  %v2570_v44 = vld [vmem:[%s3583_s14 + $0x8] sm:$0xff] }
 0x5e1   : > { %v2274_v57 = vcombine.low %v2249_v45, %v2257_v46  ;;  %v2290_v58 = vcombine.low %v2265_v47, %v2273_v48  ;;  %v2275_v59 = vcombine.high %v2249_v45, %v2257_v46  ;;  %v2291_v60 = vcombine.high %v2265_v47, %v2273_v48  ;;  %v2571_v45 = vld [vmem:[%s3583_s14 + $0x10] sm:$0xff]  ;;  %v2572_v47 = vld [vmem:[%s3583_s14 + $0x18] sm:$0xff]  ;;  %v2573_v50 = vld [vmem:[%s3583_s14 + $0x20] sm:$0xff] }
 0x5e2   : > { %2320 = vrot.lane.b32.xlu1 %v2240_v53, %s3176_s26  ;;  %2312 = vrot.lane.b32.xlu0 %v2239_v54, %s3177_s28  ;;  %v2241_v0 = vcombine.high %v2221_v40, %v2237_v41  ;;  %v2477_v40 = vld [vmem:[%s3581_s12 + $0x10] sm:$0xff]  ;;  %v2478_v41 = vld [vmem:[%s3581_s12 + $0x18] sm:$0xff]  ;;  %v3085_v46 = vpack.c.bf16 %v2570_v44, %v2569_v43  ;;  %v3089_v48 = vpack.c.bf16 %v2572_v47, %v2571_v45 }
 0x5e3   : > { %v2282_v62 = vrot.slane %v2274_v57, %v3455_v56  ;;  %v2298_v63 = vrot.slane %v2290_v58, %v3455_v56  ;;  %3070 = vmatprep.subr.bf16.mxu0 %v3069_v49  ;;  %v2289_v2 = vrot.slane %v2275_v59, %v3455_v56  ;;  %v2305_v3 = vrot.slane %v2291_v60, %v3455_v56  ;;  %v2837_v43 = vld [vmem:[%s3586_s17] ss:$0 sm:$0xff] }
 0x5e4   : > { %3072 = vmatpush3.bf16.msra.mxu0 %v3069_v49  ;;  %v3081_v42 = vpack.c.bf16 %v2478_v41, %v2477_v40  ;;  %v3093_v52 = vpack.c.bf16 %v2574_v51, %v2573_v50  ;;  %v2828_v49 = vld [vmem:[%s3579_s10] ss:$0 sm:$0xff] }
 0x5e5   : > { %v2307_v1 = vcombine.high %v2282_v62, %v2298_v63  ;;  %v2306_v4 = vcombine.low %v2282_v62, %v2298_v63  ;;  %3074 = vmatprep.subr.bf16.mxu0 %v3073_v61  ;;  %v2308_v5 = vcombine.low %v2289_v2, %v2305_v3  ;;  %v2309_v6 = vcombine.high %v2289_v2, %v2305_v3  ;;  %v2829_v62 = vld [vmem:[%s3580_s11] ss:$0 sm:$0xff] }
 0x5e6   : > { %2328 = vrot.lane.b32.xlu0 %v2241_v0, %s3178_s0  ;;  %v2836_v40 = vld [vmem:[%s3585_s16] ss:$0 sm:$0xff] }
 0x5e7   : > { %2314 = vrot.lane.b32.xlu1 %v2307_v1, %s3177_s28 }
 0x5e8   : > { %3076 = vmatpush3.bf16.msra.mxu0 %v3073_v61 }
 0x5e9   : > { %3086 = vmatprep.subr.bf16.mxu0 %v3085_v46 }
 0x5eb   : > { %2322 = vrot.lane.b32.xlu1 %v2308_v5, %s3176_s26  ;;  %v2575_v5 = vld [vmem:[%s3583_s14 + $0x30] sm:$0xff] }
 0x5ef   : > { %2330 = vrot.lane.b32.xlu1 %v2309_v6, %s3178_s0  ;;  %v2576_v6 = vld [vmem:[%s3583_s14 + $0x38] sm:$0xff] }
 0x654   : > { %v2313_v7 = vpop.permute.xlu0 %2312  ;;  %v2321_v8 = vpop.permute.xlu1 %2320 }
 0x655   : > { %v2334_v9 = vsel %vm1060_vm1, %v2238_v55, %v2313_v7  ;;  %v3097_v7 = vpack.c.bf16 %v2576_v6, %v2575_v5 }
 0x656   : > { %v2336_v10 = vsel %vm1377_vm2, %v2334_v9, %v2321_v8  ;;  %v2830_v8 = vld [vmem:[%s3582_s13] ss:$0 sm:$0xff] }
 0x658   : > { %v2329_v13 = vpop.permute.xlu0 %2328 }
 0x659   : > { %v2339_v56 = vsel %vm2338_vm5, %v2336_v10, %v2329_v13  ;;  %v2315_v14 = vpop.permute.xlu1 %2314 }
 0x65a   : > { %2996 = vmatprep.mubr.msk.f32.mxu0 %vm628_vm0, %v2339_v56  ;;  %v2335_v16 = vsel %vm1060_vm1, %v2306_v4, %v2315_v14 }
 0x65d   : > { %v2323_v15 = vpop.permute.xlu1 %2322 }
 0x65e   : > { %v2337_v17 = vsel %vm1377_vm2, %v2335_v16, %v2323_v15  ;;  %v2833_v16 = vld [vmem:[%s3584_s15] ss:$0 sm:$0xff] }
 0x661   : > { %v2331_v18 = vpop.permute.xlu1 %2330 }
 0x662   : > { %v2340_v20 = vsel %vm2338_vm5, %v2337_v17, %v2331_v18 }
 0x663   : > { %2997 = vmatmul.mubr.msk.f32.vlgmr.msra.gmra.mrb[8].mxu0 %vm628_vm0, %v2340_v20 }
 0x664   : > { %3088 = vmatpush3.bf16.msra.mxu0 %v3085_v46 }
 0x665   : > { %3090 = vmatprep.subr.bf16.mxu0 %v3089_v48 }
 0x668   : > { %3092 = vmatpush3.bf16.msra.mxu0 %v3089_v48 }
 0x669   : > { %3094 = vmatprep.subr.bf16.mxu0 %v3093_v52 }
 0x66c   : > { %3096 = vmatpush3.bf16.msra.mxu0 %v3093_v52 }
 0x66d   : > { %3098 = vmatprep.subr.bf16.mxu0 %v3097_v7 }
 0x670   : > { %3100 = vmatpush3.bf16.msra.mxu0 %v3097_v7 }
 0x736   : > { %v2998_v22 = vpop.f32.mrb[8].mxu0 }
 0x737   : > { %v2425_v19 = vadd.f32 %v2998_v22, %v2825_v21  ;;  %v2419_v23 = vpop.f32.mrb[9].mxu0 }
 0x738   : > { %v2420_v24 = vadd.f32 %v2825_v21, %v2419_v23 }
 0x739   : > { %v2429_v25 = vadd.f32 %v2425_v19, %v3318_v12 }
 0x73a   : > { %v2428_v26 = vadd.f32 %v2420_v24, %v3316_v11  ;;  %v2475_v11 = vld [vmem:[%s3581_s12] sm:$0xff] }
 0x73b   : > { %v2435_v27 = vsel %vm628_vm0, %v2429_v25, 0.0  ;;  %v3077_v39 = vpack.c.bf16 %v2476_v38, %v2475_v11 }
 0x73c   : > { %2436 = vadd.xlane.f32.xlu1 %v2435_v27  ;;  %v2432_v28 = vsel %vm628_vm0, %v2428_v26, 0.0 }
 0x73d   : > { %2433 = vadd.xlane.f32.xlu0 %v2432_v28  ;;  %3078 = vmatprep.subr.bf16.mxu1 %v3077_v39 }
 0x73e   : > { %3080 = vmatpush3.bf16.msra.mxu1 %v3077_v39 }
 0x73f   : > { %3082 = vmatprep.subr.bf16.mxu1 %v3081_v42 }
 0x742   : > { %3084 = vmatpush3.bf16.msra.mxu1 %v3081_v42 }
 0x7c9   : > { %v2437_v29 = vpop.xlane.xlu1 %2436 }
 0x7ca   : > { %v2440_v30 = vmul.f32 0.03125, %v2437_v29  ;;  %v2434_v31 = vpop.xlane.xlu0 %2433 }
 0x7cb   : > { %v2439_v32 = vmul.f32 0.03125, %v2434_v31 }
 0x7cc   : > { %v2442_v33 = vsub.f32 %v2429_v25, %v2440_v30 }
 0x7cd   : > { %v2441_v34 = vsub.f32 %v2428_v26, %v2439_v32 }
 0x7ce   : > { %v2444_v37 = vmul.f32 %v2442_v33, %v2442_v33 }
 0x7cf   : > { %v2443_v35 = vmul.f32 %v2441_v34, %v2441_v34 }
 0x7d0   : > { %v2448_v12 = vsel %vm628_vm0, %v2444_v37, 0.0 }
 0x7d1   : > { %v2445_v36 = vsel %vm628_vm0, %v2443_v35, 0.0 }
 0x7d2   : > { %2446 = vadd.xlane.f32.xlu0 %v2445_v36 }
 0x7d6   : > { %2449 = vadd.xlane.f32.xlu0 %v2448_v12 }
 0x85f   : > { %v2447_v53 = vpop.xlane.xlu0 %2446 }
 0x860   : > { %v2451_v54 = vmul.f32 0.03125, %v2447_v53 }
 0x862   : > { %v2453_v55 = vadd.f32 1e-05, %v2451_v54 }
 0x863   : > { %v2450_v57 = vpop.xlane.xlu0 %2449 }
 0x864   : > { %3152 = vrsqrt.f32 %v2453_v55  ;;  %v2452_v58 = vmul.f32 0.03125, %v2450_v57 }
 0x866   : > { %v2454_v59 = vadd.f32 1e-05, %v2452_v58 }
 0x868   : > { %3154 = vrsqrt.f32 %v2454_v59 }
 0x86e   : > { %v3153_v60 = vpop.eup %3152 }
 0x86f   : > { %v2457_v61 = vmul.f32 %v3153_v60, %v2441_v34 }
 0x871   : > { %v2465_v63 = vmul.f32 %v2828_v49, %v2457_v61 }
 0x872   : > { %v3155_v0 = vpop.eup %3154 }
 0x873   : > { %v2458_v1 = vmul.f32 %v3155_v0, %v2442_v33  ;;  %v2473_v2 = vadd.f32 %v2829_v62, %v2465_v63 }
 0x875   : > { %v2466_v3 = vmul.f32 %v2828_v49, %v2458_v1  ;;  %3007 = vmatprep.mubr.msk.f32.mxu1 %vm628_vm0, %v2473_v2 }
 0x877   : > { %v2474_v4 = vadd.f32 %v2829_v62, %v2466_v3 }
 0x879   : > { %3008 = vmatmul.mubr.msk.f32.vlgmr.msra.gmra.mrb[14].mxu1 %vm628_vm0, %v2474_v4 }
 0x94c   : > { %v3009_v9 = vpop.f32.mrb[14].mxu1 }
 0x94d   : > { %v2564_v10 = vadd.f32 %v3009_v9, %v2830_v8  ;;  %v2558_v13 = vpop.f32.mrb[15].mxu1 }
 0x94e   : > { %v2559_v56 = vadd.f32 %v2830_v8, %v2558_v13 }
 0x94f   : > { %v2568_v15 = vmax.f32 %v2564_v10, 0.0 }
 0x950   : > { %v2567_v14 = vmax.f32 %v2559_v56, 0.0 }
 0x952   : > { %3026 = vmatprep.mubr.msk.f32.mxu0 %vm2584_vm6, %v2567_v14 }
 0x953   : > { %3027 = vmatmul.mubr.msk.f32.vlgmr.msra.gmra.mrb[10].mxu0 %vm2584_vm6, %v2568_v15 }
 0xa26   : > { %v3028_v17 = vpop.f32.mrb[10].mxu0 }
 0xa27   : > { %v2663_v18 = vadd.f32 %v3028_v17, %v2833_v16  ;;  %v2657_v20 = vpop.f32.mrb[11].mxu0 }
 0xa28   : > { %v2658_v21 = vadd.f32 %v2833_v16, %v2657_v20 }
 0xa29   : > { %v2667_v22 = vadd.f32 %v2663_v18, %v2474_v4 }
 0xa2a   : > { %v2666_v19 = vadd.f32 %v2658_v21, %v2473_v2 }
 0xa2b   : > { %v2673_v23 = vsel %vm628_vm0, %v2667_v22, 0.0 }
 0xa2c   : > { %2674 = vadd.xlane.f32.xlu0 %v2673_v23  ;;  %v2670_v24 = vsel %vm628_vm0, %v2666_v19, 0.0 }
 0xa2d   : > { %2671 = vadd.xlane.f32.xlu1 %v2670_v24 }
 0xab9   : > { %v2675_v25 = vpop.xlane.xlu0 %2674 }
 0xaba   : > { %v2677_v26 = vmul.f32 0.03125, %v2675_v25  ;;  %v2672_v27 = vpop.xlane.xlu1 %2671 }
 0xabb   : > { %v2676_v28 = vmul.f32 0.03125, %v2672_v27 }
 0xabc   : > { %v2679_v29 = vsub.f32 %v2667_v22, %v2677_v26 }
 0xabd   : > { %v2678_v30 = vsub.f32 %v2666_v19, %v2676_v28 }
 0xabe   : > { %v2681_v31 = vmul.f32 %v2679_v29, %v2679_v29 }
 0xabf   : > { %v2680_v32 = vmul.f32 %v2678_v30, %v2678_v30 }
 0xac0   : > { %v2685_v33 = vsel %vm628_vm0, %v2681_v31, 0.0 }
 0xac1   : > { %2686 = vadd.xlane.f32.xlu0 %v2685_v33  ;;  %v2682_v34 = vsel %vm628_vm0, %v2680_v32, 0.0 }
 0xac2   : > { %2683 = vadd.xlane.f32.xlu1 %v2682_v34 }
 0xb4e   : > { %v2687_v35 = vpop.xlane.xlu0 %2686 }
 0xb4f   : > { %v2689_v36 = vmul.f32 0.03125, %v2687_v35  ;;  %v2684_v37 = vpop.xlane.xlu1 %2683 }
 0xb50   : > { %v2688_v12 = vmul.f32 0.03125, %v2684_v37 }
 0xb51   : > { %v2691_v11 = vadd.f32 1e-05, %v2689_v36 }
 0xb52   : > { %v2690_v38 = vadd.f32 1e-05, %v2688_v12 }
 0xb53   : > { %3156 = vrsqrt.f32 %v2691_v11 }
 0xb54   : > { %3158 = vrsqrt.f32 %v2690_v38 }
 0xb5d   : > { %v3157_v39 = vpop.eup %3156 }
 0xb5e   : > { %v3159_v41 = vpop.eup %3158  ;;  %v2695_v42 = vmul.f32 %v3157_v39, %v2679_v29 }
 0xb5f   : > { %v2694_v44 = vmul.f32 %v3159_v41, %v2678_v30 }
 0xb60   : > { %v2703_v45 = vmul.f32 %v2836_v40, %v2695_v42 }
 0xb61   : > { %v2702_v46 = vmul.f32 %v2836_v40, %v2694_v44 }
 0xb62   : > { %v2711_v47 = vadd.f32 %v2837_v43, %v2703_v45 }
 0xb63   : > { %v2710_v48 = vadd.f32 %v2837_v43, %v2702_v46 }
 0xb64   : > { %2713 = vst.msk [vmem:[%s595_s19 + $0x8] sm:$0xff] %vm628_vm0, %v2711_v47 }
 0xb65   : > { %2712 = vst.msk [vmem:[%s595_s19] sm:$0xff] %vm628_vm0, %v2710_v48 }
 0xb66 PF: > { %s28_s27 = sadd.s32 1, %s3166_s27  }
 0xb67   : > { %p25_p4 = scmp.ge.s32.totalorder %s28_s27, 4  }
 0xb69   :  { %27 = sbr.rel (!%p25_p4) target bundleno = 4 (0x4), region = 125 }

// kernel: transformer_forward.7
= control target key start
LH: loop header
LB: loop body
LE: loop exit
PB: predicated region body
PF: predicated region fallthrough
CT: control target
= control target key end

     0   :  { %s5395_s6 = smov 1   ;;  %s5396_s10 = smov 2   ;;  %s6048_s0 = inlined_call_operand.smem [shape: u32[33], index: -1, kind: input, shape index: {}] }
   0x1   :  { %s5451_s5 = sld [smem:[%s6048_s0]]   ;;  %s5397_s14 = smov 3  }
   0x2   :  { %s5456_s9 = sld [smem:[%s6048_s0 + %s5395_s6]]   ;;  %s5398_s18 = smov 4  }
   0x3   :  { %s5461_s13 = sld [smem:[%s6048_s0 + %s5396_s10]]   ;;  %s5399_s22 = smov 5  }
   0x4   :  { %s5466_s17 = sld [smem:[%s6048_s0 + %s5397_s14]]   ;;  %s5400_s26 = smov 6  }
   0x5   :  { %s5471_s21 = sld [smem:[%s6048_s0 + %s5398_s18]]   ;;  %s5401_s30 = smov 7  }
   0x6   :  { %s5476_s25 = sld [smem:[%s6048_s0 + %s5399_s22]]   ;;  %s5402_s4 = smov 8  }
   0x7   :  { %s5481_s29 = sld [smem:[%s6048_s0 + %s5400_s26]]   ;;  %s5403_s10 = smov 9  }
   0x8   :  { %s5486_s3 = sld [smem:[%s6048_s0 + %s5401_s30]]   ;;  %s5404_s15 = smov 10  }
   0x9   :  { %6058 = sst [smem:[#allocation13_spill]] %s5461_s13  ;;  %s5405_s20 = smov 11  }
   0xa   :  { %6059 = sst [smem:[#allocation14_spill]] %s5466_s17  ;;  %s5406_s26 = smov 12  }
   0xb   :  { %s5491_s8 = sld [smem:[%s6048_s0 + %s5402_s4]]   ;;  %s5407_s1 = smov 13  }
   0xc   :  { %s5496_s14 = sld [smem:[%s6048_s0 + %s5403_s10]]   ;;  %s5408_s7 = smov 14  }
   0xd   :  { %s5501_s19 = sld [smem:[%s6048_s0 + %s5404_s15]]   ;;  %s5409_s15 = smov 15  }
   0xe   :  { %s5506_s24 = sld [smem:[%s6048_s0 + %s5405_s20]]   ;;  %s5410_s22 = smov 16  }
   0xf   :  { %s5511_s30 = sld [smem:[%s6048_s0 + %s5406_s26]]   ;;  %s5411_s28 = smov 17  }
  0x10   :  { %s5516_s6 = sld [smem:[%s6048_s0 + %s5407_s1]]  }
  0x11   :  { %s5521_s12 = sld [smem:[%s6048_s0 + %s5408_s7]]   ;;  %s5412_s7 = smov 18  }
  0x12   :  { %s5526_s20 = sld [smem:[%s6048_s0 + %s5409_s15]]   ;;  %s5413_s15 = smov 19  }
  0x13   :  { %s5531_s27 = sld [smem:[%s6048_s0 + %s5410_s22]]   ;;  %s5414_s22 = smov 20  }
  0x14   :  { %6060 = sst [smem:[#allocation15_spill]] %s5506_s24 }
  0x15   :  { %6061 = sst [smem:[#allocation16_spill]] %s5511_s30 }
  0x16   :  { %6062 = sst [smem:[#allocation17_spill]] %s5516_s6 }
  0x17   :  { %6063 = sst [smem:[#allocation18_spill]] %s5521_s12 }
  0x18   :  { %6064 = sst [smem:[#allocation19_spill]] %s5526_s20 }
  0x19   :  { %s5536_s4 = sld [smem:[%s6048_s0 + %s5411_s28]]   ;;  %s5415_s28 = smov 21  }
  0x1a   :  { %s5541_s6 = sld [smem:[%s6048_s0 + %s5412_s7]]   ;;  %s5416_s7 = smov 22  }
  0x1b   :  { %s5546_s20 = sld [smem:[%s6048_s0 + %s5413_s15]]   ;;  %s5417_s15 = smov 23  }
  0x1c   :  { %s5551_s30 = sld [smem:[%s6048_s0 + %s5414_s22]]   ;;  %s5418_s22 = smov 24  }
  0x1f   :  { %6065 = sst [smem:[#allocation20_spill]] %s5536_s4 }
  0x20   :  { %6066 = sst [smem:[#allocation21_spill]] %s5541_s6 }
  0x21   :  { %6067 = sst [smem:[#allocation22_spill]] %s5546_s20 }
  0x22   :  { %6068 = sst [smem:[#allocation23_spill]] %s5551_s30 }
  0x23   :  { %s5556_s4 = sld [smem:[%s6048_s0 + %s5415_s28]]   ;;  %s5419_s28 = smov 25  }
  0x24   :  { %s5561_s6 = sld [smem:[%s6048_s0 + %s5416_s7]]   ;;  %s5420_s7 = smov 26  }
  0x25   :  { %s5566_s20 = sld [smem:[%s6048_s0 + %s5417_s15]]   ;;  %s5421_s15 = smov 27  }
  0x26   :  { %s5571_s30 = sld [smem:[%s6048_s0 + %s5418_s22]]   ;;  %s5422_s22 = smov 28  }
  0x27   :  { %s5586_s12 = sld [smem:[%s6048_s0 + %s5421_s15]]   ;;  %s5425_s15 = smov 31  }
  0x28   :  { %s5606_s17 = sld [smem:[%s6048_s0 + %s5425_s15]]  }
  0x29   :  { %6069 = sst [smem:[#allocation24_spill]] %s5556_s4 }
  0x2a   :  { %6070 = sst [smem:[#allocation25_spill]] %s5561_s6 }
  0x2b   :  { %s5576_s4 = sld [smem:[%s6048_s0 + %s5419_s28]]   ;;  %s5423_s28 = smov 29  }
  0x2c   :  { %6071 = sst [smem:[#allocation26_spill]] %s5571_s30 }
  0x2d   :  { %s5581_s6 = sld [smem:[%s6048_s0 + %s5420_s7]]   ;;  %s5424_s7 = smov 30  }
  0x2e   :  { %s5591_s30 = sld [smem:[%s6048_s0 + %s5422_s22]]   ;;  %s5426_s22 = smov 32  }
  0x2f   :  { %s5596_s24 = sld [smem:[%s6048_s0 + %s5423_s28]]  }
  0x30   :  { %s5611_s13 = sld [smem:[%s6048_s0 + %s5426_s22]]  }
  0x33   :  { %6072 = sst [smem:[#allocation27_spill]] %s5581_s6 }
  0x34   :  { %s5601_s6 = sld [smem:[%s6048_s0 + %s5424_s7]]  }
  0x35   :  { %70 = vsyncpa [#allocation3], 0 }
  0x36   :  { %71 = vsyncpa [#allocation5], 0 }
  0x37   :  { %72 = vsyncpa [#allocation8], 0  ;;  %s5613_s28 = smov 0  }
  0x38 LB: > { %s5427_s1 = smov [#allocation4]   ;;  %s5619_s7 = sadd.s32 4294967295, %s5393_s28   ;;  %s5393_s28 = sphi %s5613_s28, %s78_s28  }
  0x39   : > { %s883_s2 = sshll.u32 %s5427_s1, 4  ;;  %p4656_p0 = scmp.ge.s32.totalorder %s5393_s28, 1  ;;  %s5624_s2 = int_to_ptr.vmem [resolvable:$true] %s883_s2 }
  0x3a   : > { %p796_p1 = scmp.lt.s32.totalorder %s5393_s28, 3  ;;  %p6054_p2 = scmp.eq.s32.totalorder %s5619_s7, 0 }
  0x3b   : > { %s5428_s10 = smov [#allocation7]   ;;  %s5429_s15 = smov [#allocation2]  }
  0x3c   : > { %p5626_p3 = pnand %p4656_p0, %p796_p1  ;;  %s908_s11 = sshll.u32 %s5428_s10, 4  ;;  %s5632_s11 = int_to_ptr.vmem [resolvable:$true] %s908_s11 }
  0x3d   : > { %s869_s16 = sshll.u32 %s5429_s15, 4  ;;  %s5430_s22 = smov [#allocation6]   ;;  %s5640_s16 = int_to_ptr.vmem [resolvable:$true] %s869_s16 }
  0x3e   : > { %s6073_s0 = scalar_select %p5626_p3, 1, 0 }
  0x3f   : > { %p5113_p4 = pneg %p5626_p3  ;;  %s897_s23 = sshll.u32 %s5430_s22, 4  ;;  %s5642_s23 = int_to_ptr.vmem [resolvable:$true] %s897_s23 }
  0x40   : > { %s5235_s26 = scalar_lea.hbm %s5576_s4, 16 }
  0x41   : > { %p5636_p5 = pnand %p6054_p2, %p5113_p4  ;;  %p5236_p6 = scmp.ne.s32.totalorder %s5576_s4, %s5235_s26 }
  0x42   : > { %p5242_p10 = scmp.lt.u32.totalorder %s5235_s26, %s5576_s4 }
  0x43   : > { %p5648_p7 = pneg %p5636_p5 }
  0x45   : > { %p5238_p8 = pnand %p5648_p7, %p5236_p6 }
  0x47   : > { %p5239_p9 = pneg %p5238_p8 }
  0x49   : > { %p5244_p11 = pnand %p5242_p10, %p5239_p9 }
  0x4b   : > { %5247 = shalt.err (!%p5244_p11)
}
  0x4c   : > { %s5248_s10 = scalar_lea.vmem %s5624_s2, 16  ;;  %s5255_s15 = scalar_lea.vmem %s5624_s2, 32 }
  0x4d   : > { %p5249_p12 = scmp.ne.s32.totalorder %s5624_s2, %s5248_s10  ;;  %p5256_p1 = scmp.lt.s32.totalorder %s5624_s2, %s5624_s2 }
  0x4e   : > { %p5257_p4 = scmp.lt.s32.totalorder %s5255_s15, %s5248_s10 }
  0x4f   : > { %p5251_p13 = pnand %p5249_p12, %p5648_p7 }
  0x50   : > { %p5258_p2 = por %p5257_p4, %p5256_p1 }
  0x51   : > { %p5252_p0 = pneg %p5251_p13 }
  0x53   : > { %p5259_p6 = pnand %p5258_p2, %p5252_p0 }
  0x55   : > { %5262 = shalt.err (!%p5259_p6)
}
  0x56   : > { %5119 = dma.hbm_to_vmem [thread:$0]  (!%p5636_p5), %s5576_s4, 16, %s5624_s2, [#allocation5]  }
  0x57   : > { %s5263_s22 = scalar_lea.hbm %s5591_s30, 16 }
  0x58   : > { %p5264_p8 = scmp.ne.s32.totalorder %s5591_s30, %s5263_s22  ;;  %p5270_p11 = scmp.lt.u32.totalorder %s5263_s22, %s5591_s30 }
  0x5a   : > { %p5266_p9 = pnand %p5264_p8, %p5648_p7 }
  0x5c   : > { %p5267_p10 = pneg %p5266_p9 }
  0x5e   : > { %p5272_p12 = pnand %p5270_p11, %p5267_p10 }
  0x60   : > { %5275 = shalt.err (!%p5272_p12)
}
  0x61   : > { %s5276_s26 = scalar_lea.vmem %s5632_s11, 16  ;;  %s5283_s10 = scalar_lea.vmem %s5632_s11, 32 }
  0x62   : > { %p5277_p2 = scmp.ne.s32.totalorder %s5632_s11, %s5276_s26  ;;  %p5284_p1 = scmp.lt.s32.totalorder %s5632_s11, %s5632_s11 }
  0x63   : > { %p5285_p4 = scmp.lt.s32.totalorder %s5283_s10, %s5276_s26 }
  0x64   : > { %p5279_p13 = pnand %p5277_p2, %p5648_p7 }
  0x65   : > { %p5286_p6 = por %p5285_p4, %p5284_p1 }
  0x66   : > { %p5280_p0 = pneg %p5279_p13 }
  0x68   : > { %p5287_p8 = pnand %p5286_p6, %p5280_p0 }
  0x6a   : > { %5290 = shalt.err (!%p5287_p8)
}
  0x6b   : > { %5125 = dma.hbm_to_vmem [thread:$0]  (!%p5636_p5), %s5591_s30, 16, %s5632_s11, [#allocation8]  }
  0x6c   : > { %s5291_s2 = scalar_lea.hbm %s5566_s20, 16 }
  0x6d   : > { %p5292_p9 = scmp.ne.s32.totalorder %s5566_s20, %s5291_s2  ;;  %p5298_p12 = scmp.lt.u32.totalorder %s5291_s2, %s5566_s20 }
  0x6f   : > { %p5294_p10 = pnand %p5292_p9, %p5648_p7 }
  0x71   : > { %p5295_p11 = pneg %p5294_p10 }
  0x73   : > { %p5300_p2 = pnand %p5298_p12, %p5295_p11 }
  0x75   : > { %5303 = shalt.err (!%p5300_p2)
}
  0x76   : > { %s5304_s15 = scalar_lea.vmem %s5640_s16, 16  ;;  %s5311_s22 = scalar_lea.vmem %s5640_s16, 32 }
  0x77   : > { %p5305_p13 = scmp.ne.s32.totalorder %s5640_s16, %s5304_s15  ;;  %p5312_p4 = scmp.lt.s32.totalorder %s5640_s16, %s5640_s16 }
  0x78   : > { %p5313_p6 = scmp.lt.s32.totalorder %s5311_s22, %s5304_s15 }
  0x79   : > { %p5307_p0 = pnand %p5305_p13, %p5648_p7 }
  0x7a   : > { %p5314_p8 = por %p5313_p6, %p5312_p4 }
  0x7b   : > { %p5308_p1 = pneg %p5307_p0 }
  0x7d   : > { %p5315_p9 = pnand %p5314_p8, %p5308_p1 }
  0x7f   : > { %5318 = shalt.err (!%p5315_p9)
}
  0x80   : > { %5116 = dma.hbm_to_vmem [thread:$0]  (!%p5636_p5), %s5566_s20, 16, %s5640_s16, [#allocation3]  }
  0x81   : > { %s5319_s11 = scalar_lea.hbm %s5586_s12, 16 }
  0x82   : > { %p5320_p10 = scmp.ne.s32.totalorder %s5586_s12, %s5319_s11  ;;  %p5326_p2 = scmp.lt.u32.totalorder %s5319_s11, %s5586_s12 }
  0x84   : > { %p5322_p11 = pnand %p5320_p10, %p5648_p7 }
  0x86   : > { %p5323_p12 = pneg %p5322_p11 }
  0x88   : > { %p5328_p13 = pnand %p5326_p2, %p5323_p12 }
  0x8a   : > { %5331 = shalt.err (!%p5328_p13)
}
  0x8b   : > { %s5332_s26 = scalar_lea.vmem %s5642_s23, 16  ;;  %s5339_s10 = scalar_lea.vmem %s5642_s23, 32 }
  0x8c   : > { %p5333_p0 = scmp.ne.s32.totalorder %s5642_s23, %s5332_s26  ;;  %p5340_p6 = scmp.lt.s32.totalorder %s5642_s23, %s5642_s23 }
  0x8d   : > { %p5341_p8 = scmp.lt.s32.totalorder %s5339_s10, %s5332_s26 }
  0x8e   : > { %p5335_p1 = pnand %p5333_p0, %p5648_p7 }
  0x8f   : > { %p5342_p9 = por %p5341_p8, %p5340_p6 }
  0x90   : > { %p5336_p4 = pneg %p5335_p1 }
  0x92   : > { %p5343_p10 = pnand %p5342_p9, %p5336_p4 }
  0x94   : > { %5346 = shalt.err (!%p5343_p10)
}
  0x95   : > { %5122 = dma.hbm_to_vmem [thread:$0]  (!%p5636_p5), %s5586_s12, 16, %s5642_s23, [#allocation5]  }
  0x96   : > { %s5431_s16 = smov [#allocation9]   ;;  %s5347_s15 = scalar_lea.hbm %s5596_s24, 16 }
  0x97   : > { %s919_s2 = sshll.u32 %s5431_s16, 4  ;;  %p5348_p11 = scmp.ne.s32.totalorder %s5596_s24, %s5347_s15  ;;  %s920_s2 = int_to_ptr.vmem [resolvable:$true] %s919_s2 }
  0x98   : > { %p5354_p13 = scmp.lt.u32.totalorder %s5347_s15, %s5596_s24 }
  0x99   : > { %p5350_p12 = pnand %p5348_p11, %p5648_p7 }
  0x9b   : > { %p5351_p2 = pneg %p5350_p12 }
  0x9d   : > { %p5356_p0 = pnand %p5354_p13, %p5351_p2 }
  0x9f   : > { %5359 = shalt.err (!%p5356_p0)
}
  0xa0   : > { %s5360_s22 = scalar_lea.vmem %s920_s2, 16  ;;  %s5367_s11 = scalar_lea.vmem %s920_s2, 32 }
  0xa1   : > { %p5361_p1 = scmp.ne.s32.totalorder %s920_s2, %s5360_s22  ;;  %p5368_p8 = scmp.lt.s32.totalorder %s920_s2, %s920_s2 }
  0xa2   : > { %p5369_p9 = scmp.lt.s32.totalorder %s5367_s11, %s5360_s22 }
  0xa3   : > { %p5363_p4 = pnand %p5361_p1, %p5648_p7 }
  0xa4   : > { %p5370_p10 = por %p5369_p9, %p5368_p8 }
  0xa5   : > { %p5364_p6 = pneg %p5363_p4 }
  0xa7   : > { %p5371_p3 = pnand %p5370_p10, %p5364_p6 }
  0xa9   : > { %5374 = shalt.err (!%p5371_p3)
}
  0xaa   : > { %5128 = dma.hbm_to_vmem [thread:$0]  (!%p5636_p5), %s5596_s24, 16, %s920_s2, [#allocation8]  }
  0xab   : > { %p6076_p11 = scmp.ne.s32.totalorder %s6073_s0, 0 }
  0xac   : > { %p6077_p12 = scmp.eq.s32.totalorder (!%p6076_p11), %s5619_s7, 0 }
  0xad   : > { %961 = sbr.rel (%p6076_p11) target bundleno = 5321 (0x14c9), region = 148 }
  0xb4   : > { %5380 = dma.done.wait (%p6077_p12), [#allocation3], 16   ;;  %p6078_p2 = pmov %p6077_p12 }
  0xb6   : > { %5382 = vsyncadd (%p6078_p2), [#allocation3], 4294967280  ;;  %p6079_p7 = pmov %p6078_p2 }
  0xb7   : > { %p6080_p13 = pmov %p6078_p2 }
  0xb8   : > { %5384 = dma.done.wait (%p6079_p7), [#allocation5], 32  }
  0xb9   : > { %5386 = vsyncadd (%p6080_p13), [#allocation5], 4294967264  ;;  %p6081_p3 = pmov %p6078_p2 }
  0xba   : > { %p6082_p5 = pmov %p6078_p2 }
  0xbb   : > { %5388 = dma.done.wait (%p6081_p3), [#allocation8], 32  }
  0xbc   : > { %5390 = vsyncadd (%p6082_p5), [#allocation8], 4294967264  ;;  %p1067_p0 = scmp.lt.s32.totalorder %s5619_s7, 1  ;;  %v5432_v0 = vmov 0.0|0.0   ;;  %vm5433_vm0 = vmmov 0   ;;  %v5434_v1 = vmov 0.0  }
  0xbd   : > { %5023 = vmatprep.subr.bf16.mxu1 %v5432_v0  ;;  %4833 = vmatprep.mubr.msk.f32.mxu1 %vm5433_vm0, %v5434_v1  ;;  %v1092_v2 = vld [vmem:[%s5471_s21] sm:$0xff]  ;;  %v1093_v3 = vld [vmem:[%s5471_s21 + $0x8] sm:$0xff]  ;;  %v1094_v4 = vld [vmem:[%s5471_s21 + $0x10] sm:$0xff]  ;;  %vm1118_vm1 = vcmask 261120   ;;  %s5435_s23 = smov 104   ;;  %s5436_s1 = smov 120  }
  0xbe   : > { %s6101_s7 = smov (!%p1067_p0, %s5619_s7), 1  ;;  %5035 = vmatprep.subr.bf16.mxu0 %v5432_v0  ;;  %4855 = vmatprep.mubr.msk.f32.mxu0 %vm5433_vm0, %v5434_v1  ;;  %v5024_v5 = vpack.c.bf16 %v1093_v3, %v1092_v2  ;;  %v1095_v6 = vld [vmem:[%s5471_s21 + $0x18] sm:$0xff]  ;;  %v5759_v9 = vld [vmem:[%s5456_s9] sm:$0xff]  ;;  %v1098_v11 = vld [vmem:[%s5481_s29 + $0x8] sm:$0xff]  ;;  %s5437_s26 = smov 112   ;;  %vm1502_vm2 = vcmask 64512  }
  0xbf   : > { %s6056_s0 = sshll.u32 %s6101_s7, 3  ;;  %v5027_v7 = vpack.c.bf16 %v1095_v6, %v1094_v4  ;;  %v1097_v10 = vld [vmem:[%s5481_s29] sm:$0xff]  ;;  %v1099_v14 = vld [vmem:[%s5481_s29 + $0x10] sm:$0xff]  ;;  %v1100_v15 = vld [vmem:[%s5481_s29 + $0x18] sm:$0xff]  ;;  %s5440_s10 = smov 16   ;;  %vm2544_vm3 = vcmask 130048  }
  0xc0   : > { %s1070_s18 = scalar_lea.vmem %s5451_s5, %s6056_s0  ;;  %5025 = vmatpush3.bf16.msra.mxu1 %v5024_v5  ;;  %v5030_v13 = vpack.c.bf16 %v1098_v11, %v1097_v10  ;;  %v5033_v16 = vpack.c.bf16 %v1100_v15, %v1099_v14  ;;  %v4677_v19 = vld [vmem:[%s5486_s3] ss:$0 sm:$0xff]  ;;  %v1103_v26 = vld [vmem:[%s5491_s8 + $0x8] sm:$0xff]  ;;  %v1104_v27 = vld [vmem:[%s5491_s8 + $0x10] sm:$0xff]  ;;  %s5441_s16 = smov 8   ;;  %vm2546_vm4 = vcmask 195584  }
  0xc1   : > { %v5756_v8 = vld [vmem:[%s1070_s18] sm:$0xff]  ;;  %5026 = vmatprep.subr.bf16.mxu1 %v5432_v0  ;;  %v1105_v29 = vld [vmem:[%s5491_s8 + $0x18] sm:$0xff]  ;;  %s6057_s2 = smov 24   ;;  %s6083_s15 = sld [smem:[#allocation13_spill]]  ;;  %vm4361_vm5 = vcmask 523264  }
  0xc2   : > { %v1091_v12 = vadd.f32 %v5759_v9, %v5756_v8  ;;  %v4675_v23 = vld [vmem:[%s5476_s25] ss:$0 sm:$0xff]  ;;  %v5039_v30 = vpack.c.bf16 %v1105_v29, %v1104_v27  ;;  %s6084_s22 = sld [smem:[#allocation14_spill]]  ;;  %s4735_s11 = sshll.u32 %s6101_s7, 4 }
  0xc3   : > { %v1102_v25 = vld [vmem:[%s5491_s8] sm:$0xff] }
  0xc4   : > { %5028 = vmatpush3.bf16.msra.mxu1 %v5027_v7  ;;  %v5036_v28 = vpack.c.bf16 %v1103_v26, %v1102_v25  ;;  %v4679_v55 = vld [vmem:[%s5496_s14] ss:$0 sm:$0xff] }
  0xc5   : > { %5029 = vmatprep.subr.bf16.mxu1 %v5432_v0 }
  0xc6   : > { %5037 = vmatpush3.bf16.msra.mxu0 %v5036_v28 }
  0xc7   : > { %4834 = vmatmul.mubr.msk.f32.vlgmr.msra.gmra.mrb[0].mxu1 %vm1118_vm1, %v1091_v12  ;;  %5038 = vmatprep.subr.bf16.mxu0 %v5432_v0  ;;  %s1075_s18 = scalar_lea.vmem %s6083_s15, %s4735_s11  ;;  %s6086_s15 = sld [smem:[#allocation18_spill]] }
  0xc8   : > { %5031 = vmatpush3.bf16.msra.mxu1 %v5030_v13  ;;  %4844 = vmatprep.mubr.msk.f32.mxu1 %vm5433_vm0, %v5434_v1  ;;  %s1080_s0 = scalar_lea.vmem %s6084_s22, %s4735_s11  ;;  %s6087_s22 = sld [smem:[#allocation20_spill]] }
  0xc9   : > { %5032 = vmatprep.subr.bf16.mxu1 %v5432_v0  ;;  %s6090_s11 = sld [smem:[#allocation21_spill]] }
  0xca   : > { %5040 = vmatpush3.bf16.msra.mxu0 %v5039_v30 }
  0xcb   : > { %4868 = vmatprep.subr.mxu0 %v5434_v1 }
  0xcc   : > { %5034 = vmatpush3.bf16.msra.mxu1 %v5033_v16 }
  0xcd   : > { %4858 = vmatprep.subr.mxu1 %v5434_v1  ;;  %4856 = vmatmul.mubr.msk.f32.vlgmr.msra.gmra.mrb[0].mxu0 %vm1118_vm1, %v5756_v8 }
  0xce   : > { %4870 = vmatprep.mubr.msk.f32.mxu0 %vm5433_vm0, %v5434_v1 }
  0xcf   : > { %4845 = vmatmul.mubr.msk.f32.vlgmr.msra.gmra.mrb[2].mxu1 %vm1118_vm1, %v1091_v12 }
  0xd0   : > { %4860 = vmatprep.mubr.msk.f32.mxu1 %vm5433_vm0, %v5434_v1 }
 0x19a   : > { %v1188_v17 = vpop.f32.mrb[0].mxu1 }
 0x19b   : > { %v4835_v18 = vpop.f32.mrb[1].mxu1  ;;  %v1189_v24 = vadd.f32 %v4675_v23, %v1188_v17 }
 0x1a0   : > { %v1343_v41 = vpop.f32.mrb[0].mxu0 }
 0x1a1   : > { %v4857_v42 = vpop.f32.mrb[1].mxu0  ;;  %v1344_v56 = vadd.f32 %v4679_v55, %v1343_v41 }
 0x1a2   : > { %v1264_v20 = vpop.f32.mrb[2].mxu1 }
 0x1a3   : > { %v1265_v21 = vadd.f32 %v4677_v19, %v1264_v20  ;;  %v4846_v22 = vpop.f32.mrb[3].mxu1 }
 0x1a5   : > { %1361 = vrot.lane.b32.xlu1 %v1265_v21, %s5435_s23  ;;  %1355 = vrot.lane.b32.xlu0 %v1265_v21, %s5436_s1 }
 0x1a9   : > { %1348 = vrot.lane.b32.xlu1 %v1189_v24, %s5436_s1  ;;  %1358 = vrot.lane.b32.xlu0 %v1265_v21, %s5437_s26 }
 0x1ad   : > { %1352 = vrot.lane.b32.xlu1 %v1189_v24, %s5435_s23  ;;  %1350 = vrot.lane.b32.xlu0 %v1189_v24, %s5437_s26 }
 0x1cb   : > { %1374 = vxpose.xlu0.b32.start.end [1/1] (short) (narrow) %v1265_v21, 8 }
 0x217   : > { %v1356_v31 = vpop.permute.xlu0 %1355  ;;  %v1362_v33 = vpop.permute.xlu1 %1361 }
 0x218   : > { %1406 = vxpose.xlu1.b32.start.end [1/1] (short) (narrow) %v1356_v31, 8 }
 0x21b   : > { %v1359_v32 = vpop.permute.xlu0 %1358  ;;  %v1349_v36 = vpop.permute.xlu1 %1348 }
 0x21c   : > { %1438 = vxpose.xlu0.b32.start.end [1/1] (short) (narrow) %v1359_v32, 8 }
 0x21f   : > { %v1351_v34 = vpop.permute.xlu0 %1350  ;;  %v1353_v37 = vpop.permute.xlu1 %1352 }
 0x220   : > { %1470 = vxpose.xlu0.b32.start.end [1/1] (short) (narrow) %v1362_v33, 8 }
 0x24b   : > { %v1390_v35 = vpop.trf.xlu0 }
 0x24c   : > { %4859 = vmatpush3.msra.mxu1 %v1390_v35 }
 0x24d   : > { %4861 = vmatmul.mubr.msk.f32.vlgmr.msra.gmra.mrb[4].mxu1 %vm1502_vm2, %v1189_v24  ;;  %4863 = vmatprep.subr.mxu1 %v5434_v1 }
 0x24e   : > { %4865 = vmatprep.mubr.msk.f32.mxu1 %vm5433_vm0, %v5434_v1 }
 0x298   : > { %v1422_v38 = vpop.trf.xlu1 }
 0x299   : > { %4864 = vmatpush3.msra.mxu1 %v1422_v38 }
 0x29a   : > { %4866 = vmatmul.mubr.msk.f32.vlgmr.msra.gmra.mrb[6].mxu1 %vm1502_vm2, %v1349_v36  ;;  %4873 = vmatprep.subr.mxu1 %v5434_v1 }
 0x29b   : > { %4875 = vmatprep.mubr.msk.f32.mxu1 %vm5433_vm0, %v5434_v1 }
 0x29c   : > { %v1454_v39 = vpop.trf.xlu0 }
 0x29d   : > { %4869 = vmatpush3.msra.mxu0 %v1454_v39 }
 0x29e   : > { %4871 = vmatmul.mubr.msk.f32.vlgmr.msra.gmra.mrb[2].mxu0 %vm1502_vm2, %v1351_v34  ;;  %4878 = vmatprep.subr.mxu0 %v5434_v1 }
 0x29f   : > { %4880 = vmatprep.mubr.msk.f32.mxu0 %vm5433_vm0, %v5434_v1 }
 0x2a0   : > { %v1486_v40 = vpop.trf.xlu0 }
 0x2a1   : > { %4874 = vmatpush3.msra.mxu1 %v1486_v40 }
 0x2a2   : > { %4876 = vmatmul.mubr.msk.f32.vlgmr.msra.gmra.mrb[8].mxu1 %vm1502_vm2, %v1353_v37  ;;  %4883 = vmatprep.subr.mxu1 %v5434_v1 }
 0x2a3   : > { %4885 = vmatprep.mubr.msk.f32.mxu1 %vm5433_vm0, %v5434_v1 }
 0x320   : > { %v1571_v43 = vpop.f32.mrb[4].mxu1 }
 0x321   : > { %v4862_v44 = vpop.f32.mrb[5].mxu1  ;;  %v1791_v45 = vsel %vm1502_vm2, %v1571_v43, -inf }
 0x322   : > { %1792 = vmax.xlane.f32.xlu0 %v1791_v45  ;;  %v1107_v44 = vld [vmem:[%s5501_s19] sm:$0xff]  ;;  %v1108_v45 = vld [vmem:[%s5501_s19 + $0x8] sm:$0xff] }
 0x36d   : > { %v1643_v46 = vpop.f32.mrb[6].mxu1 }
 0x36e   : > { %v4867_v47 = vpop.f32.mrb[7].mxu1  ;;  %v1794_v48 = vsel %vm1502_vm2, %v1643_v46, -inf }
 0x36f   : > { %1795 = vmax.xlane.f32.xlu1 %v1794_v48  ;;  %v5438_v48 = vmov 1983009808  }
 0x371   : > { %v1715_v49 = vpop.f32.mrb[2].mxu0 }
 0x372   : > { %v4872_v50 = vpop.f32.mrb[3].mxu0  ;;  %v1797_v51 = vsel %vm1502_vm2, %v1715_v49, -inf }
 0x373   : > { %1798 = vmax.xlane.f32.xlu1 %v1797_v51  ;;  %v2400_v50 = vlaneseq  ;;  %v5439_v51 = vmov 1934713408  }
 0x375   : > { %v1787_v52 = vpop.f32.mrb[8].mxu1 }
 0x376   : > { %v4877_v53 = vpop.f32.mrb[9].mxu1  ;;  %v1800_v54 = vsel %vm1502_vm2, %v1787_v52, -inf }
 0x377   : > { %1801 = vmax.xlane.f32.xlu0 %v1800_v54  ;;  %v2401_v54 = vshrl.u32 %v2400_v50, 7  ;;  %v2669_v50 = vld [vmem:[%s5531_s27 + $0x18] sm:$0xff] }
 0x384   : > { %1365 = vrot.lane.b32.xlu1 %v1344_v56, %s5436_s1 }
 0x388   : > { %1371 = vrot.lane.b32.xlu1 %v1344_v56, %s5435_s23 }
 0x38d   : > { %1368 = vrot.lane.b32.xlu0 %v1344_v56, %s5437_s26 }
 0x3af   : > { %v1793_v57 = vpop.xlane.xlu0 %1792 }
 0x3b0   : > { %v1803_v58 = vsub.f32 %v1571_v43, %v1793_v57 }
 0x3b2   : > { %v1807_v59 = vmul.f32 1.442695, %v1803_v58 }
 0x3b4   : > { %5195 = vpow2.f32 %v1807_v59 }
 0x3be   : > { %v5196_v60 = vpop.eup %5195 }
 0x3bf   : > { %v1815_v61 = vsel %vm1502_vm2, %v5196_v60, 0.0 }
 0x3c0   : > { %1816 = vadd.xlane.f32.xlu1 %v1815_v61 }
 0x3fc   : > { %v1796_v62 = vpop.xlane.xlu1 %1795 }
 0x3fd   : > { %v1804_v63 = vsub.f32 %v1643_v46, %v1796_v62  ;;  %v5042_v46 = vpack.c.bf16 %v1108_v45, %v1107_v44 }
 0x3ff   : > { %v1809_v2 = vmul.f32 1.442695, %v1804_v63 }
 0x400   : > { %v1799_v3 = vpop.xlane.xlu1 %1798 }
 0x401   : > { %5197 = vpow2.f32 %v1809_v2  ;;  %v1805_v4 = vsub.f32 %v1715_v49, %v1799_v3  ;;  %v2398_v49 = vunpack.c.l.s4 %v5438_v48  ;;  %v2668_v48 = vld [vmem:[%s5531_s27 + $0x10] sm:$0xff] }
 0x403   : > { %v1811_v5 = vmul.f32 1.442695, %v1805_v4  ;;  %v2399_v53 = vunpack.c.0.s8 %v2398_v49 }
 0x404   : > { %v1802_v6 = vpop.xlane.xlu0 %1801  ;;  %v1366_v17 = vpop.permute.xlu1 %1365 }
 0x405   : > { %5199 = vpow2.f32 %v1811_v5  ;;  %v1806_v7 = vsub.f32 %v1787_v52, %v1802_v6  ;;  %v2430_v52 = vunpack.c.l.s4 %v5439_v51  ;;  %v5846_v58 = vsub.s32 %v2399_v53, %v2401_v54  ;;  %v1089_v53 = vld [vmem:[%s1080_s0] sm:$0xff] }
 0x406   : > { %v5057_v51 = vpack.c.bf16 %v2669_v50, %v2668_v48 }
 0x407   : > { %v1813_v10 = vmul.f32 1.442695, %v1806_v7  ;;  %v2431_v57 = vunpack.c.0.s8 %v2430_v52  ;;  %v5882_v52 = vld [vmem:[%s1075_s18] sm:$0xff] }
 0x408   : > { %v1369_v18 = vpop.permute.xlu0 %1368  ;;  %v1372_v19 = vpop.permute.xlu1 %1371 }
 0x409   : > { %5201 = vpow2.f32 %v1813_v10  ;;  %v5848_v2 = vsub.s32 %v2431_v57, %v2401_v54  ;;  %v2659_v54 = vadd.f32 %v1089_v53, %v5882_v52 }
 0x40b   : > { %v5198_v11 = vpop.eup %5197 }
 0x40c   : > { %v1818_v12 = vsel %vm1502_vm2, %v5198_v11, 0.0 }
 0x40d   : > { %1819 = vadd.xlane.f32.xlu0 %v1818_v12 }
 0x40f   : > { %v5200_v13 = vpop.eup %5199 }
 0x410   : > { %v1821_v14 = vsel %vm1502_vm2, %v5200_v13, 0.0 }
 0x411   : > { %1822 = vadd.xlane.f32.xlu0 %v1821_v14  ;;  %v1110_v14 = vld [vmem:[%s5501_s19 + $0x18] sm:$0xff] }
 0x413   : > { %v5202_v15 = vpop.eup %5201 }
 0x414   : > { %v1824_v16 = vsel %vm1502_vm2, %v5202_v15, 0.0 }
 0x415   : > { %1825 = vadd.xlane.f32.xlu1 %v1824_v16 }
 0x43e   : > { %1835 = vxpose.xlu0.b32.start.end [1/1] (short) (narrow) %v1344_v56, 8 }
 0x442   : > { %1899 = vxpose.xlu0.b32.start.end [1/1] (short) (narrow) %v1369_v18, 8 }
 0x446   : > { %1931 = vxpose.xlu0.b32.start.end [1/1] (short) (narrow) %v1372_v19, 8 }
 0x448   : > { %1867 = vxpose.xlu1.b32.start.end [1/1] (short) (narrow) %v1366_v17, 8 }
 0x44d   : > { %v1817_v20 = vpop.xlane.xlu1 %1816 }
 0x44e   : > { %5203 = vrcp.f32 %v1817_v20 }
 0x458   : > { %v5204_v21 = vpop.eup %5203 }
 0x459   : > { %v1831_v22 = vmul.f32 %v5204_v21, %v5196_v60 }
 0x45b   : > { %4879 = vmatpush3.xpose.msk.msra.mxu0 %vm1502_vm2, %v1831_v22 }
 0x45c   : > { %4888 = vmatprep.subr.mxu0 %v5434_v1 }
 0x49a   : > { %v1820_v23 = vpop.xlane.xlu0 %1819 }
 0x49b   : > { %5205 = vrcp.f32 %v1820_v23 }
 0x49e   : > { %v1823_v26 = vpop.xlane.xlu0 %1822 }
 0x49f   : > { %5207 = vrcp.f32 %v1823_v26 }
 0x4a2   : > { %v1826_v27 = vpop.xlane.xlu1 %1825 }
 0x4a3   : > { %5209 = vrcp.f32 %v1826_v27 }
 0x4a5   : > { %v5206_v24 = vpop.eup %5205 }
 0x4a6   : > { %v1832_v25 = vmul.f32 %v5206_v24, %v5198_v11 }
 0x4a8   : > { %4884 = vmatpush3.xpose.msk.msra.mxu1 %vm1502_vm2, %v1832_v25 }
 0x4a9   : > { %4893 = vmatprep.subr.mxu1 %v5434_v1  ;;  %v5208_v28 = vpop.eup %5207 }
 0x4aa   : > { %v1833_v29 = vmul.f32 %v5208_v28, %v5200_v13  ;;  %v1109_v13 = vld [vmem:[%s5501_s19 + $0x10] sm:$0xff] }
 0x4ab   : > { %v5045_v19 = vpack.c.bf16 %v1110_v14, %v1109_v13 }
 0x4ad   : > { %v5210_v32 = vpop.eup %5209 }
 0x4ae   : > { %v1834_v33 = vmul.f32 %v5210_v32, %v5202_v15 }
 0x4be   : > { %v1851_v30 = vpop.trf.xlu0 }
 0x4bf   : > { %4881 = vmatmul.mubr.msk.f32.vlgmr.msra.gmra.mrb[4].mxu0 %vm1502_vm2, %v1851_v30 }
 0x4c0   : > { %4889 = vmatpush3.xpose.msk.msra.mxu0 %vm1502_vm2, %v1833_v29  ;;  %4890 = vmatprep.mubr.msk.f32.mxu0 %vm5433_vm0, %v5434_v1 }
 0x4c1   : > { %5041 = vmatprep.subr.bf16.mxu0 %v5432_v0 }
 0x4c2   : > { %v1915_v31 = vpop.trf.xlu0 }
 0x4c3   : > { %4891 = vmatmul.mubr.msk.f32.vlgmr.msra.gmra.mrb[6].mxu0 %vm1502_vm2, %v1915_v31 }
 0x4c4   : > { %4906 = vmatprep.mubr.msk.f32.mxu0 %vm5433_vm0, %v5434_v1  ;;  %5043 = vmatpush3.bf16.msra.mxu0 %v5042_v46  ;;  %v2666_v46 = vld [vmem:[%s5531_s27] sm:$0xff] }
 0x4c5   : > { %5044 = vmatprep.subr.bf16.mxu0 %v5432_v0 }
 0x4c6   : > { %v1947_v35 = vpop.trf.xlu0 }
 0x4c8   : > { %v1883_v34 = vpop.trf.xlu1  ;;  %5046 = vmatpush3.bf16.msra.mxu0 %v5045_v19 }
 0x4c9   : > { %4886 = vmatmul.mubr.msk.f32.vlgmr.msra.gmra.mrb[10].mxu1 %vm1502_vm2, %v1883_v34 }
 0x4ca   : > { %4894 = vmatpush3.xpose.msk.msra.mxu1 %vm1502_vm2, %v1834_v33  ;;  %4895 = vmatprep.mubr.msk.f32.mxu1 %vm5433_vm0, %v5434_v1 }
 0x4cb   : > { %5047 = vmatprep.subr.bf16.mxu1 %v5432_v0 }
 0x4cd   : > { %4896 = vmatmul.mubr.msk.f32.vlgmr.msra.gmra.mrb[12].mxu1 %vm1502_vm2, %v1947_v35 }
 0x4ce   : > { %4917 = vmatprep.mubr.msk.f32.mxu1 %vm5433_vm0, %v5434_v1 }
 0x592   : > { %v2035_v36 = vpop.f32.mrb[4].mxu0 }
 0x593   : > { %v4882_v37 = vpop.f32.mrb[5].mxu0  ;;  %2267 = vxpose.xlu1.b32.start.end [1/1] (short) (narrow) %v2035_v36, 8 }
 0x596   : > { %v2187_v38 = vpop.f32.mrb[6].mxu0 }
 0x597   : > { %v4892_v39 = vpop.f32.mrb[7].mxu0  ;;  %2331 = vxpose.xlu1.b32.start.end [1/1] (short) (narrow) %v2187_v38, 8 }
 0x59c   : > { %v2111_v40 = vpop.f32.mrb[10].mxu1 }
 0x59d   : > { %2299 = vxpose.xlu0.b32.start.end [1/1] (short) (narrow) %v2111_v40, 8  ;;  %v4887_v41 = vpop.f32.mrb[11].mxu1 }
 0x5a0   : > { %v2263_v42 = vpop.f32.mrb[12].mxu1 }
 0x5a1   : > { %2363 = vxpose.xlu0.b32.start.end [1/1] (short) (narrow) %v2263_v42, 8  ;;  %v4897_v43 = vpop.f32.mrb[13].mxu1 }
 0x613   : > { %v2283_v47 = vpop.trf.xlu1 }
 0x617   : > { %v2347_v55 = vpop.trf.xlu1 }
 0x618   : > { %v2395_v59 = vcombine.low %v2283_v47, %v2347_v55  ;;  %v2396_v60 = vcombine.high %v2283_v47, %v2347_v55  ;;  %v2667_v47 = vld [vmem:[%s5531_s27 + $0x8] sm:$0xff] }
 0x619   : > { %v5053_v49 = vpack.c.bf16 %v2667_v47, %v2666_v46  ;;  %v5885_v55 = vld [vmem:[%s1075_s18 + $0x8] sm:$0xff]  ;;  %s6091_s18 = sld [smem:[#allocation19_spill]] }
 0x61a   : > { %v2403_v3 = vrot.slane %v2395_v59, %v5846_v58  ;;  %v2410_v4 = vrot.slane %v2396_v60, %v5846_v58 }
 0x61b   : > { %5054 = vmatprep.subr.bf16.mxu0 %v5053_v49 }
 0x61d   : > { %v2315_v56 = vpop.trf.xlu0 }
 0x621   : > { %v2379_v61 = vpop.trf.xlu0 }
 0x622   : > { %v2411_v62 = vcombine.low %v2315_v56, %v2379_v61  ;;  %v2412_v63 = vcombine.high %v2315_v56, %v2379_v61  ;;  %v1090_v56 = vld [vmem:[%s1080_s0 + $0x8] sm:$0xff]  ;;  %s6088_s0 = sld [smem:[#allocation16_spill]] }
 0x623   : > { %v2660_v57 = vadd.f32 %v1090_v56, %v5885_v55 }
 0x624   : > { %v2419_v5 = vrot.slane %v2411_v62, %v5846_v58  ;;  %v2426_v6 = vrot.slane %v2412_v63, %v5846_v58 }
 0x626   : > { %v2427_v7 = vcombine.low %v2403_v3, %v2419_v5  ;;  %v2428_v10 = vcombine.high %v2403_v3, %v2419_v5  ;;  %v2443_v11 = vcombine.low %v2410_v4, %v2426_v6  ;;  %v2444_v12 = vcombine.high %v2410_v4, %v2426_v6 }
 0x628   : > { %v2435_v15 = vrot.slane %v2427_v7, %v5848_v2  ;;  %v2442_v16 = vrot.slane %v2428_v10, %v5848_v2  ;;  %v2451_v17 = vrot.slane %v2443_v11, %v5848_v2  ;;  %v2458_v18 = vrot.slane %v2444_v12, %v5848_v2  ;;  %v2661_v11 = vld [vmem:[%s6086_s15] sm:$0xff]  ;;  %v2662_v12 = vld [vmem:[%s6086_s15 + $0x8] sm:$0xff] }
 0x629   : > { %v5048_v13 = vpack.c.bf16 %v2662_v12, %v2661_v11 }
 0x62a   : > { %v2463_v20 = vcombine.low %v2435_v15, %v2442_v16  ;;  %v4693_v21 = vcombine.high %v2435_v15, %v2442_v16  ;;  %v2479_v22 = vcombine.low %v2451_v17, %v2458_v18  ;;  %v4694_v23 = vcombine.high %v2451_v17, %v2458_v18  ;;  %v4701_v15 = vld [vmem:[%s6087_s22] ss:$0 sm:$0xff]  ;;  %v2664_v17 = vld [vmem:[%s6086_s15 + $0x18] sm:$0xff]  ;;  %s6092_s22 = sld [smem:[#allocation22_spill]] }
 0x62b   : > { %5049 = vmatpush3.bf16.msra.mxu1 %v5048_v13 }
 0x62c   : > { %v2470_v24 = vrot.slane %v2463_v20, %v5846_v58  ;;  %v2478_v25 = vrot.slane %v4693_v21, %v5846_v58  ;;  %v2486_v26 = vrot.slane %v2479_v22, %v5846_v58  ;;  %v2494_v27 = vrot.slane %v4694_v23, %v5846_v58  ;;  %5050 = vmatprep.subr.bf16.mxu1 %v5432_v0 }
 0x62e   : > { %v2496_v28 = vcombine.high %v2470_v24, %v2478_v25  ;;  %v2512_v29 = vcombine.high %v2486_v26, %v2494_v27  ;;  %v2495_v30 = vcombine.low %v2470_v24, %v2478_v25  ;;  %v2511_v31 = vcombine.low %v2486_v26, %v2494_v27  ;;  %v4697_v27 = vld [vmem:[%s6088_s0] ss:$0 sm:$0xff]  ;;  %s6096_s0 = sld [smem:[#allocation26_spill]] }
 0x630   : > { %v2510_v32 = vrot.slane %v2496_v28, %v5848_v2  ;;  %v2526_v33 = vrot.slane %v2512_v29, %v5848_v2  ;;  %v2503_v34 = vrot.slane %v2495_v30, %v5848_v2  ;;  %v2519_v35 = vrot.slane %v2511_v31, %v5848_v2 }
 0x632   : > { %v2529_v36 = vcombine.low %v2510_v32, %v2526_v33  ;;  %v2528_v37 = vcombine.high %v2503_v34, %v2519_v35  ;;  %v2527_v38 = vcombine.low %v2503_v34, %v2519_v35  ;;  %v2530_v39 = vcombine.high %v2510_v32, %v2526_v33 }
 0x634   : > { %2536 = vrot.lane.b32.xlu0 %v2529_v36, %s5440_s10  ;;  %2532 = vrot.lane.b32.xlu1 %v2528_v37, %s5441_s16  ;;  %v2671_v37 = vld [vmem:[%s6090_s11] sm:$0xff] }
 0x638   : > { %2540 = vrot.lane.b32.xlu1 %v2530_v39, %s6057_s2  ;;  %s6085_s2 = sld [smem:[#allocation15_spill]]  ;;  %v2673_v39 = vld [vmem:[%s6090_s11 + $0x10] sm:$0xff] }
 0x63e   : > { %v4695_v59 = vld [vmem:[%s6085_s2] ss:$0 sm:$0xff]  ;;  %s6089_s2 = sld [smem:[#allocation17_spill]] }
 0x644   : > { %v4698_v29 = vld [vmem:[%s6089_s2] ss:$0 sm:$0xff]  ;;  %s6099_s2 = sshll.u32 %s6101_s7, 3 }
 0x6a6   : > { %v2533_v40 = vpop.permute.xlu1 %2532  ;;  %v2537_v41 = vpop.permute.xlu0 %2536 }
 0x6a7   : > { %v2543_v42 = vsel %vm1502_vm2, %v2527_v38, %v2533_v40  ;;  %v2672_v38 = vld [vmem:[%s6090_s11 + $0x8] sm:$0xff] }
 0x6a8   : > { %v2545_v44 = vsel %vm2544_vm3, %v2543_v42, %v2537_v41  ;;  %v5061_v40 = vpack.c.bf16 %v2672_v38, %v2671_v37  ;;  %v2674_v41 = vld [vmem:[%s6090_s11 + $0x18] sm:$0xff] }
 0x6a9   : > { %v5065_v42 = vpack.c.bf16 %v2674_v41, %v2673_v39 }
 0x6aa   : > { %v2541_v43 = vpop.permute.xlu1 %2540 }
 0x6ab   : > { %v2547_v45 = vsel %vm2546_vm4, %v2545_v44, %v2541_v43  ;;  %v4699_v44 = vld [vmem:[%s6091_s18] ss:$0 sm:$0xff]  ;;  %s1084_s18 = scalar_lea.vmem %s5611_s13, %s6099_s2 }
 0x6ac   : > { %4907 = vmatmul.mubr.msk.f32.vlgmr.msra.gmra.mrb[8].mxu0 %vm1118_vm1, %v2547_v45 }
 0x6ad   : > { %5056 = vmatpush3.bf16.msra.mxu0 %v5053_v49  ;;  %4928 = vmatprep.mubr.msk.f32.mxu0 %vm1118_vm1, %v2659_v54 }
 0x6ae   : > { %5058 = vmatprep.subr.bf16.mxu0 %v5057_v51 }
 0x6b1   : > { %5060 = vmatpush3.bf16.msra.mxu0 %v5057_v51 }
 0x6b2   : > { %4942 = vmatprep.subr.mxu0 %v5434_v1 }
 0x6b4   : > { %4929 = vmatmul.mubr.msk.f32.vlgmr.msra.gmra.mrb[10].mxu0 %vm1118_vm1, %v2660_v57 }
 0x6b5   : > { %4944 = vmatprep.mubr.msk.f32.mxu0 %vm5433_vm0, %v5434_v1 }
 0x77f   : > { %v2623_v60 = vpop.f32.mrb[8].mxu0 }
 0x780   : > { %v2624_v61 = vadd.f32 %v4695_v59, %v2623_v60  ;;  %v4908_v62 = vpop.f32.mrb[9].mxu0 }
 0x781   : > { %v4704_v62 = vld [vmem:[%s6092_s22] ss:$0 sm:$0xff] }
 0x782   : > { %v2627_v63 = vadd.f32 %v2624_v61, %v5756_v8  ;;  %v2663_v8 = vld [vmem:[%s6086_s15 + $0x10] sm:$0xff] }
 0x783   : > { %v5051_v20 = vpack.c.bf16 %v2664_v17, %v2663_v8 }
 0x784   : > { %v2630_v3 = vsel %vm1118_vm1, %v2627_v63, 0.0 }
 0x785   : > { %2631 = vadd.xlane.f32.xlu1 %v2630_v3  ;;  %5052 = vmatpush3.bf16.msra.mxu1 %v5051_v20 }
 0x786   : > { %5062 = vmatprep.subr.bf16.mxu1 %v5061_v40 }
 0x787   : > { %v4930_v14 = vpop.f32.mrb[10].mxu0 }
 0x788   : > { %v2838_v16 = vpop.f32.mrb[11].mxu0  ;;  %v2844_v18 = vadd.f32 %v4930_v14, %v4701_v15 }
 0x789   : > { %v2839_v19 = vadd.f32 %v4701_v15, %v2838_v16 }
 0x796   : > { %2943 = vrot.lane.b32.xlu1 %v2839_v19, %s5436_s1 }
 0x79a   : > { %2949 = vrot.lane.b32.xlu1 %v2839_v19, %s5437_s26 }
 0x79e   : > { %2955 = vrot.lane.b32.xlu1 %v2839_v19, %s5435_s23 }
 0x7a2   : > { %2957 = vrot.lane.b32.xlu1 %v2844_v18, %s5435_s23 }
 0x7cb   : > { %2981 = vxpose.xlu1.b32.start [1/2] (short) (narrow) %v2839_v19, 8 }
 0x7cf   : > { %2982 = vxpose.xlu1.b32.end [2/2] (short) (narrow) %v2844_v18, 8 }
 0x812   : > { %v2632_v4 = vpop.xlane.xlu1 %2631 }
 0x813   : > { %v2634_v5 = vmul.f32 0.03125, %v2632_v4 }
 0x815   : > { %v2635_v6 = vsub.f32 %v2627_v63, %v2634_v5 }
 0x816   : > { %v2944_v24 = vpop.permute.xlu1 %2943 }
 0x817   : > { %v2636_v7 = vmul.f32 %v2635_v6, %v2635_v6 }
 0x819   : > { %v2637_v10 = vsel %vm1118_vm1, %v2636_v7, 0.0 }
 0x81a   : > { %2638 = vadd.xlane.f32.xlu0 %v2637_v10  ;;  %v2950_v33 = vpop.permute.xlu1 %2949 }
 0x81e   : > { %v2956_v34 = vpop.permute.xlu1 %2955 }
 0x822   : > { %v2958_v35 = vpop.permute.xlu1 %2957 }
 0x830   : > { %2945 = vrot.lane.b32.xlu0 %v2844_v18, %s5436_s1 }
 0x834   : > { %2951 = vrot.lane.b32.xlu0 %v2844_v18, %s5437_s26 }
 0x84b   : > { %v2997_v36 = vpop.trf.xlu1 }
 0x84c   : > { %4943 = vmatpush3.msra.mxu0 %v2997_v36 }
 0x84d   : > { %4952 = vmatprep.subr.mxu0 %v5434_v1 }
 0x852   : > { %3013 = vxpose.xlu0.b32.start [1/2] (short) (narrow) %v2944_v24, 8 }
 0x8a7   : > { %v2639_v21 = vpop.xlane.xlu0 %2638 }
 0x8a8   : > { %v2640_v22 = vmul.f32 0.03125, %v2639_v21 }
 0x8aa   : > { %v2641_v23 = vadd.f32 1e-05, %v2640_v22 }
 0x8ab   : > { %v2946_v25 = vpop.permute.xlu0 %2945 }
 0x8ac   : > { %5211 = vrsqrt.f32 %v2641_v23  ;;  %3014 = vxpose.xlu0.b32.end [2/2] (short) (narrow) %v2946_v25, 8 }
 0x8b6   : > { %v5212_v26 = vpop.eup %5211 }
 0x8b7   : > { %v2643_v28 = vmul.f32 %v5212_v26, %v2635_v6 }
 0x8b9   : > { %v2650_v30 = vmul.f32 %v4697_v27, %v2643_v28 }
 0x8bb   : > { %v5911_v31 = vadd.f32 %v4698_v29, %v2650_v30 }
 0x8bd   : > { %v2658_v32 = vadd.f32 %v5911_v31, %v5759_v9  ;;  %v2952_v9 = vpop.permute.xlu0 %2951 }
 0x8bf   : > { %4918 = vmatmul.mubr.msk.f32.vlgmr.msra.gmra.mrb[14].mxu1 %vm1118_vm1, %v2658_v32 }
 0x8c0   : > { %4939 = vmatprep.mubr.msk.f32.mxu1 %vm1118_vm1, %v5882_v52  ;;  %5064 = vmatpush3.bf16.msra.mxu1 %v5061_v40 }
 0x8c1   : > { %5066 = vmatprep.subr.bf16.mxu1 %v5065_v42 }
 0x8c4   : > { %5068 = vmatpush3.bf16.msra.mxu1 %v5065_v42 }
 0x8c5   : > { %4947 = vmatprep.subr.mxu1 %v5434_v1 }
 0x8c7   : > { %4940 = vmatmul.mubr.msk.f32.vlgmr.msra.gmra.mrb[16].mxu1 %vm1118_vm1, %v5885_v55 }
 0x8c8   : > { %4949 = vmatprep.mubr.msk.f32.mxu1 %vm5433_vm0, %v5434_v1 }
 0x928   : > { %v3029_v43 = vpop.trf.xlu0 }
 0x929   : > { %4948 = vmatpush3.msra.mxu1 %v3029_v43 }
 0x92a   : > { %4957 = vmatprep.subr.mxu1 %v5434_v1 }
 0x992   : > { %v2756_v45 = vpop.f32.mrb[14].mxu1 }
 0x993   : > { %v2757_v46 = vadd.f32 %v4699_v44, %v2756_v45  ;;  %v4919_v47 = vpop.f32.mrb[15].mxu1 }
 0x995   : > { %2937 = vrot.lane.b32.xlu1 %v2757_v46, %s5437_s26  ;;  %2935 = vrot.lane.b32.xlu0 %v2757_v46, %s5436_s1 }
 0x996   : > { %4945 = vmatmul.mubr.msk.f32.vlgmr.msra.gmra.mrb[12].mxu0 %vm1502_vm2, %v2757_v46 }
 0x997   : > { %4954 = vmatprep.mubr.msk.f32.mxu0 %vm5433_vm0, %v5434_v1 }
 0x999   : > { %2939 = vrot.lane.b32.xlu0 %v2757_v46, %s5435_s23 }
 0x99a   : > { %v4941_v49 = vpop.f32.mrb[16].mxu1 }
 0x99b   : > { %v2925_v50 = vpop.f32.mrb[17].mxu1  ;;  %v2931_v63 = vadd.f32 %v4941_v49, %v4704_v62 }
 0x99c   : > { %v2926_v13 = vadd.f32 %v4704_v62, %v2925_v50 }
 0x9b7   : > { %3045 = vxpose.xlu0.b32.start [1/2] (short) (narrow) %v2950_v33, 8 }
 0x9bb   : > { %3046 = vxpose.xlu0.b32.end [2/2] (short) (narrow) %v2952_v9, 8 }
 0x9be   : > { %3077 = vxpose.xlu1.b32.start [1/2] (short) (narrow) %v2956_v34, 8 }
 0x9c2   : > { %3078 = vxpose.xlu1.b32.end [2/2] (short) (narrow) %v2958_v35, 8 }
 0xa07   : > { %v2936_v48 = vpop.permute.xlu0 %2935  ;;  %v2938_v53 = vpop.permute.xlu1 %2937 }
 0xa08   : > { %4950 = vmatmul.mubr.msk.f32.vlgmr.msra.gmra.mrb[18].mxu1 %vm1502_vm2, %v2936_v48 }
 0xa09   : > { %4959 = vmatprep.mubr.msk.f32.mxu1 %vm5433_vm0, %v5434_v1 }
 0xa0b   : > { %v2940_v51 = vpop.permute.xlu0 %2939 }
 0xa37   : > { %v3061_v52 = vpop.trf.xlu0 }
 0xa38   : > { %4953 = vmatpush3.msra.mxu0 %v3061_v52 }
 0xa39   : > { %4955 = vmatmul.mubr.msk.f32.vlgmr.msra.gmra.mrb[14].mxu0 %vm1502_vm2, %v2938_v53  ;;  %4962 = vmatprep.subr.mxu0 %v5434_v1 }
 0xa3a   : > { %4964 = vmatprep.mubr.msk.f32.mxu0 %vm5433_vm0, %v5434_v1 }
 0xa3e   : > { %v3093_v54 = vpop.trf.xlu1 }
 0xa3f   : > { %4958 = vmatpush3.msra.mxu1 %v3093_v54 }
 0xa40   : > { %4960 = vmatmul.mubr.msk.f32.vlgmr.msra.gmra.mrb[20].mxu1 %vm1502_vm2, %v2940_v51  ;;  %4967 = vmatprep.subr.mxu1 %v5434_v1 }
 0xa41   : > { %4969 = vmatprep.mubr.msk.f32.mxu1 %vm5433_vm0, %v5434_v1 }
 0xa69   : > { %v3177_v55 = vpop.f32.mrb[12].mxu0 }
 0xa6a   : > { %v4946_v56 = vpop.f32.mrb[13].mxu0  ;;  %v3397_v57 = vsel %vm2544_vm3, %v3177_v55, -inf }
 0xa6b   : > { %3398 = vmax.xlane.f32.xlu0 %v3397_v57 }
 0xadb   : > { %v3249_v59 = vpop.f32.mrb[18].mxu1 }
 0xadc   : > { %v4951_v60 = vpop.f32.mrb[19].mxu1  ;;  %v3400_v61 = vsel %vm2544_vm3, %v3249_v59, -inf }
 0xadd   : > { %3401 = vmax.xlane.f32.xlu1 %v3400_v61 }
 0xaee   : > { %2965 = vrot.lane.b32.xlu1 %v2931_v63, %s5436_s1 }
 0xaf8   : > { %v3399_v3 = vpop.xlane.xlu0 %3398 }
 0xaf9   : > { %v3409_v4 = vsub.f32 %v3177_v55, %v3399_v3 }
 0xafb   : > { %v3413_v26 = vmul.f32 1.442695, %v3409_v4 }
 0xb0c   : > { %v3321_v5 = vpop.f32.mrb[14].mxu0 }
 0xb0d   : > { %v4956_v6 = vpop.f32.mrb[15].mxu0  ;;  %v3403_v7 = vsel %vm2544_vm3, %v3321_v5, -inf }
 0xb0e   : > { %3404 = vmax.xlane.f32.xlu0 %v3403_v7 }
 0xb13   : > { %v3393_v10 = vpop.f32.mrb[20].mxu1 }
 0xb14   : > { %v4961_v11 = vpop.f32.mrb[21].mxu1  ;;  %v3406_v12 = vsel %vm2544_vm3, %v3393_v10, -inf }
 0xb15   : > { %3407 = vmax.xlane.f32.xlu1 %v3406_v12 }
 0xb24   : > { %2963 = vrot.lane.b32.xlu0 %v2926_v13, %s5436_s1  ;;  %s6094_s1 = sld [smem:[#allocation24_spill]] }
 0xb28   : > { %2975 = vrot.lane.b32.xlu0 %v2926_v13, %s5435_s23 }
 0xb2c   : > { %2977 = vrot.lane.b32.xlu0 %v2931_v63, %s5435_s23  ;;  %s6093_s23 = sld [smem:[#allocation23_spill]] }
 0xb32   : > { %v2676_v62 = vld [vmem:[%s6093_s23] sm:$0xff] }
 0xb6a   : > { %v3402_v14 = vpop.xlane.xlu1 %3401 }
 0xb6b   : > { %v3410_v15 = vsub.f32 %v3249_v59, %v3402_v14 }
 0xb6d   : > { %v3415_v16 = vmul.f32 1.442695, %v3410_v15 }
 0xb6e   : > { %v2966_v22 = vpop.permute.xlu1 %2965 }
 0xb6f   : > { %5213 = vpow2.f32 %v3415_v16 }
 0xb79   : > { %v5214_v8 = vpop.eup %5213 }
 0xb7a   : > { %v3424_v17 = vsel %vm2544_vm3, %v5214_v8, 0.0 }
 0xb7b   : > { %3425 = vadd.xlane.f32.xlu0 %v3424_v17 }
 0xb9b   : > { %v3405_v18 = vpop.xlane.xlu0 %3404 }
 0xb9c   : > { %v3411_v19 = vsub.f32 %v3321_v5, %v3405_v18 }
 0xb9e   : > { %v3417_v20 = vmul.f32 1.442695, %v3411_v19 }
 0xb9f   : > { %v2964_v21 = vpop.permute.xlu0 %2963 }
 0xba0   : > { %5215 = vpow2.f32 %v3417_v20  ;;  %3473 = vxpose.xlu1.b32.start [1/2] (short) (narrow) %v2964_v21, 8  ;;  %v2678_v21 = vld [vmem:[%s6093_s23 + $0x10] sm:$0xff] }
 0xba1   : > { %5217 = vpow2.f32 %v3413_v26 }
 0xba2   : > { %v3408_v25 = vpop.xlane.xlu1 %3407 }
 0xba3   : > { %v3412_v27 = vsub.f32 %v3393_v10, %v3408_v25  ;;  %v2976_v34 = vpop.permute.xlu0 %2975 }
 0xba4   : > { %3474 = vxpose.xlu1.b32.end [2/2] (short) (narrow) %v2966_v22, 8  ;;  %v2679_v22 = vld [vmem:[%s6093_s23 + $0x18] sm:$0xff] }
 0xba5   : > { %v3419_v28 = vmul.f32 1.442695, %v3412_v27  ;;  %v5073_v27 = vpack.c.bf16 %v2679_v22, %v2678_v21 }
 0xba7   : > { %5219 = vpow2.f32 %v3419_v28  ;;  %v2978_v35 = vpop.permute.xlu0 %2977 }
 0xbaa   : > { %v5216_v23 = vpop.eup %5215 }
 0xbab   : > { %v3427_v24 = vsel %vm2544_vm3, %v5216_v23, 0.0  ;;  %v5218_v29 = vpop.eup %5217 }
 0xbac   : > { %3428 = vadd.xlane.f32.xlu0 %v3427_v24  ;;  %v3421_v30 = vsel %vm2544_vm3, %v5218_v29, 0.0 }
 0xbb1   : > { %v5220_v32 = vpop.eup %5219 }
 0xbb2   : > { %v3430_v33 = vsel %vm2544_vm3, %v5220_v32, 0.0 }
 0xbc2   : > { %2969 = vrot.lane.b32.xlu1 %v2926_v13, %s5437_s26 }
 0xbc6   : > { %2971 = vrot.lane.b32.xlu1 %v2931_v63, %s5437_s26  ;;  %s6095_s26 = smov 24  }
 0xbd9   : > { %3441 = vxpose.xlu0.b32.start [1/2] (short) (narrow) %v2926_v13, 8 }
 0xbdd   : > { %3442 = vxpose.xlu0.b32.end [2/2] (short) (narrow) %v2931_v63, 8  ;;  %v2677_v63 = vld [vmem:[%s6093_s23 + $0x8] sm:$0xff] }
 0xbde   : > { %v5070_v3 = vpack.c.bf16 %v2677_v63, %v2676_v62  ;;  %v4261_v63 = vld [vmem:[%s6096_s0] sm:$0xff] }
 0xbea   : > { %3422 = vadd.xlane.f32.xlu1 %v3421_v30 }
 0xbee   : > { %3431 = vadd.xlane.f32.xlu1 %v3430_v33 }
 0xc08   : > { %v3426_v36 = vpop.xlane.xlu0 %3425 }
 0xc09   : > { %5221 = vrcp.f32 %v3426_v36 }
 0xc13   : > { %v5222_v37 = vpop.eup %5221 }
 0xc14   : > { %v3438_v38 = vmul.f32 %v5222_v37, %v5214_v8 }
 0xc16   : > { %4968 = vmatpush3.xpose.msk.msra.mxu1 %vm2544_vm3, %v3438_v38 }
 0xc17   : > { %4977 = vmatprep.subr.mxu1 %v5434_v1 }
 0xc20   : > { %v3489_v39 = vpop.trf.xlu1 }
 0xc21   : > { %3537 = vxpose.xlu1.b32.start [1/2] (short) (narrow) %v2976_v34, 8  ;;  %4970 = vmatmul.mubr.msk.f32.vlgmr.msra.gmra.mrb[22].mxu1 %vm2544_vm3, %v3489_v39 }
 0xc22   : > { %4979 = vmatprep.mubr.msk.f32.mxu1 %vm5433_vm0, %v5434_v1 }
 0xc25   : > { %3538 = vxpose.xlu1.b32.end [2/2] (short) (narrow) %v2978_v35, 8 }
 0xc34   : > { %v2970_v40 = vpop.permute.xlu1 %2969 }
 0xc35   : > { %3505 = vxpose.xlu0.b32.start [1/2] (short) (narrow) %v2970_v40, 8 }
 0xc38   : > { %v2972_v41 = vpop.permute.xlu1 %2971 }
 0xc39   : > { %3506 = vxpose.xlu0.b32.end [2/2] (short) (narrow) %v2972_v41, 8  ;;  %v3429_v42 = vpop.xlane.xlu0 %3428 }
 0xc59   : > { %v3457_v47 = vpop.trf.xlu0 }
 0xc77   : > { %v3423_v9 = vpop.xlane.xlu1 %3422 }
 0xc78   : > { %5223 = vrcp.f32 %v3423_v9 }
 0xc79   : > { %5225 = vrcp.f32 %v3429_v42 }
 0xc7b   : > { %v3432_v43 = vpop.xlane.xlu1 %3431 }
 0xc7c   : > { %5227 = vrcp.f32 %v3432_v43 }
 0xc82   : > { %v5224_v44 = vpop.eup %5223 }
 0xc83   : > { %v3437_v45 = vmul.f32 %v5224_v44, %v5218_v29  ;;  %v5226_v46 = vpop.eup %5225 }
 0xc84   : > { %v3439_v49 = vmul.f32 %v5226_v46, %v5216_v23 }
 0xc85   : > { %4963 = vmatpush3.xpose.msk.msra.mxu0 %vm2544_vm3, %v3437_v45 }
 0xc86   : > { %v5228_v48 = vpop.eup %5227  ;;  %4972 = vmatprep.subr.mxu0 %v5434_v1 }
 0xc87   : > { %v3440_v50 = vmul.f32 %v5228_v48, %v5220_v32 }
 0xc88   : > { %4965 = vmatmul.mubr.msk.f32.vlgmr.msra.gmra.mrb[16].mxu0 %vm2544_vm3, %v3457_v47 }
 0xc89   : > { %4973 = vmatpush3.xpose.msk.msra.mxu0 %vm2544_vm3, %v3439_v49  ;;  %4978 = vmatpush3.xpose.msk.msra.mxu1 %vm2544_vm3, %v3440_v50 }
 0xc8a   : > { %4974 = vmatprep.mubr.msk.f32.mxu0 %vm5433_vm0, %v5434_v1  ;;  %5069 = vmatprep.subr.bf16.mxu0 %v5432_v0 }
 0xc8b   : > { %5075 = vmatprep.subr.bf16.mxu1 %v5432_v0 }
 0xca1   : > { %v3553_v51 = vpop.trf.xlu1 }
 0xca2   : > { %4980 = vmatmul.mubr.msk.f32.vlgmr.msra.gmra.mrb[24].mxu1 %vm2544_vm3, %v3553_v51 }
 0xca3   : > { %5001 = vmatprep.mubr.msk.f32.mxu1 %vm5433_vm0, %v5434_v1 }
 0xcb5   : > { %v3521_v52 = vpop.trf.xlu0 }
 0xcb6   : > { %4975 = vmatmul.mubr.msk.f32.vlgmr.msra.gmra.mrb[18].mxu0 %vm2544_vm3, %v3521_v52  ;;  %v4721_v52 = vld [vmem:[%s6094_s1] ss:$0 sm:$0xff] }
 0xcb7   : > { %4990 = vmatprep.mubr.msk.f32.mxu0 %vm5433_vm0, %v5434_v1  ;;  %5071 = vmatpush3.bf16.msra.mxu0 %v5070_v3  ;;  %v4262_v3 = vld [vmem:[%s6096_s0 + $0x8] sm:$0xff] }
 0xcb8   : > { %5072 = vmatprep.subr.bf16.mxu0 %v5432_v0 }
 0xcbb   : > { %5074 = vmatpush3.bf16.msra.mxu0 %v5073_v27 }
 0xcbc   : > { %5081 = vmatprep.subr.bf16.mxu0 %v5432_v0 }
 0xcf4   : > { %v3717_v53 = vpop.f32.mrb[22].mxu1 }
 0xcf5   : > { %v4971_v54 = vpop.f32.mrb[23].mxu1 }
 0xd5b   : > { %v3641_v55 = vpop.f32.mrb[16].mxu0 }
 0xd5c   : > { %3873 = vxpose.xlu0.b32.start.end [1/1] (short) (narrow) %v3641_v55, 8  ;;  %v4966_v56 = vpop.f32.mrb[17].mxu0 }
 0xd60   : > { %3905 = vxpose.xlu0.b32.start.end [1/1] (short) (narrow) %v3717_v53, 8 }
 0xd75   : > { %v3869_v57 = vpop.f32.mrb[24].mxu1 }
 0xd76   : > { %3969 = vxpose.xlu0.b32.start.end [1/1] (short) (narrow) %v3869_v57, 8  ;;  %v4981_v59 = vpop.f32.mrb[25].mxu1 }
 0xd89   : > { %v3793_v60 = vpop.f32.mrb[18].mxu0 }
 0xd8a   : > { %3937 = vxpose.xlu1.b32.start.end [1/1] (short) (narrow) %v3793_v60, 8  ;;  %v4976_v61 = vpop.f32.mrb[19].mxu0 }
 0xddc   : > { %v3889_v4 = vpop.trf.xlu0 }
 0xde0   : > { %v3921_v5 = vpop.trf.xlu0 }
 0xdf6   : > { %v3985_v6 = vpop.trf.xlu0 }
 0xdf7   : > { %v4017_v7 = vcombine.low %v3921_v5, %v3985_v6  ;;  %v4018_v10 = vcombine.high %v3921_v5, %v3985_v6  ;;  %v4264_v5 = vld [vmem:[%s6096_s0 + $0x18] sm:$0xff] }
 0xdf9   : > { %v4025_v14 = vrot.slane %v4017_v7, %v5846_v58  ;;  %v4032_v15 = vrot.slane %v4018_v10, %v5846_v58 }
 0xe0a   : > { %v3953_v11 = vpop.trf.xlu1 }
 0xe0b   : > { %v4001_v12 = vcombine.low %v3889_v4, %v3953_v11  ;;  %v4002_v13 = vcombine.high %v3889_v4, %v3953_v11  ;;  %v5076_v4 = vpack.c.bf16 %v4262_v3, %v4261_v63  ;;  %v4732_v63 = vld [vmem:[%s5606_s17] ss:$0 sm:$0xff] }
 0xe0d   : > { %v4009_v16 = vrot.slane %v4001_v12, %v5846_v58  ;;  %v4016_v8 = vrot.slane %v4002_v13, %v5846_v58  ;;  %5077 = vmatpush3.bf16.msra.mxu1 %v5076_v4 }
 0xe0e   : > { %5078 = vmatprep.subr.bf16.mxu1 %v5432_v0 }
 0xe0f   : > { %v4033_v17 = vcombine.low %v4009_v16, %v4025_v14  ;;  %v4034_v18 = vcombine.high %v4009_v16, %v4025_v14  ;;  %v4049_v19 = vcombine.low %v4016_v8, %v4032_v15  ;;  %v4050_v20 = vcombine.high %v4016_v8, %v4032_v15 }
 0xe11   : > { %v4041_v23 = vrot.slane %v4033_v17, %v5848_v2  ;;  %v4048_v24 = vrot.slane %v4034_v18, %v5848_v2  ;;  %v4057_v25 = vrot.slane %v4049_v19, %v5848_v2  ;;  %v4064_v26 = vrot.slane %v4050_v20, %v5848_v2 }
 0xe13   : > { %v4069_v28 = vcombine.low %v4041_v23, %v4048_v24  ;;  %v4719_v29 = vcombine.high %v4041_v23, %v4048_v24  ;;  %v4085_v30 = vcombine.low %v4057_v25, %v4064_v26  ;;  %v4720_v32 = vcombine.high %v4057_v25, %v4064_v26  ;;  %v4724_v23 = vld [vmem:[#allocation2] ss:$0 sm:$0xff] }
 0xe15   : > { %v4076_v33 = vrot.slane %v4069_v28, %v5846_v58  ;;  %v4084_v34 = vrot.slane %v4719_v29, %v5846_v58  ;;  %v4092_v35 = vrot.slane %v4085_v30, %v5846_v58  ;;  %v4100_v36 = vrot.slane %v4720_v32, %v5846_v58  ;;  %v4725_v29 = vld [vmem:[#allocation4] ss:$0 sm:$0xff] }
 0xe17   : > { %v4102_v37 = vcombine.high %v4076_v33, %v4084_v34  ;;  %v4118_v38 = vcombine.high %v4092_v35, %v4100_v36  ;;  %v4101_v39 = vcombine.low %v4076_v33, %v4084_v34  ;;  %v4117_v40 = vcombine.low %v4092_v35, %v4100_v36  ;;  %v4727_v34 = vld [vmem:[#allocation6] ss:$0 sm:$0xff] }
 0xe19   : > { %v4116_v41 = vrot.slane %v4102_v37, %v5848_v2  ;;  %v4132_v42 = vrot.slane %v4118_v38, %v5848_v2  ;;  %v4109_v9 = vrot.slane %v4101_v39, %v5848_v2  ;;  %v4125_v43 = vrot.slane %v4117_v40, %v5848_v2 }
 0xe1b   : > { %v4135_v44 = vcombine.low %v4116_v41, %v4132_v42  ;;  %v4134_v45 = vcombine.high %v4109_v9, %v4125_v43  ;;  %v4133_v46 = vcombine.low %v4109_v9, %v4125_v43  ;;  %v4136_v58 = vcombine.high %v4116_v41, %v4132_v42 }
 0xe1d   : > { %4142 = vrot.lane.b32.xlu0 %v4135_v44, %s5440_s10  ;;  %4138 = vrot.lane.b32.xlu1 %v4134_v45, %s5441_s16  ;;  %s6097_s10 = sld [smem:[#allocation27_spill]]  ;;  %s6098_s16 = sld [smem:[#allocation25_spill]] }
 0xe21   : > { %4146 = vrot.lane.b32.xlu1 %v4136_v58, %s6095_s26 }
 0xe23   : > { %v4346_v7 = vld [vmem:[%s6097_s10] sm:$0xff]  ;;  %v4347_v10 = vld [vmem:[%s6097_s10 + $0x8] sm:$0xff]  ;;  %v4348_v11 = vld [vmem:[%s6097_s10 + $0x10] sm:$0xff] }
 0xe24   : > { %v5082_v12 = vpack.c.bf16 %v4347_v10, %v4346_v7  ;;  %v4349_v13 = vld [vmem:[%s6097_s10 + $0x18] sm:$0xff]  ;;  %v4350_v15 = vld [vmem:[%s6097_s10 + $0x20] sm:$0xff]  ;;  %v4351_v16 = vld [vmem:[%s6097_s10 + $0x28] sm:$0xff] }
 0xe25   : > { %v5085_v14 = vpack.c.bf16 %v4349_v13, %v4348_v11  ;;  %v5088_v8 = vpack.c.bf16 %v4351_v16, %v4350_v15  ;;  %v4723_v21 = vld [vmem:[%s6098_s16] ss:$0 sm:$0xff]  ;;  %v4352_v26 = vld [vmem:[%s6097_s10 + $0x30] sm:$0xff]  ;;  %v4353_v27 = vld [vmem:[%s6097_s10 + $0x38] sm:$0xff] }
 0xe26   : > { %v5091_v28 = vpack.c.bf16 %v4353_v27, %v4352_v26 }
 0xe8f   : > { %v4139_v47 = vpop.permute.xlu1 %4138  ;;  %v4143_v48 = vpop.permute.xlu0 %4142 }
 0xe90   : > { %v4149_v49 = vsel %vm1502_vm2, %v4133_v46, %v4139_v47  ;;  %v4729_v47 = vld [vmem:[#allocation7] ss:$0 sm:$0xff] }
 0xe91   : > { %v4150_v51 = vsel %vm2544_vm3, %v4149_v49, %v4143_v48  ;;  %v4730_v49 = vld [vmem:[#allocation9] ss:$0 sm:$0xff] }
 0xe93   : > { %v4147_v50 = vpop.permute.xlu1 %4146 }
 0xe94   : > { %v4151_v2 = vsel %vm2546_vm4, %v4150_v51, %v4147_v50 }
 0xe95   : > { %4991 = vmatmul.mubr.msk.f32.vlgmr.msra.gmra.mrb[20].mxu0 %vm1118_vm1, %v4151_v2 }
 0xe96   : > { %5020 = vmatprep.mubr.msk.f32.mxu0 %vm5433_vm0, %v5434_v1  ;;  %5083 = vmatpush3.bf16.msra.mxu0 %v5082_v12 }
 0xe97   : > { %5084 = vmatprep.subr.bf16.mxu0 %v5432_v0 }
 0xe9a   : > { %5086 = vmatpush3.bf16.msra.mxu0 %v5085_v14 }
 0xe9b   : > { %5087 = vmatprep.subr.bf16.mxu0 %v5432_v0 }
 0xe9e   : > { %5089 = vmatpush3.bf16.msra.mxu0 %v5088_v8 }
 0xe9f   : > { %5090 = vmatprep.subr.bf16.mxu0 %v5432_v0 }
 0xea2   : > { %5092 = vmatpush3.bf16.msra.mxu0 %v5091_v28 }
 0xf68   : > { %v4227_v53 = vpop.f32.mrb[20].mxu0 }
 0xf69   : > { %v4228_v54 = vadd.f32 %v4721_v52, %v4227_v53  ;;  %v4992_v55 = vpop.f32.mrb[21].mxu0 }
 0xf6b   : > { %v4231_v56 = vadd.f32 %v4228_v54, %v5911_v31  ;;  %v4263_v31 = vld [vmem:[%s6096_s0 + $0x10] sm:$0xff] }
 0xf6c   : > { %v5079_v6 = vpack.c.bf16 %v4264_v5, %v4263_v31 }
 0xf6d   : > { %v4234_v57 = vsel %vm1118_vm1, %v4231_v56, 0.0 }
 0xf6e   : > { %4235 = vadd.xlane.f32.xlu1 %v4234_v57  ;;  %5080 = vmatpush3.bf16.msra.mxu1 %v5079_v6 }
 0xffb   : > { %v4236_v59 = vpop.xlane.xlu1 %4235 }
 0xffc   : > { %v4237_v60 = vmul.f32 0.03125, %v4236_v59 }
 0xffe   : > { %v4238_v61 = vsub.f32 %v4231_v56, %v4237_v60 }
0x1000   : > { %v4239_v62 = vmul.f32 %v4238_v61, %v4238_v61 }
0x1002   : > { %v4240_v1 = vsel %vm1118_vm1, %v4239_v62, 0.0  ;;  %v4731_v62 = vld [vmem:[%s5601_s6] ss:$0 sm:$0xff] }
0x1003   : > { %4241 = vadd.xlane.f32.xlu0 %v4240_v1 }
0x1090   : > { %v4242_v17 = vpop.xlane.xlu0 %4241 }
0x1091   : > { %v4243_v18 = vmul.f32 0.03125, %v4242_v17 }
0x1093   : > { %v4244_v19 = vadd.f32 1e-05, %v4243_v18 }
0x1095   : > { %5229 = vrsqrt.f32 %v4244_v19 }
0x109f   : > { %v5230_v20 = vpop.eup %5229 }
0x10a0   : > { %v4246_v22 = vmul.f32 %v5230_v20, %v4238_v61 }
0x10a2   : > { %v4253_v24 = vmul.f32 %v4723_v21, %v4246_v22 }
0x10a4   : > { %v4260_v25 = vadd.f32 %v4724_v23, %v4253_v24 }
0x10a6   : > { %5002 = vmatmul.mubr.msk.f32.vlgmr.msra.gmra.mrb[26].mxu1 %vm1118_vm1, %v4260_v25 }
0x1179   : > { %v4341_v30 = vpop.f32.mrb[26].mxu1 }
0x117a   : > { %v4342_v32 = vadd.f32 %v4725_v29, %v4341_v30  ;;  %v5003_v0 = vpop.f32.mrb[27].mxu1 }
0x117c   : > { %v4345_v33 = vmax.f32 %v4342_v32, 0.0 }
0x117e   : > { %5021 = vmatmul.mubr.msk.f32.vlgmr.msra.gmra.mrb[22].mxu0 %vm4361_vm5, %v4345_v33 }
0x1251   : > { %v4431_v35 = vpop.f32.mrb[22].mxu0 }
0x1252   : > { %v4432_v36 = vadd.f32 %v4727_v34, %v4431_v35  ;;  %v5022_v37 = vpop.f32.mrb[23].mxu0 }
0x1254   : > { %v4435_v38 = vadd.f32 %v4432_v36, %v4260_v25 }
0x1256   : > { %v4438_v39 = vsel %vm1118_vm1, %v4435_v38, 0.0 }
0x1257   : > { %4439 = vadd.xlane.f32.xlu1 %v4438_v39 }
0x12e4   : > { %v4440_v40 = vpop.xlane.xlu1 %4439 }
0x12e5   : > { %v4441_v41 = vmul.f32 0.03125, %v4440_v40 }
0x12e7   : > { %v4442_v42 = vsub.f32 %v4435_v38, %v4441_v41 }
0x12e9   : > { %v4443_v9 = vmul.f32 %v4442_v42, %v4442_v42 }
0x12eb   : > { %v4444_v43 = vsel %vm1118_vm1, %v4443_v9, 0.0 }
0x12ec   : > { %4445 = vadd.xlane.f32.xlu0 %v4444_v43 }
0x1379   : > { %v4446_v44 = vpop.xlane.xlu0 %4445 }
0x137a   : > { %v4447_v45 = vmul.f32 0.03125, %v4446_v44 }
0x137c   : > { %v4448_v46 = vadd.f32 1e-05, %v4447_v45 }
0x137e   : > { %5231 = vrsqrt.f32 %v4448_v46 }
0x1388   : > { %v5232_v58 = vpop.eup %5231 }
0x1389   : > { %v4450_v48 = vmul.f32 %v5232_v58, %v4442_v42 }
0x138b   : > { %v4457_v50 = vmul.f32 %v4729_v47, %v4450_v48 }
0x138d   : > { %v4464_v51 = vadd.f32 %v4730_v49, %v4457_v50 }
0x138f   : > { %v4467_v2 = vsel %vm1118_vm1, %v4464_v51, 0.0 }
0x1390   : > { %4468 = vadd.xlane.f32.xlu1 %v4467_v2 }
0x141d   : > { %v4469_v52 = vpop.xlane.xlu1 %4468 }
0x141e   : > { %v4470_v53 = vmul.f32 0.03125, %v4469_v52 }
0x1420   : > { %v4471_v54 = vsub.f32 %v4464_v51, %v4470_v53 }
0x1422   : > { %v4472_v55 = vmul.f32 %v4471_v54, %v4471_v54 }
0x1424   : > { %v4473_v56 = vsel %vm1118_vm1, %v4472_v55, 0.0 }
0x1425   : > { %4474 = vadd.xlane.f32.xlu0 %v4473_v56 }
0x14b2   : > { %v4475_v57 = vpop.xlane.xlu0 %4474 }
0x14b3   : > { %v4476_v59 = vmul.f32 0.03125, %v4475_v57 }
0x14b5   : > { %v4477_v60 = vadd.f32 1e-05, %v4476_v59 }
0x14b7   : > { %5233 = vrsqrt.f32 %v4477_v60 }
0x14c1   : > { %v5234_v61 = vpop.eup %5233 }
0x14c2   : > { %v4479_v1 = vmul.f32 %v5234_v61, %v4471_v54 }
0x14c4   : > { %v4486_v3 = vmul.f32 %v4731_v62, %v4479_v1 }
0x14c6   : > { %v4493_v4 = vadd.f32 %v4732_v63, %v4486_v3 }
0x14c8   : > { %4494 = vst.msk [vmem:[%s1084_s18] sm:$0xff] %vm1118_vm1, %v4493_v4 }
0x14c9 PF: > { %s78_s28 = sadd.s32 1, %s5393_s28  }
0x14ca   : > { %p75_p1 = scmp.ge.s32.totalorder %s78_s28, 4  }
0x14cc   :  { %77 = sbr.rel (!%p75_p1) target bundleno = 56 (0x38), region = 237 }
0x14d3   :  { %4514 = vsyncpa [#allocation3], 1 }
0x14d4   :  { %4516 = vsyncpa [#allocation3 + $0x1], 1 }
0x14d5   :  { %4517 = vsyncpa [#allocation5], 1 }
0x14d6   :  { %4518 = vsyncpa [#allocation8], 1 }

// kernel: transformer_forward.6
= control target key start
LH: loop header
LB: loop body
LE: loop exit
PB: predicated region body
PF: predicated region fallthrough
CT: control target
= control target key end

     0   :  { %s5614_s6 = smov 1   ;;  %s5615_s10 = smov 2   ;;  %s6299_s0 = inlined_call_operand.smem [shape: u32[33], index: -1, kind: input, shape index: {}] }
   0x1   :  { %s5672_s5 = sld [smem:[%s6299_s0]]   ;;  %s5616_s14 = smov 3  }
   0x2   :  { %s5677_s9 = sld [smem:[%s6299_s0 + %s5614_s6]]   ;;  %s5617_s18 = smov 4  }
   0x3   :  { %s5682_s13 = sld [smem:[%s6299_s0 + %s5615_s10]]   ;;  %s5618_s22 = smov 5  }
   0x4   :  { %s5687_s17 = sld [smem:[%s6299_s0 + %s5616_s14]]   ;;  %s5619_s26 = smov 6  }
   0x5   :  { %s5692_s21 = sld [smem:[%s6299_s0 + %s5617_s18]]   ;;  %s5620_s30 = smov 7  }
   0x6   :  { %s5697_s25 = sld [smem:[%s6299_s0 + %s5618_s22]]   ;;  %s5621_s4 = smov 8  }
   0x7   :  { %s5702_s29 = sld [smem:[%s6299_s0 + %s5619_s26]]   ;;  %s5622_s10 = smov 9  }
   0x8   :  { %s5707_s3 = sld [smem:[%s6299_s0 + %s5620_s30]]   ;;  %s5623_s15 = smov 10  }
   0x9   :  { %6313 = sst [smem:[#allocation21_spill]] %s5682_s13  ;;  %s5624_s20 = smov 11  }
   0xa   :  { %6314 = sst [smem:[#allocation22_spill]] %s5687_s17  ;;  %s5625_s26 = smov 12  }
   0xb   :  { %s5712_s8 = sld [smem:[%s6299_s0 + %s5621_s4]]   ;;  %s5626_s1 = smov 13  }
   0xc   :  { %s5717_s14 = sld [smem:[%s6299_s0 + %s5622_s10]]   ;;  %s5627_s7 = smov 14  }
   0xd   :  { %s5722_s19 = sld [smem:[%s6299_s0 + %s5623_s15]]   ;;  %s5628_s15 = smov 15  }
   0xe   :  { %s5727_s24 = sld [smem:[%s6299_s0 + %s5624_s20]]   ;;  %s5629_s22 = smov 16  }
   0xf   :  { %s5732_s30 = sld [smem:[%s6299_s0 + %s5625_s26]]   ;;  %s5630_s28 = smov 17  }
  0x10   :  { %s5737_s6 = sld [smem:[%s6299_s0 + %s5626_s1]]  }
  0x11   :  { %s5742_s12 = sld [smem:[%s6299_s0 + %s5627_s7]]   ;;  %s5631_s7 = smov 18  }
  0x12   :  { %s5747_s20 = sld [smem:[%s6299_s0 + %s5628_s15]]   ;;  %s5632_s15 = smov 19  }
  0x13   :  { %6315 = sst [smem:[#allocation23_spill]] %s5722_s19 }
  0x14   :  { %6316 = sst [smem:[#allocation24_spill]] %s5727_s24 }
  0x15   :  { %6317 = sst [smem:[#allocation25_spill]] %s5732_s30 }
  0x16   :  { %6318 = sst [smem:[#allocation26_spill]] %s5737_s6 }
  0x17   :  { %6319 = sst [smem:[#allocation27_spill]] %s5742_s12 }
  0x18   :  { %6320 = sst [smem:[#allocation28_spill]] %s5747_s20 }
  0x19   :  { %s5752_s27 = sld [smem:[%s6299_s0 + %s5629_s22]]   ;;  %s5633_s22 = smov 20  }
  0x1a   :  { %s5757_s4 = sld [smem:[%s6299_s0 + %s5630_s28]]   ;;  %s5634_s28 = smov 21  }
  0x1b   :  { %s5762_s6 = sld [smem:[%s6299_s0 + %s5631_s7]]   ;;  %s5635_s7 = smov 22  }
  0x1c   :  { %s5767_s20 = sld [smem:[%s6299_s0 + %s5632_s15]]   ;;  %s5636_s15 = smov 23  }
  0x1d   :  { %s5772_s30 = sld [smem:[%s6299_s0 + %s5633_s22]]   ;;  %s5637_s22 = smov 24  }
  0x1e   :  { %s5777_s12 = sld [smem:[%s6299_s0 + %s5634_s28]]   ;;  %s5638_s28 = smov 25  }
  0x1f   :  { %6321 = sst [smem:[#allocation29_spill]] %s5752_s27 }
  0x20   :  { %s5787_s24 = sld [smem:[%s6299_s0 + %s5636_s15]]   ;;  %s5640_s15 = smov 27  }
  0x21   :  { %6322 = sst [smem:[#allocation30_spill]] %s5762_s6 }
  0x22   :  { %s5782_s6 = sld [smem:[%s6299_s0 + %s5635_s7]]   ;;  %s5639_s7 = smov 26  }
  0x23   :  { %6323 = sst [smem:[#allocation31_spill]] %s5772_s30 }
  0x24   :  { %s5792_s30 = sld [smem:[%s6299_s0 + %s5637_s22]]   ;;  %s5641_s22 = smov 28  }
  0x25   :  { %s5797_s17 = sld [smem:[%s6299_s0 + %s5638_s28]]   ;;  %s5642_s28 = smov 29  }
  0x26   :  { %s5802_s13 = sld [smem:[%s6299_s0 + %s5639_s7]]   ;;  %s5643_s7 = smov 32  }
  0x27   :  { %s5807_s27 = sld [smem:[%s6299_s0 + %s5640_s15]]  }
  0x28   :  { %s5817_s19 = sld [smem:[%s6299_s0 + %s5642_s28]]  }
  0x2a   :  { %6324 = sst [smem:[#allocation32_spill]] %s5792_s30 }
  0x2b   :  { %s5812_s30 = sld [smem:[%s6299_s0 + %s5641_s22]]  }
  0x2c   :  { %6325 = sst [smem:[#allocation33_spill]] %s5802_s13 }
  0x2d   :  { %s5822_s13 = sld [smem:[%s6299_s0 + %s5643_s7]]  }
  0x2e   :  { %70 = vsyncpa [#allocation3], 0 }
  0x2f   :  { %71 = vsyncpa [#allocation5], 0 }
  0x30   :  { %72 = vsyncpa [#allocation8], 0 }
  0x31   :  { %73 = vsyncpa [#allocation11], 0 }
  0x32   :  { %74 = vsyncpa [#allocation14], 0  ;;  %s5824_s15 = smov 0  }
  0x33 LB: > { %s5644_s16 = smov [#allocation4]   ;;  %s5830_s22 = sadd.s32 4294967295, %s5612_s15   ;;  %s5612_s15 = sphi %s5824_s15, %s80_s15  }
  0x34   : > { %s867_s18 = sshll.u32 %s5644_s16, 4  ;;  %p4713_p0 = scmp.ge.s32.totalorder %s5612_s15, 1  ;;  %s5835_s18 = int_to_ptr.vmem [resolvable:$true] %s867_s18 }
  0x35   : > { %p798_p1 = scmp.lt.s32.totalorder %s5612_s15, 3  ;;  %p6307_p2 = scmp.eq.s32.totalorder %s5830_s22, 0 }
  0x36   : > { %s5645_s23 = smov [#allocation7]   ;;  %s5646_s28 = smov [#allocation10]  }
  0x37   : > { %p5837_p3 = pnand %p4713_p0, %p798_p1  ;;  %s892_s26 = sshll.u32 %s5645_s23, 4  ;;  %s5843_s26 = int_to_ptr.vmem [resolvable:$true] %s892_s26 }
  0x38   : > { %s917_s1 = sshll.u32 %s5646_s28, 4  ;;  %s5647_s7 = smov [#allocation13]   ;;  %s5851_s1 = int_to_ptr.vmem [resolvable:$true] %s917_s1 }
  0x39   : > { %s6326_s0 = scalar_select %p5837_p3, 1, 0 }
  0x3a   : > { %p5192_p4 = pneg %p5837_p3  ;;  %s942_s10 = sshll.u32 %s5647_s7, 4  ;;  %s5853_s10 = int_to_ptr.vmem [resolvable:$true] %s942_s10 }
  0x3b   : > { %s5334_s11 = scalar_lea.hbm %s5767_s20, 16 }
  0x3c   : > { %p5847_p5 = pnand %p6307_p2, %p5192_p4  ;;  %p5335_p6 = scmp.ne.s32.totalorder %s5767_s20, %s5334_s11 }
  0x3d   : > { %p5341_p10 = scmp.lt.u32.totalorder %s5334_s11, %s5767_s20 }
  0x3e   : > { %p5859_p7 = pneg %p5847_p5 }
  0x40   : > { %p5337_p8 = pnand %p5859_p7, %p5335_p6 }
  0x42   : > { %p5338_p9 = pneg %p5337_p8 }
  0x44   : > { %p5343_p11 = pnand %p5341_p10, %p5338_p9 }
  0x46   : > { %5346 = shalt.err (!%p5343_p11)
}
  0x47   : > { %s5347_s23 = scalar_lea.vmem %s5835_s18, 16  ;;  %s5354_s28 = scalar_lea.vmem %s5835_s18, 32 }
  0x48   : > { %p5348_p12 = scmp.ne.s32.totalorder %s5835_s18, %s5347_s23  ;;  %p5355_p1 = scmp.lt.s32.totalorder %s5835_s18, %s5835_s18 }
  0x49   : > { %p5356_p4 = scmp.lt.s32.totalorder %s5354_s28, %s5347_s23 }
  0x4a   : > { %p5350_p13 = pnand %p5348_p12, %p5859_p7 }
  0x4b   : > { %p5357_p2 = por %p5356_p4, %p5355_p1 }
  0x4c   : > { %p5351_p0 = pneg %p5350_p13 }
  0x4e   : > { %p5358_p6 = pnand %p5357_p2, %p5351_p0 }
  0x50   : > { %5361 = shalt.err (!%p5358_p6)
}
  0x51   : > { %5198 = dma.hbm_to_vmem [thread:$0]  (!%p5847_p5), %s5767_s20, 16, %s5835_s18, [#allocation5]  }
  0x52   : > { %s5362_s7 = scalar_lea.hbm %s5782_s6, 16 }
  0x53   : > { %p5363_p8 = scmp.ne.s32.totalorder %s5782_s6, %s5362_s7  ;;  %p5369_p11 = scmp.lt.u32.totalorder %s5362_s7, %s5782_s6 }
  0x55   : > { %p5365_p9 = pnand %p5363_p8, %p5859_p7 }
  0x57   : > { %p5366_p10 = pneg %p5365_p9 }
  0x59   : > { %p5371_p12 = pnand %p5369_p11, %p5366_p10 }
  0x5b   : > { %5374 = shalt.err (!%p5371_p12)
}
  0x5c   : > { %s5375_s11 = scalar_lea.vmem %s5843_s26, 16  ;;  %s5382_s23 = scalar_lea.vmem %s5843_s26, 32 }
  0x5d   : > { %p5376_p2 = scmp.ne.s32.totalorder %s5843_s26, %s5375_s11  ;;  %p5383_p1 = scmp.lt.s32.totalorder %s5843_s26, %s5843_s26 }
  0x5e   : > { %p5384_p4 = scmp.lt.s32.totalorder %s5382_s23, %s5375_s11 }
  0x5f   : > { %p5378_p13 = pnand %p5376_p2, %p5859_p7 }
  0x60   : > { %p5385_p6 = por %p5384_p4, %p5383_p1 }
  0x61   : > { %p5379_p0 = pneg %p5378_p13 }
  0x63   : > { %p5386_p8 = pnand %p5385_p6, %p5379_p0 }
  0x65   : > { %5389 = shalt.err (!%p5386_p8)
}
  0x66   : > { %5204 = dma.hbm_to_vmem [thread:$0]  (!%p5847_p5), %s5782_s6, 16, %s5843_s26, [#allocation8]  }
  0x67   : > { %s5390_s18 = scalar_lea.hbm %s5797_s17, 16 }
  0x68   : > { %p5391_p9 = scmp.ne.s32.totalorder %s5797_s17, %s5390_s18  ;;  %p5397_p12 = scmp.lt.u32.totalorder %s5390_s18, %s5797_s17 }
  0x6a   : > { %p5393_p10 = pnand %p5391_p9, %p5859_p7 }
  0x6c   : > { %p5394_p11 = pneg %p5393_p10 }
  0x6e   : > { %p5399_p2 = pnand %p5397_p12, %p5394_p11 }
  0x70   : > { %5402 = shalt.err (!%p5399_p2)
}
  0x71   : > { %s5403_s28 = scalar_lea.vmem %s5851_s1, 16  ;;  %s5410_s7 = scalar_lea.vmem %s5851_s1, 32 }
  0x72   : > { %p5404_p13 = scmp.ne.s32.totalorder %s5851_s1, %s5403_s28  ;;  %p5411_p4 = scmp.lt.s32.totalorder %s5851_s1, %s5851_s1 }
  0x73   : > { %p5412_p6 = scmp.lt.s32.totalorder %s5410_s7, %s5403_s28 }
  0x74   : > { %p5406_p0 = pnand %p5404_p13, %p5859_p7 }
  0x75   : > { %p5413_p8 = por %p5412_p6, %p5411_p4 }
  0x76   : > { %p5407_p1 = pneg %p5406_p0 }
  0x78   : > { %p5414_p9 = pnand %p5413_p8, %p5407_p1 }
  0x7a   : > { %5417 = shalt.err (!%p5414_p9)
}
  0x7b   : > { %5210 = dma.hbm_to_vmem [thread:$0]  (!%p5847_p5), %s5797_s17, 16, %s5851_s1, [#allocation11]  }
  0x7c   : > { %s5418_s26 = scalar_lea.hbm %s5812_s30, 16 }
  0x7d   : > { %p5419_p10 = scmp.ne.s32.totalorder %s5812_s30, %s5418_s26  ;;  %p5425_p2 = scmp.lt.u32.totalorder %s5418_s26, %s5812_s30 }
  0x7f   : > { %p5421_p11 = pnand %p5419_p10, %p5859_p7 }
  0x81   : > { %p5422_p12 = pneg %p5421_p11 }
  0x83   : > { %p5427_p13 = pnand %p5425_p2, %p5422_p12 }
  0x85   : > { %5430 = shalt.err (!%p5427_p13)
}
  0x86   : > { %s5431_s11 = scalar_lea.vmem %s5853_s10, 16  ;;  %s5438_s23 = scalar_lea.vmem %s5853_s10, 32 }
  0x87   : > { %p5432_p0 = scmp.ne.s32.totalorder %s5853_s10, %s5431_s11  ;;  %p5439_p6 = scmp.lt.s32.totalorder %s5853_s10, %s5853_s10 }
  0x88   : > { %p5440_p8 = scmp.lt.s32.totalorder %s5438_s23, %s5431_s11 }
  0x89   : > { %p5434_p1 = pnand %p5432_p0, %p5859_p7 }
  0x8a   : > { %p5441_p9 = por %p5440_p8, %p5439_p6 }
  0x8b   : > { %p5435_p4 = pneg %p5434_p1 }
  0x8d   : > { %p5442_p10 = pnand %p5441_p9, %p5435_p4 }
  0x8f   : > { %5445 = shalt.err (!%p5442_p10)
}
  0x90   : > { %5216 = dma.hbm_to_vmem [thread:$0]  (!%p5847_p5), %s5812_s30, 16, %s5853_s10, [#allocation14]  }
  0x91   : > { %s5648_s1 = smov [#allocation2]   ;;  %s5649_s28 = smov [#allocation6]  }
  0x92   : > { %s853_s18 = sshll.u32 %s5648_s1, 4  ;;  %s881_s7 = sshll.u32 %s5649_s28, 4  ;;  %s854_s18 = int_to_ptr.vmem [resolvable:$true] %s853_s18  ;;  %s882_s7 = int_to_ptr.vmem [resolvable:$true] %s881_s7 }
  0x93   : > { %s5446_s26 = scalar_lea.hbm %s5757_s4, 16 }
  0x94   : > { %p5447_p11 = scmp.ne.s32.totalorder %s5757_s4, %s5446_s26  ;;  %p5453_p13 = scmp.lt.u32.totalorder %s5446_s26, %s5757_s4 }
  0x96   : > { %p5449_p12 = pnand %p5447_p11, %p5859_p7 }
  0x98   : > { %p5450_p2 = pneg %p5449_p12 }
  0x9a   : > { %p5455_p0 = pnand %p5453_p13, %p5450_p2 }
  0x9c   : > { %5458 = shalt.err (!%p5455_p0)
}
  0x9d   : > { %s5459_s11 = scalar_lea.vmem %s854_s18, 16  ;;  %s5466_s10 = scalar_lea.vmem %s854_s18, 32 }
  0x9e   : > { %p5460_p1 = scmp.ne.s32.totalorder %s854_s18, %s5459_s11  ;;  %p5467_p8 = scmp.lt.s32.totalorder %s854_s18, %s854_s18 }
  0x9f   : > { %p5468_p9 = scmp.lt.s32.totalorder %s5466_s10, %s5459_s11 }
  0xa0   : > { %p5462_p4 = pnand %p5460_p1, %p5859_p7 }
  0xa1   : > { %p5469_p10 = por %p5468_p9, %p5467_p8 }
  0xa2   : > { %p5463_p6 = pneg %p5462_p4 }
  0xa4   : > { %p5470_p3 = pnand %p5469_p10, %p5463_p6 }
  0xa6   : > { %5473 = shalt.err (!%p5470_p3)
}
  0xa7   : > { %5195 = dma.hbm_to_vmem [thread:$0]  (!%p5847_p5), %s5757_s4, 16, %s854_s18, [#allocation3]  }
  0xa8   : > { %s5474_s23 = scalar_lea.hbm %s5777_s12, 16 }
  0xa9   : > { %p5475_p11 = scmp.ne.s32.totalorder %s5777_s12, %s5474_s23  ;;  %p5481_p13 = scmp.lt.u32.totalorder %s5474_s23, %s5777_s12 }
  0xab   : > { %p5477_p12 = pnand %p5475_p11, %p5859_p7 }
  0xad   : > { %p5478_p2 = pneg %p5477_p12 }
  0xaf   : > { %p5483_p0 = pnand %p5481_p13, %p5478_p2 }
  0xb1   : > { %5486 = shalt.err (!%p5483_p0)
}
  0xb2   : > { %s5487_s1 = scalar_lea.vmem %s882_s7, 16  ;;  %s5494_s28 = scalar_lea.vmem %s882_s7, 32 }
  0xb3   : > { %p5488_p3 = scmp.ne.s32.totalorder %s882_s7, %s5487_s1  ;;  %p5495_p6 = scmp.lt.s32.totalorder %s882_s7, %s882_s7 }
  0xb4   : > { %p5496_p8 = scmp.lt.s32.totalorder %s5494_s28, %s5487_s1 }
  0xb5   : > { %p5490_p1 = pnand %p5488_p3, %p5859_p7 }
  0xb6   : > { %p5497_p9 = por %p5496_p8, %p5495_p6 }
  0xb7   : > { %p5491_p4 = pneg %p5490_p1 }
  0xb9   : > { %p5498_p10 = pnand %p5497_p9, %p5491_p4 }
  0xbb   : > { %5501 = shalt.err (!%p5498_p10)
}
  0xbc   : > { %5201 = dma.hbm_to_vmem [thread:$0]  (!%p5847_p5), %s5777_s12, 16, %s882_s7, [#allocation5]  }
  0xbd   : > { %s5650_s18 = smov [#allocation9]   ;;  %s5651_s11 = smov [#allocation12]  }
  0xbe   : > { %s903_s26 = sshll.u32 %s5650_s18, 4  ;;  %s931_s10 = sshll.u32 %s5651_s11, 4  ;;  %s904_s26 = int_to_ptr.vmem [resolvable:$true] %s903_s26  ;;  %s932_s10 = int_to_ptr.vmem [resolvable:$true] %s931_s10 }
  0xbf   : > { %s5502_s23 = scalar_lea.hbm %s5787_s24, 16 }
  0xc0   : > { %p5503_p11 = scmp.ne.s32.totalorder %s5787_s24, %s5502_s23  ;;  %p5509_p13 = scmp.lt.u32.totalorder %s5502_s23, %s5787_s24 }
  0xc2   : > { %p5505_p12 = pnand %p5503_p11, %p5859_p7 }
  0xc4   : > { %p5506_p2 = pneg %p5505_p12 }
  0xc6   : > { %p5511_p0 = pnand %p5509_p13, %p5506_p2 }
  0xc8   : > { %5514 = shalt.err (!%p5511_p0)
}
  0xc9   : > { %s5515_s1 = scalar_lea.vmem %s904_s26, 16  ;;  %s5522_s7 = scalar_lea.vmem %s904_s26, 32 }
  0xca   : > { %p5516_p3 = scmp.ne.s32.totalorder %s904_s26, %s5515_s1  ;;  %p5523_p6 = scmp.lt.s32.totalorder %s904_s26, %s904_s26 }
  0xcb   : > { %p5524_p8 = scmp.lt.s32.totalorder %s5522_s7, %s5515_s1 }
  0xcc   : > { %p5518_p1 = pnand %p5516_p3, %p5859_p7 }
  0xcd   : > { %p5525_p9 = por %p5524_p8, %p5523_p6 }
  0xce   : > { %p5519_p4 = pneg %p5518_p1 }
  0xd0   : > { %p5526_p10 = pnand %p5525_p9, %p5519_p4 }
  0xd2   : > { %5529 = shalt.err (!%p5526_p10)
}
  0xd3   : > { %5207 = dma.hbm_to_vmem [thread:$0]  (!%p5847_p5), %s5787_s24, 16, %s904_s26, [#allocation8]  }
  0xd4   : > { %s5530_s28 = scalar_lea.hbm %s5807_s27, 16 }
  0xd5   : > { %p5531_p11 = scmp.ne.s32.totalorder %s5807_s27, %s5530_s28  ;;  %p5537_p13 = scmp.lt.u32.totalorder %s5530_s28, %s5807_s27 }
  0xd7   : > { %p5533_p12 = pnand %p5531_p11, %p5859_p7 }
  0xd9   : > { %p5534_p2 = pneg %p5533_p12 }
  0xdb   : > { %p5539_p0 = pnand %p5537_p13, %p5534_p2 }
  0xdd   : > { %5542 = shalt.err (!%p5539_p0)
}
  0xde   : > { %s5543_s18 = scalar_lea.vmem %s932_s10, 16  ;;  %s5550_s11 = scalar_lea.vmem %s932_s10, 32 }
  0xdf   : > { %p5544_p3 = scmp.ne.s32.totalorder %s932_s10, %s5543_s18  ;;  %p5551_p6 = scmp.lt.s32.totalorder %s932_s10, %s932_s10 }
  0xe0   : > { %p5552_p8 = scmp.lt.s32.totalorder %s5550_s11, %s5543_s18 }
  0xe1   : > { %p5546_p1 = pnand %p5544_p3, %p5859_p7 }
  0xe2   : > { %p5553_p9 = por %p5552_p8, %p5551_p6 }
  0xe3   : > { %p5547_p4 = pneg %p5546_p1 }
  0xe5   : > { %p5554_p10 = pnand %p5553_p9, %p5547_p4 }
  0xe7   : > { %5557 = shalt.err (!%p5554_p10)
}
  0xe8   : > { %5213 = dma.hbm_to_vmem [thread:$0]  (!%p5847_p5), %s5807_s27, 16, %s932_s10, [#allocation11]  }
  0xe9   : > { %s5652_s26 = smov [#allocation15]   ;;  %s5558_s1 = scalar_lea.hbm %s5817_s19, 16 }
  0xea   : > { %s953_s23 = sshll.u32 %s5652_s26, 4  ;;  %p5559_p11 = scmp.ne.s32.totalorder %s5817_s19, %s5558_s1  ;;  %s954_s23 = int_to_ptr.vmem [resolvable:$true] %s953_s23 }
  0xeb   : > { %p5565_p13 = scmp.lt.u32.totalorder %s5558_s1, %s5817_s19 }
  0xec   : > { %p5561_p12 = pnand %p5559_p11, %p5859_p7 }
  0xee   : > { %p5562_p2 = pneg %p5561_p12 }
  0xf0   : > { %p5567_p0 = pnand %p5565_p13, %p5562_p2 }
  0xf2   : > { %5570 = shalt.err (!%p5567_p0)
}
  0xf3   : > { %s5571_s7 = scalar_lea.vmem %s954_s23, 16  ;;  %s5578_s28 = scalar_lea.vmem %s954_s23, 32 }
  0xf4   : > { %p5572_p3 = scmp.ne.s32.totalorder %s954_s23, %s5571_s7  ;;  %p5579_p6 = scmp.lt.s32.totalorder %s954_s23, %s954_s23 }
  0xf5   : > { %p5580_p8 = scmp.lt.s32.totalorder %s5578_s28, %s5571_s7 }
  0xf6   : > { %p5574_p1 = pnand %p5572_p3, %p5859_p7 }
  0xf7   : > { %p5581_p9 = por %p5580_p8, %p5579_p6 }
  0xf8   : > { %p5575_p4 = pneg %p5574_p1 }
  0xfa   : > { %p5582_p10 = pnand %p5581_p9, %p5575_p4 }
  0xfc   : > { %5585 = shalt.err (!%p5582_p10)
}
  0xfd   : > { %5219 = dma.hbm_to_vmem [thread:$0]  (!%p5847_p5), %s5817_s19, 16, %s954_s23, [#allocation14]  }
  0xfe   : > { %p6329_p11 = scmp.ne.s32.totalorder %s6326_s0, 0 }
  0xff   : > { %p6330_p12 = scmp.eq.s32.totalorder (!%p6329_p11), %s5830_s22, 0 }
 0x100   : > { %995 = sbr.rel (%p6329_p11) target bundleno = 5096 (0x13e8), region = 148 }
 0x107   : > { %5591 = dma.done.wait (%p6330_p12), [#allocation3], 16   ;;  %p6331_p2 = pmov %p6330_p12 }
 0x109   : > { %5593 = vsyncadd (%p6331_p2), [#allocation3], 4294967280  ;;  %p6332_p7 = pmov %p6331_p2 }
 0x10a   : > { %p6333_p13 = pmov %p6331_p2 }
 0x10b   : > { %5595 = dma.done.wait (%p6332_p7), [#allocation5], 32  }
 0x10c   : > { %5597 = vsyncadd (%p6333_p13), [#allocation5], 4294967264  ;;  %p6334_p0 = pmov %p6331_p2 }
 0x10e   : > { %5599 = dma.done.wait (%p6334_p0), [#allocation8], 32   ;;  %p6335_p5 = pmov %p6334_p0 }
 0x10f   : > { %p6336_p3 = pmov %p6334_p0 }
 0x110   : > { %5601 = vsyncadd (%p6335_p5), [#allocation8], 4294967264 }
 0x111   : > { %5603 = dma.done.wait (%p6336_p3), [#allocation11], 32   ;;  %p6337_p1 = pmov %p6334_p0 }
 0x112   : > { %p6338_p4 = pmov %p6334_p0 }
 0x113   : > { %5605 = vsyncadd (%p6337_p1), [#allocation11], 4294967264 }
 0x114   : > { %5607 = dma.done.wait (%p6338_p4), [#allocation14], 32   ;;  %p6339_p6 = pmov %p6334_p0 }
 0x115   : > { %p1117_p8 = scmp.lt.s32.totalorder %s5830_s22, 1  ;;  %v5653_v0 = vmov 0.0|0.0   ;;  %vm5654_vm0 = vmmov 0   ;;  %v5655_v1 = vmov 0.0   ;;  %v1142_v2 = vld [vmem:[%s5692_s21] sm:$0xff]  ;;  %v1143_v3 = vld [vmem:[%s5692_s21 + $0x8] sm:$0xff] }
 0x116   : > { %5609 = vsyncadd (%p6339_p6), [#allocation14], 4294967264  ;;  %5086 = vmatprep.subr.bf16.mxu1 %v5653_v0  ;;  %4896 = vmatprep.mubr.msk.f32.mxu1 %vm5654_vm0, %v5655_v1  ;;  %v1144_v4 = vld [vmem:[%s5692_s21 + $0x10] sm:$0xff]  ;;  %v5087_v5 = vpack.c.bf16 %v1143_v3, %v1142_v2  ;;  %v1145_v6 = vld [vmem:[%s5692_s21 + $0x18] sm:$0xff]  ;;  %vm1168_vm1 = vcmask 261120   ;;  %s5656_s16 = smov 104  }
 0x117   : > { %s6358_s22 = smov (!%p1117_p8, %s5830_s22), 1  ;;  %5098 = vmatprep.subr.bf16.mxu0 %v5653_v0  ;;  %4918 = vmatprep.mubr.msk.f32.mxu0 %vm5654_vm0, %v5655_v1  ;;  %v5090_v7 = vpack.c.bf16 %v1145_v6, %v1144_v4  ;;  %v6018_v9 = vld [vmem:[%s5677_s9] sm:$0xff]  ;;  %v1148_v11 = vld [vmem:[%s5702_s29 + $0x8] sm:$0xff]  ;;  %v1149_v14 = vld [vmem:[%s5702_s29 + $0x10] sm:$0xff]  ;;  %s5657_s10 = smov 120   ;;  %vm1552_vm2 = vcmask 64512  }
 0x118   : > { %s6309_s0 = sshll.u32 %s6358_s22, 3  ;;  %5088 = vmatpush3.bf16.msra.mxu1 %v5087_v5  ;;  %v1147_v10 = vld [vmem:[%s5702_s29] sm:$0xff]  ;;  %v1150_v15 = vld [vmem:[%s5702_s29 + $0x18] sm:$0xff]  ;;  %s5658_s18 = smov 112   ;;  %v1153_v26 = vld [vmem:[%s5712_s8 + $0x8] sm:$0xff]  ;;  %vm2594_vm3 = vcmask 130048  }
 0x119   : > { %s1120_s2 = scalar_lea.vmem %s5672_s5, %s6309_s0  ;;  %5089 = vmatprep.subr.bf16.mxu1 %v5653_v0  ;;  %v5093_v13 = vpack.c.bf16 %v1148_v11, %v1147_v10  ;;  %v5096_v16 = vpack.c.bf16 %v1150_v15, %v1149_v14  ;;  %v4742_v19 = vld [vmem:[%s5707_s3] ss:$0 sm:$0xff]  ;;  %v1154_v27 = vld [vmem:[%s5712_s8 + $0x10] sm:$0xff]  ;;  %v1155_v29 = vld [vmem:[%s5712_s8 + $0x18] sm:$0xff]  ;;  %s6340_s11 = sld [smem:[#allocation23_spill]]  ;;  %vm2596_vm4 = vcmask 195584  }
 0x11a   : > { %v6015_v8 = vld [vmem:[%s1120_s2] sm:$0xff]  ;;  %v5102_v30 = vpack.c.bf16 %v1155_v29, %v1154_v27  ;;  %s6312_s26 = smov 16   ;;  %s6341_s23 = sld [smem:[#allocation29_spill]]  ;;  %vm4411_vm5 = vcmask 523264  }
 0x11b   : > { %v1141_v12 = vadd.f32 %v6018_v9, %v6015_v8  ;;  %v4740_v23 = vld [vmem:[%s5697_s25] ss:$0 sm:$0xff]  ;;  %s6311_s1 = smov 8   ;;  %s6310_s7 = smov 24  }
 0x11c   : > { %5091 = vmatpush3.bf16.msra.mxu1 %v5090_v7  ;;  %v1152_v25 = vld [vmem:[%s5712_s8] sm:$0xff]  ;;  %s6342_s28 = sld [smem:[#allocation21_spill]]  ;;  %s6343_s2 = sld [smem:[#allocation22_spill]] }
 0x11d   : > { %5092 = vmatprep.subr.bf16.mxu1 %v5653_v0  ;;  %v5099_v28 = vpack.c.bf16 %v1153_v26, %v1152_v25  ;;  %v4744_v55 = vld [vmem:[%s5717_s14] ss:$0 sm:$0xff]  ;;  %s4798_s0 = sshll.u32 %s6358_s22, 4 }
 0x11f   : > { %4897 = vmatmul.mubr.msk.f32.vlgmr.msra.gmra.mrb[0].mxu1 %vm1168_vm1, %v1141_v12  ;;  %5100 = vmatpush3.bf16.msra.mxu0 %v5099_v28 }
 0x120   : > { %5094 = vmatpush3.bf16.msra.mxu1 %v5093_v13  ;;  %4907 = vmatprep.mubr.msk.f32.mxu1 %vm5654_vm0, %v5655_v1 }
 0x121   : > { %5095 = vmatprep.subr.bf16.mxu1 %v5653_v0  ;;  %5101 = vmatprep.subr.bf16.mxu0 %v5653_v0 }
 0x123   : > { %5103 = vmatpush3.bf16.msra.mxu0 %v5102_v30 }
 0x124   : > { %5097 = vmatpush3.bf16.msra.mxu1 %v5096_v16  ;;  %4931 = vmatprep.subr.mxu0 %v5655_v1 }
 0x125   : > { %4921 = vmatprep.subr.mxu1 %v5655_v1 }
 0x126   : > { %4919 = vmatmul.mubr.msk.f32.vlgmr.msra.gmra.mrb[0].mxu0 %vm1168_vm1, %v6015_v8 }
 0x127   : > { %4908 = vmatmul.mubr.msk.f32.vlgmr.msra.gmra.mrb[2].mxu1 %vm1168_vm1, %v1141_v12  ;;  %4933 = vmatprep.mubr.msk.f32.mxu0 %vm5654_vm0, %v5655_v1 }
 0x128   : > { %4923 = vmatprep.mubr.msk.f32.mxu1 %vm5654_vm0, %v5655_v1 }
 0x1f2   : > { %v1238_v17 = vpop.f32.mrb[0].mxu1 }
 0x1f3   : > { %v4898_v18 = vpop.f32.mrb[1].mxu1  ;;  %v1239_v24 = vadd.f32 %v4740_v23, %v1238_v17 }
 0x1f9   : > { %v1393_v41 = vpop.f32.mrb[0].mxu0 }
 0x1fa   : > { %v1314_v20 = vpop.f32.mrb[2].mxu1  ;;  %v4920_v42 = vpop.f32.mrb[1].mxu0  ;;  %v1394_v56 = vadd.f32 %v4744_v55, %v1393_v41 }
 0x1fb   : > { %v1315_v21 = vadd.f32 %v4742_v19, %v1314_v20  ;;  %v4909_v22 = vpop.f32.mrb[3].mxu1 }
 0x1fd   : > { %1411 = vrot.lane.b32.xlu1 %v1315_v21, %s5656_s16  ;;  %1405 = vrot.lane.b32.xlu0 %v1315_v21, %s5657_s10 }
 0x201   : > { %1398 = vrot.lane.b32.xlu1 %v1239_v24, %s5657_s10  ;;  %1408 = vrot.lane.b32.xlu0 %v1315_v21, %s5658_s18 }
 0x205   : > { %1402 = vrot.lane.b32.xlu1 %v1239_v24, %s5656_s16  ;;  %1400 = vrot.lane.b32.xlu0 %v1239_v24, %s5658_s18 }
 0x223   : > { %1424 = vxpose.xlu0.b32.start.end [1/1] (short) (narrow) %v1315_v21, 8 }
 0x26f   : > { %v1406_v31 = vpop.permute.xlu0 %1405  ;;  %v1412_v33 = vpop.permute.xlu1 %1411 }
 0x270   : > { %1456 = vxpose.xlu1.b32.start.end [1/1] (short) (narrow) %v1406_v31, 8 }
 0x273   : > { %v1409_v32 = vpop.permute.xlu0 %1408  ;;  %v1399_v36 = vpop.permute.xlu1 %1398 }
 0x274   : > { %1488 = vxpose.xlu0.b32.start.end [1/1] (short) (narrow) %v1409_v32, 8 }
 0x277   : > { %v1401_v34 = vpop.permute.xlu0 %1400  ;;  %v1403_v37 = vpop.permute.xlu1 %1402 }
 0x278   : > { %1520 = vxpose.xlu0.b32.start.end [1/1] (short) (narrow) %v1412_v33, 8 }
 0x2a3   : > { %v1440_v35 = vpop.trf.xlu0 }
 0x2a4   : > { %4922 = vmatpush3.msra.mxu1 %v1440_v35 }
 0x2a5   : > { %4924 = vmatmul.mubr.msk.f32.vlgmr.msra.gmra.mrb[4].mxu1 %vm1552_vm2, %v1239_v24  ;;  %4926 = vmatprep.subr.mxu1 %v5655_v1 }
 0x2a6   : > { %4928 = vmatprep.mubr.msk.f32.mxu1 %vm5654_vm0, %v5655_v1 }
 0x2f0   : > { %v1472_v38 = vpop.trf.xlu1 }
 0x2f1   : > { %4927 = vmatpush3.msra.mxu1 %v1472_v38 }
 0x2f2   : > { %4929 = vmatmul.mubr.msk.f32.vlgmr.msra.gmra.mrb[6].mxu1 %vm1552_vm2, %v1399_v36  ;;  %4936 = vmatprep.subr.mxu1 %v5655_v1 }
 0x2f3   : > { %4938 = vmatprep.mubr.msk.f32.mxu1 %vm5654_vm0, %v5655_v1 }
 0x2f4   : > { %v1504_v39 = vpop.trf.xlu0 }
 0x2f5   : > { %4932 = vmatpush3.msra.mxu0 %v1504_v39 }
 0x2f6   : > { %4934 = vmatmul.mubr.msk.f32.vlgmr.msra.gmra.mrb[2].mxu0 %vm1552_vm2, %v1401_v34  ;;  %4941 = vmatprep.subr.mxu0 %v5655_v1 }
 0x2f7   : > { %4943 = vmatprep.mubr.msk.f32.mxu0 %vm5654_vm0, %v5655_v1 }
 0x2f8   : > { %v1536_v40 = vpop.trf.xlu0 }
 0x2f9   : > { %4937 = vmatpush3.msra.mxu1 %v1536_v40 }
 0x2fa   : > { %4939 = vmatmul.mubr.msk.f32.vlgmr.msra.gmra.mrb[8].mxu1 %vm1552_vm2, %v1403_v37  ;;  %4946 = vmatprep.subr.mxu1 %v5655_v1 }
 0x2fb   : > { %4948 = vmatprep.mubr.msk.f32.mxu1 %vm5654_vm0, %v5655_v1 }
 0x378   : > { %v1621_v43 = vpop.f32.mrb[4].mxu1 }
 0x379   : > { %v4925_v44 = vpop.f32.mrb[5].mxu1  ;;  %v1841_v45 = vsel %vm1552_vm2, %v1621_v43, -inf }
 0x37a   : > { %1842 = vmax.xlane.f32.xlu0 %v1841_v45  ;;  %v1157_v44 = vld [vmem:[%s6340_s11] sm:$0xff]  ;;  %v1158_v45 = vld [vmem:[%s6340_s11 + $0x8] sm:$0xff] }
 0x3c5   : > { %v1693_v46 = vpop.f32.mrb[6].mxu1 }
 0x3c6   : > { %v4930_v47 = vpop.f32.mrb[7].mxu1  ;;  %v1844_v48 = vsel %vm1552_vm2, %v1693_v46, -inf }
 0x3c7   : > { %1845 = vmax.xlane.f32.xlu1 %v1844_v48  ;;  %v5659_v48 = vmov 1983009808  }
 0x3c9   : > { %v1765_v49 = vpop.f32.mrb[2].mxu0 }
 0x3ca   : > { %v4935_v50 = vpop.f32.mrb[3].mxu0  ;;  %v1847_v51 = vsel %vm1552_vm2, %v1765_v49, -inf }
 0x3cb   : > { %1848 = vmax.xlane.f32.xlu1 %v1847_v51  ;;  %v2450_v50 = vlaneseq  ;;  %v5660_v51 = vmov 1934713408  }
 0x3cd   : > { %v1837_v52 = vpop.f32.mrb[8].mxu1 }
 0x3ce   : > { %v4940_v53 = vpop.f32.mrb[9].mxu1  ;;  %v1850_v54 = vsel %vm1552_vm2, %v1837_v52, -inf }
 0x3cf   : > { %1851 = vmax.xlane.f32.xlu0 %v1850_v54  ;;  %v2451_v54 = vshrl.u32 %v2450_v50, 7  ;;  %v2719_v50 = vld [vmem:[%s6341_s23 + $0x18] sm:$0xff] }
 0x3dc   : > { %1415 = vrot.lane.b32.xlu1 %v1394_v56, %s5657_s10 }
 0x3e0   : > { %1421 = vrot.lane.b32.xlu1 %v1394_v56, %s5656_s16 }
 0x3e5   : > { %1418 = vrot.lane.b32.xlu0 %v1394_v56, %s5658_s18 }
 0x407   : > { %v1843_v57 = vpop.xlane.xlu0 %1842 }
 0x408   : > { %v1853_v58 = vsub.f32 %v1621_v43, %v1843_v57 }
 0x40a   : > { %v1857_v59 = vmul.f32 1.442695, %v1853_v58 }
 0x40c   : > { %5296 = vpow2.f32 %v1857_v59 }
 0x416   : > { %v5297_v60 = vpop.eup %5296 }
 0x417   : > { %v1865_v61 = vsel %vm1552_vm2, %v5297_v60, 0.0 }
 0x418   : > { %1866 = vadd.xlane.f32.xlu1 %v1865_v61 }
 0x454   : > { %v1846_v62 = vpop.xlane.xlu1 %1845 }
 0x455   : > { %v1854_v63 = vsub.f32 %v1693_v46, %v1846_v62  ;;  %v5105_v46 = vpack.c.bf16 %v1158_v45, %v1157_v44 }
 0x457   : > { %v1859_v2 = vmul.f32 1.442695, %v1854_v63 }
 0x458   : > { %v1849_v3 = vpop.xlane.xlu1 %1848 }
 0x459   : > { %5298 = vpow2.f32 %v1859_v2  ;;  %v1855_v4 = vsub.f32 %v1765_v49, %v1849_v3  ;;  %v2448_v49 = vunpack.c.l.s4 %v5659_v48  ;;  %v2718_v48 = vld [vmem:[%s6341_s23 + $0x10] sm:$0xff] }
 0x45b   : > { %v1861_v5 = vmul.f32 1.442695, %v1855_v4  ;;  %v2449_v53 = vunpack.c.0.s8 %v2448_v49 }
 0x45c   : > { %v1852_v6 = vpop.xlane.xlu0 %1851  ;;  %v1416_v17 = vpop.permute.xlu1 %1415 }
 0x45d   : > { %5300 = vpow2.f32 %v1861_v5  ;;  %v1856_v7 = vsub.f32 %v1837_v52, %v1852_v6  ;;  %v2480_v52 = vunpack.c.l.s4 %v5660_v51  ;;  %v6105_v58 = vsub.s32 %v2449_v53, %v2451_v54 }
 0x45e   : > { %v5120_v51 = vpack.c.bf16 %v2719_v50, %v2718_v48 }
 0x45f   : > { %v1863_v10 = vmul.f32 1.442695, %v1856_v7  ;;  %v2481_v57 = vunpack.c.0.s8 %v2480_v52 }
 0x460   : > { %v1419_v18 = vpop.permute.xlu0 %1418  ;;  %v1422_v19 = vpop.permute.xlu1 %1421 }
 0x461   : > { %5302 = vpow2.f32 %v1863_v10  ;;  %v6107_v2 = vsub.s32 %v2481_v57, %v2451_v54 }
 0x463   : > { %v5299_v11 = vpop.eup %5298 }
 0x464   : > { %v1868_v12 = vsel %vm1552_vm2, %v5299_v11, 0.0 }
 0x465   : > { %1869 = vadd.xlane.f32.xlu0 %v1868_v12 }
 0x467   : > { %v5301_v13 = vpop.eup %5300 }
 0x468   : > { %v1871_v14 = vsel %vm1552_vm2, %v5301_v13, 0.0 }
 0x469   : > { %1872 = vadd.xlane.f32.xlu0 %v1871_v14  ;;  %v1160_v14 = vld [vmem:[%s6340_s11 + $0x18] sm:$0xff] }
 0x46b   : > { %v5303_v15 = vpop.eup %5302 }
 0x46c   : > { %v1874_v16 = vsel %vm1552_vm2, %v5303_v15, 0.0 }
 0x46d   : > { %1875 = vadd.xlane.f32.xlu1 %v1874_v16 }
 0x496   : > { %1885 = vxpose.xlu0.b32.start.end [1/1] (short) (narrow) %v1394_v56, 8 }
 0x49a   : > { %1949 = vxpose.xlu0.b32.start.end [1/1] (short) (narrow) %v1419_v18, 8 }
 0x49e   : > { %1981 = vxpose.xlu0.b32.start.end [1/1] (short) (narrow) %v1422_v19, 8 }
 0x4a0   : > { %1917 = vxpose.xlu1.b32.start.end [1/1] (short) (narrow) %v1416_v17, 8 }
 0x4a5   : > { %v1867_v20 = vpop.xlane.xlu1 %1866 }
 0x4a6   : > { %5304 = vrcp.f32 %v1867_v20 }
 0x4b0   : > { %v5305_v21 = vpop.eup %5304 }
 0x4b1   : > { %v1881_v22 = vmul.f32 %v5305_v21, %v5297_v60 }
 0x4b3   : > { %4942 = vmatpush3.xpose.msk.msra.mxu0 %vm1552_vm2, %v1881_v22 }
 0x4b4   : > { %4951 = vmatprep.subr.mxu0 %v5655_v1 }
 0x4f2   : > { %v1870_v23 = vpop.xlane.xlu0 %1869 }
 0x4f3   : > { %5306 = vrcp.f32 %v1870_v23 }
 0x4f6   : > { %v1873_v26 = vpop.xlane.xlu0 %1872 }
 0x4f7   : > { %5308 = vrcp.f32 %v1873_v26 }
 0x4fa   : > { %v1876_v27 = vpop.xlane.xlu1 %1875 }
 0x4fb   : > { %5310 = vrcp.f32 %v1876_v27 }
 0x4fd   : > { %v5307_v24 = vpop.eup %5306 }
 0x4fe   : > { %v1882_v25 = vmul.f32 %v5307_v24, %v5299_v11 }
 0x500   : > { %4947 = vmatpush3.xpose.msk.msra.mxu1 %vm1552_vm2, %v1882_v25 }
 0x501   : > { %4956 = vmatprep.subr.mxu1 %v5655_v1  ;;  %v5309_v28 = vpop.eup %5308 }
 0x502   : > { %v1883_v29 = vmul.f32 %v5309_v28, %v5301_v13  ;;  %v1159_v13 = vld [vmem:[%s6340_s11 + $0x10] sm:$0xff] }
 0x503   : > { %v5108_v19 = vpack.c.bf16 %v1160_v14, %v1159_v13 }
 0x505   : > { %v5311_v32 = vpop.eup %5310 }
 0x506   : > { %v1884_v33 = vmul.f32 %v5311_v32, %v5303_v15 }
 0x516   : > { %v1901_v30 = vpop.trf.xlu0 }
 0x517   : > { %4944 = vmatmul.mubr.msk.f32.vlgmr.msra.gmra.mrb[4].mxu0 %vm1552_vm2, %v1901_v30 }
 0x518   : > { %4952 = vmatpush3.xpose.msk.msra.mxu0 %vm1552_vm2, %v1883_v29  ;;  %4953 = vmatprep.mubr.msk.f32.mxu0 %vm5654_vm0, %v5655_v1 }
 0x519   : > { %5104 = vmatprep.subr.bf16.mxu0 %v5653_v0 }
 0x51a   : > { %v1965_v31 = vpop.trf.xlu0 }
 0x51b   : > { %4954 = vmatmul.mubr.msk.f32.vlgmr.msra.gmra.mrb[6].mxu0 %vm1552_vm2, %v1965_v31 }
 0x51c   : > { %4969 = vmatprep.mubr.msk.f32.mxu0 %vm5654_vm0, %v5655_v1  ;;  %5106 = vmatpush3.bf16.msra.mxu0 %v5105_v46  ;;  %v2716_v46 = vld [vmem:[%s6341_s23] sm:$0xff] }
 0x51d   : > { %5107 = vmatprep.subr.bf16.mxu0 %v5653_v0 }
 0x51e   : > { %v1997_v35 = vpop.trf.xlu0 }
 0x520   : > { %v1933_v34 = vpop.trf.xlu1  ;;  %5109 = vmatpush3.bf16.msra.mxu0 %v5108_v19 }
 0x521   : > { %4949 = vmatmul.mubr.msk.f32.vlgmr.msra.gmra.mrb[10].mxu1 %vm1552_vm2, %v1933_v34 }
 0x522   : > { %4957 = vmatpush3.xpose.msk.msra.mxu1 %vm1552_vm2, %v1884_v33  ;;  %4958 = vmatprep.mubr.msk.f32.mxu1 %vm5654_vm0, %v5655_v1 }
 0x523   : > { %5110 = vmatprep.subr.bf16.mxu1 %v5653_v0 }
 0x525   : > { %4959 = vmatmul.mubr.msk.f32.vlgmr.msra.gmra.mrb[12].mxu1 %vm1552_vm2, %v1997_v35 }
 0x526   : > { %4980 = vmatprep.mubr.msk.f32.mxu1 %vm5654_vm0, %v5655_v1 }
 0x5ea   : > { %v2085_v36 = vpop.f32.mrb[4].mxu0 }
 0x5eb   : > { %v4945_v37 = vpop.f32.mrb[5].mxu0  ;;  %2317 = vxpose.xlu1.b32.start.end [1/1] (short) (narrow) %v2085_v36, 8 }
 0x5ee   : > { %v2237_v38 = vpop.f32.mrb[6].mxu0 }
 0x5ef   : > { %v4955_v39 = vpop.f32.mrb[7].mxu0  ;;  %2381 = vxpose.xlu1.b32.start.end [1/1] (short) (narrow) %v2237_v38, 8 }
 0x5f4   : > { %v2161_v40 = vpop.f32.mrb[10].mxu1 }
 0x5f5   : > { %2349 = vxpose.xlu0.b32.start.end [1/1] (short) (narrow) %v2161_v40, 8  ;;  %v4950_v41 = vpop.f32.mrb[11].mxu1 }
 0x5f8   : > { %v2313_v42 = vpop.f32.mrb[12].mxu1 }
 0x5f9   : > { %2413 = vxpose.xlu0.b32.start.end [1/1] (short) (narrow) %v2313_v42, 8  ;;  %v4960_v43 = vpop.f32.mrb[13].mxu1 }
 0x66b   : > { %v2333_v47 = vpop.trf.xlu1 }
 0x66f   : > { %v2397_v55 = vpop.trf.xlu1 }
 0x670   : > { %v2445_v59 = vcombine.low %v2333_v47, %v2397_v55  ;;  %v2446_v60 = vcombine.high %v2333_v47, %v2397_v55  ;;  %v2717_v47 = vld [vmem:[%s6341_s23 + $0x8] sm:$0xff] }
 0x671   : > { %v5116_v49 = vpack.c.bf16 %v2717_v47, %v2716_v46 }
 0x672   : > { %v2453_v3 = vrot.slane %v2445_v59, %v6105_v58  ;;  %v2460_v4 = vrot.slane %v2446_v60, %v6105_v58 }
 0x673   : > { %5117 = vmatprep.subr.bf16.mxu0 %v5116_v49 }
 0x675   : > { %v2365_v56 = vpop.trf.xlu0 }
 0x679   : > { %v2429_v61 = vpop.trf.xlu0 }
 0x67a   : > { %v2461_v62 = vcombine.low %v2365_v56, %v2429_v61  ;;  %v2462_v63 = vcombine.high %v2365_v56, %v2429_v61 }
 0x67c   : > { %v2469_v5 = vrot.slane %v2461_v62, %v6105_v58  ;;  %v2476_v6 = vrot.slane %v2462_v63, %v6105_v58 }
 0x67e   : > { %v2477_v7 = vcombine.low %v2453_v3, %v2469_v5  ;;  %v2478_v10 = vcombine.high %v2453_v3, %v2469_v5  ;;  %v2493_v11 = vcombine.low %v2460_v4, %v2476_v6  ;;  %v2494_v12 = vcombine.high %v2460_v4, %v2476_v6 }
 0x680   : > { %v2485_v15 = vrot.slane %v2477_v7, %v6107_v2  ;;  %v2492_v16 = vrot.slane %v2478_v10, %v6107_v2  ;;  %v2501_v17 = vrot.slane %v2493_v11, %v6107_v2  ;;  %v2508_v18 = vrot.slane %v2494_v12, %v6107_v2 }
 0x682   : > { %v2513_v20 = vcombine.low %v2485_v15, %v2492_v16  ;;  %v4758_v21 = vcombine.high %v2485_v15, %v2492_v16  ;;  %v2529_v22 = vcombine.low %v2501_v17, %v2508_v18  ;;  %v4759_v23 = vcombine.high %v2501_v17, %v2508_v18  ;;  %v4766_v15 = vld [vmem:[#allocation2] ss:$0 sm:$0xff] }
 0x684   : > { %v2520_v24 = vrot.slane %v2513_v20, %v6105_v58  ;;  %v2528_v25 = vrot.slane %v4758_v21, %v6105_v58  ;;  %v2536_v26 = vrot.slane %v2529_v22, %v6105_v58  ;;  %v2544_v27 = vrot.slane %v4759_v23, %v6105_v58 }
 0x686   : > { %v2546_v28 = vcombine.high %v2520_v24, %v2528_v25  ;;  %v2562_v29 = vcombine.high %v2536_v26, %v2544_v27  ;;  %v2545_v30 = vcombine.low %v2520_v24, %v2528_v25  ;;  %v2561_v31 = vcombine.low %v2536_v26, %v2544_v27 }
 0x688   : > { %v2560_v32 = vrot.slane %v2546_v28, %v6107_v2  ;;  %v2576_v33 = vrot.slane %v2562_v29, %v6107_v2  ;;  %v2553_v34 = vrot.slane %v2545_v30, %v6107_v2  ;;  %v2569_v35 = vrot.slane %v2561_v31, %v6107_v2 }
 0x68a   : > { %v2579_v36 = vcombine.low %v2560_v32, %v2576_v33  ;;  %v2578_v37 = vcombine.high %v2553_v34, %v2569_v35  ;;  %v2577_v38 = vcombine.low %v2553_v34, %v2569_v35  ;;  %v2580_v39 = vcombine.high %v2560_v32, %v2576_v33 }
 0x68c   : > { %2586 = vrot.lane.b32.xlu0 %v2579_v36, %s6312_s26  ;;  %2582 = vrot.lane.b32.xlu1 %v2578_v37, %s6311_s1  ;;  %s1130_s1 = scalar_lea.vmem %s6343_s2, %s4798_s0  ;;  %s6344_s26 = sld [smem:[#allocation24_spill]] }
 0x68d   : > { %v1139_v53 = vld [vmem:[%s1130_s1] sm:$0xff]  ;;  %v1140_v56 = vld [vmem:[%s1130_s1 + $0x8] sm:$0xff]  ;;  %s6347_s1 = sld [smem:[#allocation26_spill]]  ;;  %s6353_s2 = smov 24  }
 0x690   : > { %2590 = vrot.lane.b32.xlu1 %v2580_v39, %s6310_s7  ;;  %s1125_s7 = scalar_lea.vmem %s6342_s28, %s4798_s0  ;;  %s6345_s0 = sld [smem:[#allocation27_spill]] }
 0x691   : > { %v6141_v52 = vld [vmem:[%s1125_s7] sm:$0xff]  ;;  %v6144_v55 = vld [vmem:[%s1125_s7 + $0x8] sm:$0xff]  ;;  %s6348_s7 = sld [smem:[#allocation30_spill]]  ;;  %s6349_s28 = sld [smem:[#allocation28_spill]] }
 0x692   : > { %v2709_v54 = vadd.f32 %v1139_v53, %v6141_v52  ;;  %v2710_v57 = vadd.f32 %v1140_v56, %v6144_v55  ;;  %v4760_v59 = vld [vmem:[%s6344_s26] ss:$0 sm:$0xff]  ;;  %s6346_s26 = sld [smem:[#allocation25_spill]] }
 0x693   : > { %v4763_v29 = vld [vmem:[%s6347_s1] ss:$0 sm:$0xff]  ;;  %s6355_s1 = sld [smem:[#allocation33_spill]] }
 0x696   : > { %v2711_v11 = vld [vmem:[%s6345_s0] sm:$0xff]  ;;  %v2712_v12 = vld [vmem:[%s6345_s0 + $0x8] sm:$0xff]  ;;  %v2714_v17 = vld [vmem:[%s6345_s0 + $0x18] sm:$0xff] }
 0x697   : > { %v5111_v13 = vpack.c.bf16 %v2712_v12, %v2711_v11  ;;  %v2721_v37 = vld [vmem:[%s6348_s7] sm:$0xff]  ;;  %v2723_v39 = vld [vmem:[%s6348_s7 + $0x10] sm:$0xff] }
 0x698   : > { %v4762_v27 = vld [vmem:[%s6346_s26] ss:$0 sm:$0xff]  ;;  %s6354_s26 = sld [smem:[#allocation32_spill]] }
 0x699   : > { %5112 = vmatpush3.bf16.msra.mxu1 %v5111_v13 }
 0x69a   : > { %5113 = vmatprep.subr.bf16.mxu1 %v5653_v0 }
 0x6fe   : > { %v2583_v40 = vpop.permute.xlu1 %2582  ;;  %v2587_v41 = vpop.permute.xlu0 %2586 }
 0x6ff   : > { %v2593_v42 = vsel %vm1552_vm2, %v2577_v38, %v2583_v40  ;;  %v2722_v38 = vld [vmem:[%s6348_s7 + $0x8] sm:$0xff] }
 0x700   : > { %v2595_v44 = vsel %vm2594_vm3, %v2593_v42, %v2587_v41  ;;  %v5124_v40 = vpack.c.bf16 %v2722_v38, %v2721_v37  ;;  %v2724_v41 = vld [vmem:[%s6348_s7 + $0x18] sm:$0xff] }
 0x701   : > { %v5128_v42 = vpack.c.bf16 %v2724_v41, %v2723_v39 }
 0x702   : > { %v2591_v43 = vpop.permute.xlu1 %2590 }
 0x703   : > { %v2597_v45 = vsel %vm2596_vm4, %v2595_v44, %v2591_v43  ;;  %v4764_v44 = vld [vmem:[%s6349_s28] ss:$0 sm:$0xff]  ;;  %s6356_s28 = sshll.u32 %s6358_s22, 3 }
 0x704   : > { %4970 = vmatmul.mubr.msk.f32.vlgmr.msra.gmra.mrb[8].mxu0 %vm1168_vm1, %v2597_v45 }
 0x705   : > { %5119 = vmatpush3.bf16.msra.mxu0 %v5116_v49  ;;  %4991 = vmatprep.mubr.msk.f32.mxu0 %vm1168_vm1, %v2709_v54 }
 0x706   : > { %5121 = vmatprep.subr.bf16.mxu0 %v5120_v51 }
 0x709   : > { %5123 = vmatpush3.bf16.msra.mxu0 %v5120_v51 }
 0x70a   : > { %5005 = vmatprep.subr.mxu0 %v5655_v1 }
 0x70c   : > { %4992 = vmatmul.mubr.msk.f32.vlgmr.msra.gmra.mrb[10].mxu0 %vm1168_vm1, %v2710_v57 }
 0x70d   : > { %5007 = vmatprep.mubr.msk.f32.mxu0 %vm5654_vm0, %v5655_v1 }
 0x7d7   : > { %v2673_v60 = vpop.f32.mrb[8].mxu0 }
 0x7d8   : > { %v2674_v61 = vadd.f32 %v4760_v59, %v2673_v60  ;;  %v4971_v62 = vpop.f32.mrb[9].mxu0 }
 0x7d9   : > { %v4769_v62 = vld [vmem:[#allocation4] ss:$0 sm:$0xff] }
 0x7da   : > { %v2677_v63 = vadd.f32 %v2674_v61, %v6015_v8  ;;  %v2713_v8 = vld [vmem:[%s6345_s0 + $0x10] sm:$0xff] }
 0x7db   : > { %v5114_v20 = vpack.c.bf16 %v2714_v17, %v2713_v8 }
 0x7dc   : > { %v2680_v3 = vsel %vm1168_vm1, %v2677_v63, 0.0 }
 0x7dd   : > { %2681 = vadd.xlane.f32.xlu1 %v2680_v3  ;;  %5115 = vmatpush3.bf16.msra.mxu1 %v5114_v20 }
 0x7de   : > { %5125 = vmatprep.subr.bf16.mxu1 %v5124_v40 }
 0x7df   : > { %v4993_v14 = vpop.f32.mrb[10].mxu0 }
 0x7e0   : > { %v2888_v16 = vpop.f32.mrb[11].mxu0  ;;  %v2894_v18 = vadd.f32 %v4993_v14, %v4766_v15 }
 0x7e1   : > { %v2889_v19 = vadd.f32 %v4766_v15, %v2888_v16 }
 0x7ee   : > { %2993 = vrot.lane.b32.xlu1 %v2889_v19, %s5657_s10 }
 0x7f2   : > { %2999 = vrot.lane.b32.xlu1 %v2889_v19, %s5658_s18 }
 0x7f6   : > { %3005 = vrot.lane.b32.xlu1 %v2889_v19, %s5656_s16 }
 0x7fa   : > { %3007 = vrot.lane.b32.xlu1 %v2894_v18, %s5656_s16 }
 0x823   : > { %3031 = vxpose.xlu1.b32.start [1/2] (short) (narrow) %v2889_v19, 8 }
 0x827   : > { %3032 = vxpose.xlu1.b32.end [2/2] (short) (narrow) %v2894_v18, 8 }
 0x86a   : > { %v2682_v4 = vpop.xlane.xlu1 %2681 }
 0x86b   : > { %v2684_v5 = vmul.f32 0.03125, %v2682_v4 }
 0x86d   : > { %v2685_v6 = vsub.f32 %v2677_v63, %v2684_v5 }
 0x86e   : > { %v2994_v24 = vpop.permute.xlu1 %2993 }
 0x86f   : > { %v2686_v7 = vmul.f32 %v2685_v6, %v2685_v6 }
 0x871   : > { %v2687_v10 = vsel %vm1168_vm1, %v2686_v7, 0.0 }
 0x872   : > { %2688 = vadd.xlane.f32.xlu0 %v2687_v10  ;;  %v3000_v33 = vpop.permute.xlu1 %2999 }
 0x876   : > { %v3006_v34 = vpop.permute.xlu1 %3005 }
 0x87a   : > { %v3008_v35 = vpop.permute.xlu1 %3007 }
 0x888   : > { %2995 = vrot.lane.b32.xlu0 %v2894_v18, %s5657_s10 }
 0x88c   : > { %3001 = vrot.lane.b32.xlu0 %v2894_v18, %s5658_s18 }
 0x8a3   : > { %v3047_v36 = vpop.trf.xlu1 }
 0x8a4   : > { %5006 = vmatpush3.msra.mxu0 %v3047_v36 }
 0x8a5   : > { %5015 = vmatprep.subr.mxu0 %v5655_v1 }
 0x8aa   : > { %3063 = vxpose.xlu0.b32.start [1/2] (short) (narrow) %v2994_v24, 8 }
 0x8ff   : > { %v2689_v21 = vpop.xlane.xlu0 %2688 }
 0x900   : > { %v2690_v22 = vmul.f32 0.03125, %v2689_v21 }
 0x902   : > { %v2691_v23 = vadd.f32 1e-05, %v2690_v22 }
 0x903   : > { %v2996_v25 = vpop.permute.xlu0 %2995 }
 0x904   : > { %5312 = vrsqrt.f32 %v2691_v23  ;;  %3064 = vxpose.xlu0.b32.end [2/2] (short) (narrow) %v2996_v25, 8 }
 0x90e   : > { %v5313_v26 = vpop.eup %5312 }
 0x90f   : > { %v2693_v28 = vmul.f32 %v5313_v26, %v2685_v6 }
 0x911   : > { %v2700_v30 = vmul.f32 %v4762_v27, %v2693_v28 }
 0x913   : > { %v6169_v31 = vadd.f32 %v4763_v29, %v2700_v30 }
 0x915   : > { %v2708_v32 = vadd.f32 %v6169_v31, %v6018_v9  ;;  %v3002_v9 = vpop.permute.xlu0 %3001 }
 0x917   : > { %4981 = vmatmul.mubr.msk.f32.vlgmr.msra.gmra.mrb[14].mxu1 %vm1168_vm1, %v2708_v32 }
 0x918   : > { %5002 = vmatprep.mubr.msk.f32.mxu1 %vm1168_vm1, %v6141_v52  ;;  %5127 = vmatpush3.bf16.msra.mxu1 %v5124_v40 }
 0x919   : > { %5129 = vmatprep.subr.bf16.mxu1 %v5128_v42 }
 0x91c   : > { %5131 = vmatpush3.bf16.msra.mxu1 %v5128_v42 }
 0x91d   : > { %5010 = vmatprep.subr.mxu1 %v5655_v1 }
 0x91f   : > { %5003 = vmatmul.mubr.msk.f32.vlgmr.msra.gmra.mrb[16].mxu1 %vm1168_vm1, %v6144_v55 }
 0x920   : > { %5012 = vmatprep.mubr.msk.f32.mxu1 %vm5654_vm0, %v5655_v1 }
 0x980   : > { %v3079_v43 = vpop.trf.xlu0 }
 0x981   : > { %5011 = vmatpush3.msra.mxu1 %v3079_v43 }
 0x982   : > { %5020 = vmatprep.subr.mxu1 %v5655_v1 }
 0x9ea   : > { %v2806_v45 = vpop.f32.mrb[14].mxu1 }
 0x9eb   : > { %v2807_v46 = vadd.f32 %v4764_v44, %v2806_v45  ;;  %v4982_v47 = vpop.f32.mrb[15].mxu1 }
 0x9ed   : > { %2987 = vrot.lane.b32.xlu1 %v2807_v46, %s5658_s18  ;;  %2985 = vrot.lane.b32.xlu0 %v2807_v46, %s5657_s10 }
 0x9ee   : > { %5008 = vmatmul.mubr.msk.f32.vlgmr.msra.gmra.mrb[12].mxu0 %vm1552_vm2, %v2807_v46 }
 0x9ef   : > { %5017 = vmatprep.mubr.msk.f32.mxu0 %vm5654_vm0, %v5655_v1 }
 0x9f1   : > { %2989 = vrot.lane.b32.xlu0 %v2807_v46, %s5656_s16 }
 0x9f2   : > { %v5004_v49 = vpop.f32.mrb[16].mxu1 }
 0x9f3   : > { %v2975_v50 = vpop.f32.mrb[17].mxu1  ;;  %v2981_v63 = vadd.f32 %v5004_v49, %v4769_v62 }
 0x9f4   : > { %v2976_v13 = vadd.f32 %v4769_v62, %v2975_v50 }
 0xa0f   : > { %3095 = vxpose.xlu0.b32.start [1/2] (short) (narrow) %v3000_v33, 8 }
 0xa13   : > { %3096 = vxpose.xlu0.b32.end [2/2] (short) (narrow) %v3002_v9, 8 }
 0xa16   : > { %3127 = vxpose.xlu1.b32.start [1/2] (short) (narrow) %v3006_v34, 8 }
 0xa1a   : > { %3128 = vxpose.xlu1.b32.end [2/2] (short) (narrow) %v3008_v35, 8 }
 0xa5f   : > { %v2986_v48 = vpop.permute.xlu0 %2985  ;;  %v2988_v53 = vpop.permute.xlu1 %2987 }
 0xa60   : > { %5013 = vmatmul.mubr.msk.f32.vlgmr.msra.gmra.mrb[18].mxu1 %vm1552_vm2, %v2986_v48 }
 0xa61   : > { %5022 = vmatprep.mubr.msk.f32.mxu1 %vm5654_vm0, %v5655_v1 }
 0xa63   : > { %v2990_v51 = vpop.permute.xlu0 %2989 }
 0xa8f   : > { %v3111_v52 = vpop.trf.xlu0 }
 0xa90   : > { %5016 = vmatpush3.msra.mxu0 %v3111_v52 }
 0xa91   : > { %5018 = vmatmul.mubr.msk.f32.vlgmr.msra.gmra.mrb[14].mxu0 %vm1552_vm2, %v2988_v53  ;;  %5025 = vmatprep.subr.mxu0 %v5655_v1 }
 0xa92   : > { %5027 = vmatprep.mubr.msk.f32.mxu0 %vm5654_vm0, %v5655_v1 }
 0xa96   : > { %v3143_v54 = vpop.trf.xlu1 }
 0xa97   : > { %5021 = vmatpush3.msra.mxu1 %v3143_v54 }
 0xa98   : > { %5023 = vmatmul.mubr.msk.f32.vlgmr.msra.gmra.mrb[20].mxu1 %vm1552_vm2, %v2990_v51  ;;  %5030 = vmatprep.subr.mxu1 %v5655_v1 }
 0xa99   : > { %5032 = vmatprep.mubr.msk.f32.mxu1 %vm5654_vm0, %v5655_v1 }
 0xac1   : > { %v3227_v55 = vpop.f32.mrb[12].mxu0 }
 0xac2   : > { %v5009_v56 = vpop.f32.mrb[13].mxu0  ;;  %v3447_v57 = vsel %vm2594_vm3, %v3227_v55, -inf }
 0xac3   : > { %3448 = vmax.xlane.f32.xlu0 %v3447_v57 }
 0xb33   : > { %v3299_v59 = vpop.f32.mrb[18].mxu1 }
 0xb34   : > { %v5014_v60 = vpop.f32.mrb[19].mxu1  ;;  %v3450_v61 = vsel %vm2594_vm3, %v3299_v59, -inf }
 0xb35   : > { %3451 = vmax.xlane.f32.xlu1 %v3450_v61 }
 0xb46   : > { %3015 = vrot.lane.b32.xlu1 %v2981_v63, %s5657_s10 }
 0xb50   : > { %v3449_v3 = vpop.xlane.xlu0 %3448 }
 0xb51   : > { %v3459_v4 = vsub.f32 %v3227_v55, %v3449_v3 }
 0xb53   : > { %v3463_v26 = vmul.f32 1.442695, %v3459_v4 }
 0xb64   : > { %v3371_v5 = vpop.f32.mrb[14].mxu0 }
 0xb65   : > { %v5019_v6 = vpop.f32.mrb[15].mxu0  ;;  %v3453_v7 = vsel %vm2594_vm3, %v3371_v5, -inf }
 0xb66   : > { %3454 = vmax.xlane.f32.xlu0 %v3453_v7 }
 0xb6b   : > { %v3443_v10 = vpop.f32.mrb[20].mxu1 }
 0xb6c   : > { %v5024_v11 = vpop.f32.mrb[21].mxu1  ;;  %v3456_v12 = vsel %vm2594_vm3, %v3443_v10, -inf }
 0xb6d   : > { %3457 = vmax.xlane.f32.xlu1 %v3456_v12 }
 0xb7c   : > { %3013 = vrot.lane.b32.xlu0 %v2976_v13, %s5657_s10  ;;  %s6351_s10 = smov 16  }
 0xb80   : > { %3025 = vrot.lane.b32.xlu0 %v2976_v13, %s5656_s16 }
 0xb84   : > { %3027 = vrot.lane.b32.xlu0 %v2981_v63, %s5656_s16  ;;  %s6350_s16 = sld [smem:[#allocation31_spill]] }
 0xb8a   : > { %v2726_v62 = vld [vmem:[%s6350_s16] sm:$0xff] }
 0xbc2   : > { %v3452_v14 = vpop.xlane.xlu1 %3451 }
 0xbc3   : > { %v3460_v15 = vsub.f32 %v3299_v59, %v3452_v14 }
 0xbc5   : > { %v3465_v16 = vmul.f32 1.442695, %v3460_v15 }
 0xbc6   : > { %v3016_v22 = vpop.permute.xlu1 %3015 }
 0xbc7   : > { %5314 = vpow2.f32 %v3465_v16 }
 0xbd1   : > { %v5315_v8 = vpop.eup %5314 }
 0xbd2   : > { %v3474_v17 = vsel %vm2594_vm3, %v5315_v8, 0.0 }
 0xbd3   : > { %3475 = vadd.xlane.f32.xlu0 %v3474_v17 }
 0xbf3   : > { %v3455_v18 = vpop.xlane.xlu0 %3454 }
 0xbf4   : > { %v3461_v19 = vsub.f32 %v3371_v5, %v3455_v18 }
 0xbf6   : > { %v3467_v20 = vmul.f32 1.442695, %v3461_v19 }
 0xbf7   : > { %v3014_v21 = vpop.permute.xlu0 %3013 }
 0xbf8   : > { %5316 = vpow2.f32 %v3467_v20  ;;  %3523 = vxpose.xlu1.b32.start [1/2] (short) (narrow) %v3014_v21, 8  ;;  %v2728_v21 = vld [vmem:[%s6350_s16 + $0x10] sm:$0xff] }
 0xbf9   : > { %5318 = vpow2.f32 %v3463_v26 }
 0xbfa   : > { %v3458_v25 = vpop.xlane.xlu1 %3457 }
 0xbfb   : > { %v3462_v27 = vsub.f32 %v3443_v10, %v3458_v25  ;;  %v3026_v34 = vpop.permute.xlu0 %3025 }
 0xbfc   : > { %3524 = vxpose.xlu1.b32.end [2/2] (short) (narrow) %v3016_v22, 8  ;;  %v2729_v22 = vld [vmem:[%s6350_s16 + $0x18] sm:$0xff] }
 0xbfd   : > { %v3469_v28 = vmul.f32 1.442695, %v3462_v27  ;;  %v5136_v27 = vpack.c.bf16 %v2729_v22, %v2728_v21  ;;  %v4788_v21 = vld [vmem:[#allocation7] ss:$0 sm:$0xff] }
 0xbff   : > { %5320 = vpow2.f32 %v3469_v28  ;;  %v3028_v35 = vpop.permute.xlu0 %3027 }
 0xc02   : > { %v5317_v23 = vpop.eup %5316 }
 0xc03   : > { %v3477_v24 = vsel %vm2594_vm3, %v5317_v23, 0.0  ;;  %v5319_v29 = vpop.eup %5318 }
 0xc04   : > { %3478 = vadd.xlane.f32.xlu0 %v3477_v24  ;;  %v3471_v30 = vsel %vm2594_vm3, %v5319_v29, 0.0 }
 0xc09   : > { %v5321_v32 = vpop.eup %5320 }
 0xc0a   : > { %v3480_v33 = vsel %vm2594_vm3, %v5321_v32, 0.0 }
 0xc1a   : > { %3019 = vrot.lane.b32.xlu1 %v2976_v13, %s5658_s18 }
 0xc1e   : > { %3021 = vrot.lane.b32.xlu1 %v2981_v63, %s5658_s18  ;;  %s6352_s18 = smov 8  }
 0xc31   : > { %3491 = vxpose.xlu0.b32.start [1/2] (short) (narrow) %v2976_v13, 8 }
 0xc35   : > { %3492 = vxpose.xlu0.b32.end [2/2] (short) (narrow) %v2981_v63, 8  ;;  %v2727_v63 = vld [vmem:[%s6350_s16 + $0x8] sm:$0xff] }
 0xc36   : > { %v5133_v3 = vpack.c.bf16 %v2727_v63, %v2726_v62  ;;  %v4311_v63 = vld [vmem:[%s6354_s26] sm:$0xff] }
 0xc42   : > { %3472 = vadd.xlane.f32.xlu1 %v3471_v30 }
 0xc46   : > { %3481 = vadd.xlane.f32.xlu1 %v3480_v33 }
 0xc60   : > { %v3476_v36 = vpop.xlane.xlu0 %3475 }
 0xc61   : > { %5322 = vrcp.f32 %v3476_v36 }
 0xc6b   : > { %v5323_v37 = vpop.eup %5322 }
 0xc6c   : > { %v3488_v38 = vmul.f32 %v5323_v37, %v5315_v8 }
 0xc6e   : > { %5031 = vmatpush3.xpose.msk.msra.mxu1 %vm2594_vm3, %v3488_v38 }
 0xc6f   : > { %5040 = vmatprep.subr.mxu1 %v5655_v1 }
 0xc78   : > { %v3539_v39 = vpop.trf.xlu1 }
 0xc79   : > { %3587 = vxpose.xlu1.b32.start [1/2] (short) (narrow) %v3026_v34, 8  ;;  %5033 = vmatmul.mubr.msk.f32.vlgmr.msra.gmra.mrb[22].mxu1 %vm2594_vm3, %v3539_v39 }
 0xc7a   : > { %5042 = vmatprep.mubr.msk.f32.mxu1 %vm5654_vm0, %v5655_v1 }
 0xc7d   : > { %3588 = vxpose.xlu1.b32.end [2/2] (short) (narrow) %v3028_v35, 8 }
 0xc8c   : > { %v3020_v40 = vpop.permute.xlu1 %3019 }
 0xc8d   : > { %3555 = vxpose.xlu0.b32.start [1/2] (short) (narrow) %v3020_v40, 8 }
 0xc90   : > { %v3022_v41 = vpop.permute.xlu1 %3021 }
 0xc91   : > { %3556 = vxpose.xlu0.b32.end [2/2] (short) (narrow) %v3022_v41, 8  ;;  %v3479_v42 = vpop.xlane.xlu0 %3478 }
 0xcb1   : > { %v3507_v47 = vpop.trf.xlu0 }
 0xccf   : > { %v3473_v9 = vpop.xlane.xlu1 %3472 }
 0xcd0   : > { %5324 = vrcp.f32 %v3473_v9 }
 0xcd1   : > { %5326 = vrcp.f32 %v3479_v42 }
 0xcd3   : > { %v3482_v43 = vpop.xlane.xlu1 %3481 }
 0xcd4   : > { %5328 = vrcp.f32 %v3482_v43 }
 0xcda   : > { %v5325_v44 = vpop.eup %5324 }
 0xcdb   : > { %v3487_v45 = vmul.f32 %v5325_v44, %v5319_v29  ;;  %v5327_v46 = vpop.eup %5326 }
 0xcdc   : > { %v3489_v49 = vmul.f32 %v5327_v46, %v5317_v23 }
 0xcdd   : > { %5026 = vmatpush3.xpose.msk.msra.mxu0 %vm2594_vm3, %v3487_v45 }
 0xcde   : > { %v5329_v48 = vpop.eup %5328  ;;  %5035 = vmatprep.subr.mxu0 %v5655_v1 }
 0xcdf   : > { %v3490_v50 = vmul.f32 %v5329_v48, %v5321_v32 }
 0xce0   : > { %5028 = vmatmul.mubr.msk.f32.vlgmr.msra.gmra.mrb[16].mxu0 %vm2594_vm3, %v3507_v47 }
 0xce1   : > { %5036 = vmatpush3.xpose.msk.msra.mxu0 %vm2594_vm3, %v3489_v49  ;;  %5041 = vmatpush3.xpose.msk.msra.mxu1 %vm2594_vm3, %v3490_v50 }
 0xce2   : > { %5037 = vmatprep.mubr.msk.f32.mxu0 %vm5654_vm0, %v5655_v1  ;;  %5132 = vmatprep.subr.bf16.mxu0 %v5653_v0 }
 0xce3   : > { %5138 = vmatprep.subr.bf16.mxu1 %v5653_v0 }
 0xcf9   : > { %v3603_v51 = vpop.trf.xlu1 }
 0xcfa   : > { %5043 = vmatmul.mubr.msk.f32.vlgmr.msra.gmra.mrb[24].mxu1 %vm2594_vm3, %v3603_v51 }
 0xcfb   : > { %5064 = vmatprep.mubr.msk.f32.mxu1 %vm5654_vm0, %v5655_v1 }
 0xd0d   : > { %v3571_v52 = vpop.trf.xlu0 }
 0xd0e   : > { %5038 = vmatmul.mubr.msk.f32.vlgmr.msra.gmra.mrb[18].mxu0 %vm2594_vm3, %v3571_v52 }
 0xd0f   : > { %5053 = vmatprep.mubr.msk.f32.mxu0 %vm5654_vm0, %v5655_v1  ;;  %5134 = vmatpush3.bf16.msra.mxu0 %v5133_v3  ;;  %v4312_v3 = vld [vmem:[%s6354_s26 + $0x8] sm:$0xff] }
 0xd10   : > { %5135 = vmatprep.subr.bf16.mxu0 %v5653_v0 }
 0xd13   : > { %5137 = vmatpush3.bf16.msra.mxu0 %v5136_v27  ;;  %v4403_v27 = vld [vmem:[%s6355_s1 + $0x38] sm:$0xff] }
 0xd14   : > { %5144 = vmatprep.subr.bf16.mxu0 %v5653_v0 }
 0xd4c   : > { %v3767_v53 = vpop.f32.mrb[22].mxu1 }
 0xd4d   : > { %v5034_v54 = vpop.f32.mrb[23].mxu1 }
 0xdb3   : > { %v3691_v55 = vpop.f32.mrb[16].mxu0 }
 0xdb4   : > { %3923 = vxpose.xlu0.b32.start.end [1/1] (short) (narrow) %v3691_v55, 8  ;;  %v5029_v56 = vpop.f32.mrb[17].mxu0 }
 0xdb8   : > { %3955 = vxpose.xlu0.b32.start.end [1/1] (short) (narrow) %v3767_v53, 8 }
 0xdcd   : > { %v3919_v57 = vpop.f32.mrb[24].mxu1 }
 0xdce   : > { %4019 = vxpose.xlu0.b32.start.end [1/1] (short) (narrow) %v3919_v57, 8  ;;  %v5044_v59 = vpop.f32.mrb[25].mxu1 }
 0xde1   : > { %v3843_v60 = vpop.f32.mrb[18].mxu0 }
 0xde2   : > { %3987 = vxpose.xlu1.b32.start.end [1/1] (short) (narrow) %v3843_v60, 8  ;;  %v5039_v61 = vpop.f32.mrb[19].mxu0 }
 0xe34   : > { %v3939_v4 = vpop.trf.xlu0 }
 0xe38   : > { %v3971_v5 = vpop.trf.xlu0 }
 0xe4e   : > { %v4035_v6 = vpop.trf.xlu0 }
 0xe4f   : > { %v4067_v7 = vcombine.low %v3971_v5, %v4035_v6  ;;  %v4068_v10 = vcombine.high %v3971_v5, %v4035_v6  ;;  %v4314_v5 = vld [vmem:[%s6354_s26 + $0x18] sm:$0xff] }
 0xe51   : > { %v4075_v14 = vrot.slane %v4067_v7, %v6105_v58  ;;  %v4082_v15 = vrot.slane %v4068_v10, %v6105_v58  ;;  %v4396_v7 = vld [vmem:[%s6355_s1] sm:$0xff]  ;;  %v4397_v10 = vld [vmem:[%s6355_s1 + $0x8] sm:$0xff] }
 0xe62   : > { %v4003_v11 = vpop.trf.xlu1 }
 0xe63   : > { %v4051_v12 = vcombine.low %v3939_v4, %v4003_v11  ;;  %v4052_v13 = vcombine.high %v3939_v4, %v4003_v11  ;;  %v5139_v4 = vpack.c.bf16 %v4312_v3, %v4311_v63  ;;  %v4398_v11 = vld [vmem:[%s6355_s1 + $0x10] sm:$0xff] }
 0xe65   : > { %v4059_v16 = vrot.slane %v4051_v12, %v6105_v58  ;;  %v4066_v8 = vrot.slane %v4052_v13, %v6105_v58  ;;  %5140 = vmatpush3.bf16.msra.mxu1 %v5139_v4  ;;  %v5145_v12 = vpack.c.bf16 %v4397_v10, %v4396_v7  ;;  %v4399_v13 = vld [vmem:[%s6355_s1 + $0x18] sm:$0xff] }
 0xe66   : > { %5141 = vmatprep.subr.bf16.mxu1 %v5653_v0 }
 0xe67   : > { %v4083_v17 = vcombine.low %v4059_v16, %v4075_v14  ;;  %v4084_v18 = vcombine.high %v4059_v16, %v4075_v14  ;;  %v4099_v19 = vcombine.low %v4066_v8, %v4082_v15  ;;  %v4100_v20 = vcombine.high %v4066_v8, %v4082_v15  ;;  %v4400_v15 = vld [vmem:[%s6355_s1 + $0x20] sm:$0xff]  ;;  %v4401_v16 = vld [vmem:[%s6355_s1 + $0x28] sm:$0xff] }
 0xe68   : > { %v5148_v14 = vpack.c.bf16 %v4399_v13, %v4398_v11  ;;  %v5151_v8 = vpack.c.bf16 %v4401_v16, %v4400_v15 }
 0xe69   : > { %v4091_v23 = vrot.slane %v4083_v17, %v6107_v2  ;;  %v4098_v24 = vrot.slane %v4084_v18, %v6107_v2  ;;  %v4107_v25 = vrot.slane %v4099_v19, %v6107_v2  ;;  %v4114_v26 = vrot.slane %v4100_v20, %v6107_v2 }
 0xe6b   : > { %v4119_v28 = vcombine.low %v4091_v23, %v4098_v24  ;;  %v4784_v29 = vcombine.high %v4091_v23, %v4098_v24  ;;  %v4135_v30 = vcombine.low %v4107_v25, %v4114_v26  ;;  %v4785_v32 = vcombine.high %v4107_v25, %v4114_v26  ;;  %v4789_v23 = vld [vmem:[#allocation9] ss:$0 sm:$0xff]  ;;  %v4402_v26 = vld [vmem:[%s6355_s1 + $0x30] sm:$0xff] }
 0xe6d   : > { %v4126_v33 = vrot.slane %v4119_v28, %v6105_v58  ;;  %v4134_v34 = vrot.slane %v4784_v29, %v6105_v58  ;;  %v4142_v35 = vrot.slane %v4135_v30, %v6105_v58  ;;  %v4150_v36 = vrot.slane %v4785_v32, %v6105_v58  ;;  %v4790_v29 = vld [vmem:[#allocation10] ss:$0 sm:$0xff] }
 0xe6e   : > { %v5154_v28 = vpack.c.bf16 %v4403_v27, %v4402_v26 }
 0xe6f   : > { %v4152_v37 = vcombine.high %v4126_v33, %v4134_v34  ;;  %v4168_v38 = vcombine.high %v4142_v35, %v4150_v36  ;;  %v4151_v39 = vcombine.low %v4126_v33, %v4134_v34  ;;  %v4167_v40 = vcombine.low %v4142_v35, %v4150_v36  ;;  %v4792_v34 = vld [vmem:[#allocation12] ss:$0 sm:$0xff] }
 0xe71   : > { %v4166_v41 = vrot.slane %v4152_v37, %v6107_v2  ;;  %v4182_v42 = vrot.slane %v4168_v38, %v6107_v2  ;;  %v4159_v9 = vrot.slane %v4151_v39, %v6107_v2  ;;  %v4175_v43 = vrot.slane %v4167_v40, %v6107_v2  ;;  %v4786_v2 = vld [vmem:[#allocation6] ss:$0 sm:$0xff] }
 0xe73   : > { %v4185_v44 = vcombine.low %v4166_v41, %v4182_v42  ;;  %v4184_v45 = vcombine.high %v4159_v9, %v4175_v43  ;;  %v4183_v46 = vcombine.low %v4159_v9, %v4175_v43  ;;  %v4186_v58 = vcombine.high %v4166_v41, %v4182_v42 }
 0xe75   : > { %4192 = vrot.lane.b32.xlu0 %v4185_v44, %s6351_s10  ;;  %4188 = vrot.lane.b32.xlu1 %v4184_v45, %s6352_s18  ;;  %s1134_s10 = scalar_lea.vmem %s5822_s13, %s6356_s28 }
 0xe79   : > { %4196 = vrot.lane.b32.xlu1 %v4186_v58, %s6353_s2 }
 0xee7   : > { %v4189_v47 = vpop.permute.xlu1 %4188  ;;  %v4193_v48 = vpop.permute.xlu0 %4192 }
 0xee8   : > { %v4199_v49 = vsel %vm1552_vm2, %v4183_v46, %v4189_v47  ;;  %v4794_v47 = vld [vmem:[#allocation13] ss:$0 sm:$0xff] }
 0xee9   : > { %v4200_v51 = vsel %vm2594_vm3, %v4199_v49, %v4193_v48  ;;  %v4795_v49 = vld [vmem:[#allocation15] ss:$0 sm:$0xff] }
 0xeeb   : > { %v4197_v50 = vpop.permute.xlu1 %4196 }
 0xeec   : > { %v4201_v52 = vsel %vm2596_vm4, %v4200_v51, %v4197_v50 }
 0xeed   : > { %5054 = vmatmul.mubr.msk.f32.vlgmr.msra.gmra.mrb[20].mxu0 %vm1168_vm1, %v4201_v52 }
 0xeee   : > { %5083 = vmatprep.mubr.msk.f32.mxu0 %vm5654_vm0, %v5655_v1  ;;  %5146 = vmatpush3.bf16.msra.mxu0 %v5145_v12 }
 0xeef   : > { %5147 = vmatprep.subr.bf16.mxu0 %v5653_v0 }
 0xef2   : > { %5149 = vmatpush3.bf16.msra.mxu0 %v5148_v14 }
 0xef3   : > { %5150 = vmatprep.subr.bf16.mxu0 %v5653_v0 }
 0xef6   : > { %5152 = vmatpush3.bf16.msra.mxu0 %v5151_v8 }
 0xef7   : > { %5153 = vmatprep.subr.bf16.mxu0 %v5653_v0 }
 0xefa   : > { %5155 = vmatpush3.bf16.msra.mxu0 %v5154_v28 }
 0xfc0   : > { %v4277_v53 = vpop.f32.mrb[20].mxu0 }
 0xfc1   : > { %v4278_v54 = vadd.f32 %v4786_v2, %v4277_v53  ;;  %v5055_v55 = vpop.f32.mrb[21].mxu0 }
 0xfc3   : > { %v4281_v56 = vadd.f32 %v4278_v54, %v6169_v31  ;;  %v4313_v31 = vld [vmem:[%s6354_s26 + $0x10] sm:$0xff] }
 0xfc4   : > { %v5142_v6 = vpack.c.bf16 %v4314_v5, %v4313_v31 }
 0xfc5   : > { %v4284_v57 = vsel %vm1168_vm1, %v4281_v56, 0.0 }
 0xfc6   : > { %4285 = vadd.xlane.f32.xlu1 %v4284_v57  ;;  %5143 = vmatpush3.bf16.msra.mxu1 %v5142_v6 }
0x1053   : > { %v4286_v59 = vpop.xlane.xlu1 %4285 }
0x1054   : > { %v4287_v60 = vmul.f32 0.03125, %v4286_v59 }
0x1056   : > { %v4288_v61 = vsub.f32 %v4281_v56, %v4287_v60 }
0x1058   : > { %v4289_v62 = vmul.f32 %v4288_v61, %v4288_v61 }
0x105a   : > { %v4290_v1 = vsel %vm1168_vm1, %v4289_v62, 0.0 }
0x105b   : > { %4291 = vadd.xlane.f32.xlu0 %v4290_v1 }
0x10e8   : > { %v4292_v17 = vpop.xlane.xlu0 %4291 }
0x10e9   : > { %v4293_v18 = vmul.f32 0.03125, %v4292_v17 }
0x10eb   : > { %v4294_v19 = vadd.f32 1e-05, %v4293_v18 }
0x10ed   : > { %5330 = vrsqrt.f32 %v4294_v19 }
0x10f7   : > { %v5331_v20 = vpop.eup %5330 }
0x10f8   : > { %v4296_v22 = vmul.f32 %v5331_v20, %v4288_v61 }
0x10fa   : > { %v4303_v24 = vmul.f32 %v4788_v21, %v4296_v22 }
0x10fc   : > { %v4310_v25 = vadd.f32 %v4789_v23, %v4303_v24 }
0x10fe   : > { %5065 = vmatmul.mubr.msk.f32.vlgmr.msra.gmra.mrb[26].mxu1 %vm1168_vm1, %v4310_v25 }
0x11d1   : > { %v4391_v30 = vpop.f32.mrb[26].mxu1 }
0x11d2   : > { %v4392_v32 = vadd.f32 %v4790_v29, %v4391_v30  ;;  %v5066_v0 = vpop.f32.mrb[27].mxu1 }
0x11d4   : > { %v4395_v33 = vmax.f32 %v4392_v32, 0.0 }
0x11d6   : > { %5084 = vmatmul.mubr.msk.f32.vlgmr.msra.gmra.mrb[22].mxu0 %vm4411_vm5, %v4395_v33 }
0x12a9   : > { %v4481_v35 = vpop.f32.mrb[22].mxu0 }
0x12aa   : > { %v4482_v36 = vadd.f32 %v4792_v34, %v4481_v35  ;;  %v5085_v37 = vpop.f32.mrb[23].mxu0 }
0x12ac   : > { %v4485_v38 = vadd.f32 %v4482_v36, %v4310_v25 }
0x12ae   : > { %v4488_v39 = vsel %vm1168_vm1, %v4485_v38, 0.0 }
0x12af   : > { %4489 = vadd.xlane.f32.xlu1 %v4488_v39 }
0x133c   : > { %v4490_v40 = vpop.xlane.xlu1 %4489 }
0x133d   : > { %v4491_v41 = vmul.f32 0.03125, %v4490_v40 }
0x133f   : > { %v4492_v42 = vsub.f32 %v4485_v38, %v4491_v41 }
0x1341   : > { %v4493_v9 = vmul.f32 %v4492_v42, %v4492_v42 }
0x1343   : > { %v4494_v43 = vsel %vm1168_vm1, %v4493_v9, 0.0 }
0x1344   : > { %4495 = vadd.xlane.f32.xlu0 %v4494_v43 }
0x13d1   : > { %v4496_v44 = vpop.xlane.xlu0 %4495 }
0x13d2   : > { %v4497_v45 = vmul.f32 0.03125, %v4496_v44 }
0x13d4   : > { %v4498_v46 = vadd.f32 1e-05, %v4497_v45 }
0x13d6   : > { %5332 = vrsqrt.f32 %v4498_v46 }
0x13e0   : > { %v5333_v58 = vpop.eup %5332 }
0x13e1   : > { %v4500_v48 = vmul.f32 %v5333_v58, %v4492_v42 }
0x13e3   : > { %v4507_v50 = vmul.f32 %v4794_v47, %v4500_v48 }
0x13e5   : > { %v4514_v51 = vadd.f32 %v4795_v49, %v4507_v50 }
0x13e7   : > { %4515 = vst.msk [vmem:[%s1134_s10] sm:$0xff] %vm1168_vm1, %v4514_v51 }
0x13e8 PF: > { %s80_s15 = sadd.s32 1, %s5612_s15  }
0x13e9   : > { %p77_p9 = scmp.ge.s32.totalorder %s80_s15, 4  }
0x13eb   :  { %79 = sbr.rel (!%p77_p9) target bundleno = 51 (0x33), region = 253 }
0x13f2   :  { %4535 = vsyncpa [#allocation3], 1 }
0x13f3   :  { %4537 = vsyncpa [#allocation3 + $0x1], 1 }
0x13f4   :  { %4538 = vsyncpa [#allocation5], 1 }
0x13f5   :  { %4539 = vsyncpa [#allocation8], 1 }
0x13f6   :  { %4540 = vsyncpa [#allocation11], 1 }
0x13f7   :  { %4541 = vsyncpa [#allocation14], 1 }

</bundles_post_ra>
